<compile_context>
chip_gen: v6e
topology: v6e:2x2x1
jax: 0.10.0
libtpu: 0.0.40
codegen_flags: <defaults>
</compile_context>

<pallas_src>
import jax
import jax.numpy as jnp
import numpy as np
from jax.experimental import pallas as pl
from jax.experimental.pallas import tpu as pltpu


def _make_kernel(H, W, C, K, dil, pad):
    Hp, Wp = H + 2 * pad, W + 2 * pad
    HW = H * W

    def zero_halo(buf_ref):
        # Non-overlapping strips covering the halo exactly once.
        buf_ref[0:pad, :, :] = jnp.zeros((pad, Wp, C), jnp.float32)
        buf_ref[pad + H:Hp, :, :] = jnp.zeros((Hp - pad - H, Wp, C), jnp.float32)
        buf_ref[pad:pad + H, 0:pad, :] = jnp.zeros((H, pad, C), jnp.float32)
        buf_ref[pad:pad + H, pad + W:Wp, :] = jnp.zeros((H, Wp - pad - W, C),
                                                        jnp.float32)

    def fill_slab(slab_ref, src_ref):
        # Store each dilated tap directly into the persistent im2col slab:
        # rows = output pixels (h*W + w), columns ordered (kh, kw, cin).
        for kh in range(K):
            for kw in range(K):
                t = kh * K + kw
                tap = src_ref[kh * dil:kh * dil + H,
                              kw * dil:kw * dil + W, :]          # (H, W, C)
                slab_ref[:, t * C:(t + 1) * C] = tap.reshape(HW, C)

    def kernel(x_ref, w1_ref, s1_ref, b1_ref, w2_ref, s2_ref, b2_ref,
               o_ref, xpad_ref, midpad_ref, slab_ref):
        # x_ref   : (1, C, H*W)  NCHW-native input block (lane-dense, unpadded)
        # w*_ref  : (K*K*C, C)   im2col conv weights, rows ordered (kh, kw, cin)
        # s*/b*   : (1, C)       folded BatchNorm (+conv bias) scale / bias
        # o_ref   : (1, C, H*W)  output block (lane-dense)
        # xpad_ref, midpad_ref : (Hp, Wp, C) f32 zero-haloed NHWC scratches
        # slab_ref: (H*W, K*K*C) f32 im2col slab, reused by both convs

        x = x_ref[0]                                      # (C, HW) f32

        # ---- in-kernel zero padding of the input ----
        zero_halo(xpad_ref)
        xpad_ref[pad:pad + H, pad:pad + W, :] = x.T.reshape(H, W, C)

        # ---- conv1 (single matmul) + folded BN1 + ReLU ----
        fill_slab(slab_ref, xpad_ref)
        y1 = jnp.dot(slab_ref[...], w1_ref[...],
                     preferred_element_type=jnp.float32)   # (HW, C)
        y1 = jnp.maximum(y1 * s1_ref[...] + b1_ref[...], 0.0)

        # ---- re-pad intermediate (interior fully overwritten every step) ----
        zero_halo(midpad_ref)
        midpad_ref[pad:pad + H, pad:pad + W, :] = y1.reshape(H, W, C)

        # ---- conv2 (single matmul) + folded BN2 + residual add + ReLU ----
        fill_slab(slab_ref, midpad_ref)
        y2 = jnp.dot(slab_ref[...], w2_ref[...],
                     preferred_element_type=jnp.float32)   # (HW, C)
        y2 = y2 * s2_ref[...] + b2_ref[...]

        out = jnp.maximum(y2.T + x, 0.0)                   # (C, HW) lane-dense
        o_ref[0] = out.astype(o_ref.dtype)

    return kernel


def res_block_dilated(x_nchw, params, *, size, dil):
    """x_nchw: (N, C, H, W) float32.  Returns (N, C, H, W)."""
    pad = dil
    N, C, H, W = x_nchw.shape
    K = size
    HW = H * W
    eps = 1e-5
    # The module keeps spatial size only when (K - 1) * dil == 2 * pad.
    assert (K - 1) * dil == 2 * pad, "ResBlockDilated assumes size=3 (same-size conv)"

    (w1, cb1, g1, be1, m1, v1, w2, cb2, g2, be2, m2, v2) = params

    # Free (metadata-only) reshape of the native NCHW layout; no transposes,
    # no jnp.pad — the kernel consumes the unpadded NCHW block directly.
    x_flat = x_nchw.reshape(N, C, HW)

    def prep_w(w):   # OIHW -> (K*K*Cin, Cout), rows ordered (kh, kw, cin)
        return jnp.transpose(w, (2, 3, 1, 0)).reshape(K * K * C, C)

    def fold_bn(cb, g, b, m, v):
        # Fold conv bias + inference BatchNorm into per-channel scale/bias.
        scale = g / jnp.sqrt(v + eps)
        bias = b + (cb - m) * scale
        return scale.reshape(1, C), bias.reshape(1, C)

    w1k, w2k = prep_w(w1), prep_w(w2)
    s1, b1 = fold_bn(cb1, g1, be1, m1, v1)
    s2, b2 = fold_bn(cb2, g2, be2, m2, v2)

    Hp, Wp = H + 2 * pad, W + 2 * pad
    kernel = _make_kernel(H, W, C, K, dil, pad)

    out_flat = pl.pallas_call(
        kernel,
        out_shape=jax.ShapeDtypeStruct((N, C, HW), x_nchw.dtype),
        grid_spec=pltpu.PrefetchScalarGridSpec(
            num_scalar_prefetch=0,
            grid=(N,),
            in_specs=[
                pl.BlockSpec((1, C, HW), lambda n: (n, 0, 0)),      # x (NCHW-flat)
                pl.BlockSpec((K * K * C, C), lambda n: (0, 0)),     # w1
                pl.BlockSpec((1, C), lambda n: (0, 0)),             # s1
                pl.BlockSpec((1, C), lambda n: (0, 0)),             # b1
                pl.BlockSpec((K * K * C, C), lambda n: (0, 0)),     # w2
                pl.BlockSpec((1, C), lambda n: (0, 0)),             # s2
                pl.BlockSpec((1, C), lambda n: (0, 0)),             # b2
            ],
            out_specs=pl.BlockSpec((1, C, HW), lambda n: (n, 0, 0)),
            scratch_shapes=[
                pltpu.VMEM((Hp, Wp, C), jnp.float32),   # zero-haloed input
                pltpu.VMEM((Hp, Wp, C), jnp.float32),   # zero-haloed intermediate
                pltpu.VMEM((HW, K * K * C), jnp.float32),   # im2col slab (shared)
            ],
        ),
        compiler_params=pltpu.CompilerParams(
            dimension_semantics=("parallel",)),
    )(x_flat, w1k, s1, b1, w2k, s2, b2)

    return out_flat.reshape(N, C, H, W)   # free reshape back to NCHW


def _reference(x, params, *, size, dil):
    """Pure-JAX reference (lax conv) for validation."""
    pad = dil
    eps = 1e-5
    (w1, cb1, g1, be1, m1, v1, w2, cb2, g2, be2, m2, v2) = params

    def conv(x, w, b):
        y = jax.lax.conv_general_dilated(
            x, w, window_strides=(1, 1),
            padding=[(pad, pad), (pad, pad)],
            rhs_dilation=(dil, dil),
            dimension_numbers=("NCHW", "OIHW", "NCHW"))
        return y + b[None, :, None, None]

    def bn(x, g, b, m, v):
        rs = lambda a: a[None, :, None, None]
        return (x - rs(m)) / jnp.sqrt(rs(v) + eps) * rs(g) + rs(b)

    y = jnp.maximum(bn(conv(x, w1, cb1), g1, be1, m1, v1), 0.0)
    y = bn(conv(y, w2, cb2), g2, be2, m2, v2)
    return jnp.maximum(y + x, 0.0)


if __name__ == "__main__":
    # Small shapes consistent with the module: hidden=32 channels, 16x16 spatial.
    N, C, H, W = 2, 32, 16, 16
    size, dil = 3, 2

    key = jax.random.PRNGKey(0)
    ks = jax.random.split(key, 13)

    x = jax.random.normal(ks[0], (N, C, H, W), dtype=jnp.float32)

    w1 = 0.05 * jax.random.normal(ks[1], (C, C, size, size), dtype=jnp.float32)
    cb1 = 0.1 * jax.random.normal(ks[2], (C,), dtype=jnp.float32)
    g1 = 1.0 + 0.1 * jax.random.normal(ks[3], (C,), dtype=jnp.float32)
    be1 = 0.1 * jax.random.normal(ks[4], (C,), dtype=jnp.float32)
    m1 = 0.05 * jax.random.normal(ks[5], (C,), dtype=jnp.float32)
    v1 = 1.0 + 0.1 * jax.random.uniform(ks[6], (C,), dtype=jnp.float32)

    w2 = 0.05 * jax.random.normal(ks[7], (C, C, size, size), dtype=jnp.float32)
    cb2 = 0.1 * jax.random.normal(ks[8], (C,), dtype=jnp.float32)
    g2 = 1.0 + 0.1 * jax.random.normal(ks[9], (C,), dtype=jnp.float32)
    be2 = 0.1 * jax.random.normal(ks[10], (C,), dtype=jnp.float32)
    m2 = 0.05 * jax.random.normal(ks[11], (C,), dtype=jnp.float32)
    v2 = 1.0 + 0.1 * jax.random.uniform(ks[12], (C,), dtype=jnp.float32)

    params = (w1, cb1, g1, be1, m1, v1, w2, cb2, g2, be2, m2, v2)

    out = jax.block_until_ready(res_block_dilated(x, params, size=size, dil=dil))
    ref = jax.block_until_ready(_reference(x, params, size=size, dil=dil))
    np.testing.assert_allclose(np.asarray(out), np.asarray(ref),
                               rtol=1e-4, atol=1e-4)

    print("KERNEL_OK")
</pallas_src>

<mosaic_0001>
module attributes {stable_mosaic.version = 11 : i64} {
  func.func @kernel(%arg0: i32, %arg1: memref<1x32x256xf32, #tpu.memory_space<vmem>>, %arg2: memref<288x32xf32, #tpu.memory_space<vmem>>, %arg3: memref<1x32xf32, #tpu.memory_space<vmem>>, %arg4: memref<1x32xf32, #tpu.memory_space<vmem>>, %arg5: memref<288x32xf32, #tpu.memory_space<vmem>>, %arg6: memref<1x32xf32, #tpu.memory_space<vmem>>, %arg7: memref<1x32xf32, #tpu.memory_space<vmem>>, %arg8: memref<1x32x256xf32, #tpu.memory_space<vmem>>, %arg9: memref<20x20x32xf32, #tpu.memory_space<vmem>>, %arg10: memref<20x20x32xf32, #tpu.memory_space<vmem>>, %arg11: memref<256x288xf32, #tpu.memory_space<vmem>>) attributes {dimension_semantics = [#tpu.dimension_semantics<parallel>], iteration_bounds = array<i64: 2>, scalar_prefetch = 0 : i64, scratch_operands = 3 : i64, tpu.core_type = #tpu.core_type<tc>, window_params = [{transform_indices = @transform_0, window_bounds = array<i64: 1, 32, 256>}, {pipeline_mode = #tpu.pipeline_mode<synchronous>, transform_indices = @transform_1, window_bounds = array<i64: 288, 32>}, {pipeline_mode = #tpu.pipeline_mode<synchronous>, transform_indices = @transform_2, window_bounds = array<i64: 1, 32>}, {pipeline_mode = #tpu.pipeline_mode<synchronous>, transform_indices = @transform_3, window_bounds = array<i64: 1, 32>}, {pipeline_mode = #tpu.pipeline_mode<synchronous>, transform_indices = @transform_4, window_bounds = array<i64: 288, 32>}, {pipeline_mode = #tpu.pipeline_mode<synchronous>, transform_indices = @transform_5, window_bounds = array<i64: 1, 32>}, {pipeline_mode = #tpu.pipeline_mode<synchronous>, transform_indices = @transform_6, window_bounds = array<i64: 1, 32>}, {transform_indices = @transform_7, window_bounds = array<i64: 1, 32, 256>}]} {
    %c0 = arith.constant 0 : index
    %c0_0 = arith.constant 0 : index
    %c0_1 = arith.constant 0 : index
    %0 = vector.load %arg1[%c0, %c0_0, %c0_1] : memref<1x32x256xf32, #tpu.memory_space<vmem>>, vector<1x32x256xf32>
    %1 = vector.shape_cast %0 : vector<1x32x256xf32> to vector<32x256xf32>
    %cst = arith.constant 0.000000e+00 : f32
    %2 = vector.broadcast %cst : f32 to vector<2x20x32xf32>
    %c0_2 = arith.constant 0 : index
    %c0_3 = arith.constant 0 : index
    %c0_4 = arith.constant 0 : index
    %3 = vector.load %arg9[%c0_2, %c0_3, %c0_4] : memref<20x20x32xf32, #tpu.memory_space<vmem>>, vector<2x20x32xf32>
    tpu.vector_store %arg9[%c0_2, %c0_3, %c0_4], %2 {strides = array<i32>} : memref<20x20x32xf32, #tpu.memory_space<vmem>>, vector<2x20x32xf32>,
    %cst_5 = arith.constant 0.000000e+00 : f32
    %4 = vector.broadcast %cst_5 : f32 to vector<2x20x32xf32>
    %c18 = arith.constant 18 : index
    %c0_6 = arith.constant 0 : index
    %c0_7 = arith.constant 0 : index
    %5 = vector.load %arg9[%c18, %c0_6, %c0_7] : memref<20x20x32xf32, #tpu.memory_space<vmem>>, vector<2x20x32xf32>
    tpu.vector_store %arg9[%c18, %c0_6, %c0_7], %4 {strides = array<i32>} : memref<20x20x32xf32, #tpu.memory_space<vmem>>, vector<2x20x32xf32>,
    %cst_8 = arith.constant 0.000000e+00 : f32
    %6 = vector.broadcast %cst_8 : f32 to vector<16x2x32xf32>
    %c2 = arith.constant 2 : index
    %c0_9 = arith.constant 0 : index
    %c0_10 = arith.constant 0 : index
    %7 = vector.load %arg9[%c2, %c0_9, %c0_10] : memref<20x20x32xf32, #tpu.memory_space<vmem>>, vector<16x2x32xf32>
    tpu.vector_store %arg9[%c2, %c0_9, %c0_10], %6 {strides = array<i32>} : memref<20x20x32xf32, #tpu.memory_space<vmem>>, vector<16x2x32xf32>,
    %cst_11 = arith.constant 0.000000e+00 : f32
    %8 = vector.broadcast %cst_11 : f32 to vector<16x2x32xf32>
    %c2_12 = arith.constant 2 : index
    %c18_13 = arith.constant 18 : index
    %c0_14 = arith.constant 0 : index
    %9 = vector.load %arg9[%c2_12, %c18_13, %c0_14] : memref<20x20x32xf32, #tpu.memory_space<vmem>>, vector<16x2x32xf32>
    tpu.vector_store %arg9[%c2_12, %c18_13, %c0_14], %8 {strides = array<i32>} : memref<20x20x32xf32, #tpu.memory_space<vmem>>, vector<16x2x32xf32>,
    %10 = tpu.transpose %1, [1, 0] : vector<32x256xf32> -> vector<256x32xf32>
    %11 = vector.shape_cast %10 : vector<256x32xf32> to vector<16x16x32xf32>
    %c2_15 = arith.constant 2 : index
    %c2_16 = arith.constant 2 : index
    %c0_17 = arith.constant 0 : index
    %12 = vector.load %arg9[%c2_15, %c2_16, %c0_17] : memref<20x20x32xf32, #tpu.memory_space<vmem>>, vector<16x16x32xf32>
    tpu.vector_store %arg9[%c2_15, %c2_16, %c0_17], %11 {strides = array<i32>} : memref<20x20x32xf32, #tpu.memory_space<vmem>>, vector<16x16x32xf32>,
    %c0_18 = arith.constant 0 : index
    %c0_19 = arith.constant 0 : index
    %c0_20 = arith.constant 0 : index
    %13 = vector.load %arg9[%c0_18, %c0_19, %c0_20] : memref<20x20x32xf32, #tpu.memory_space<vmem>>, vector<16x16x32xf32>
    %14 = vector.shape_cast %13 : vector<16x16x32xf32> to vector<256x32xf32>
    %c0_21 = arith.constant 0 : index
    %c0_22 = arith.constant 0 : index
    %15 = vector.load %arg11[%c0_21, %c0_22] : memref<256x288xf32, #tpu.memory_space<vmem>>, vector<256x32xf32>
    tpu.vector_store %arg11[%c0_21, %c0_22], %14 {strides = array<i32>} : memref<256x288xf32, #tpu.memory_space<vmem>>, vector<256x32xf32>,
    %c0_23 = arith.constant 0 : index
    %c2_24 = arith.constant 2 : index
    %c0_25 = arith.constant 0 : index
    %16 = vector.load %arg9[%c0_23, %c2_24, %c0_25] : memref<20x20x32xf32, #tpu.memory_space<vmem>>, vector<16x16x32xf32>
    %17 = vector.shape_cast %16 : vector<16x16x32xf32> to vector<256x32xf32>
    %c0_26 = arith.constant 0 : index
    %c32 = arith.constant 32 : index
    %18 = vector.load %arg11[%c0_26, %c32] : memref<256x288xf32, #tpu.memory_space<vmem>>, vector<256x32xf32>
    tpu.vector_store %arg11[%c0_26, %c32], %17 {strides = array<i32>} : memref<256x288xf32, #tpu.memory_space<vmem>>, vector<256x32xf32>,
    %c0_27 = arith.constant 0 : index
    %c4 = arith.constant 4 : index
    %c0_28 = arith.constant 0 : index
    %19 = vector.load %arg9[%c0_27, %c4, %c0_28] : memref<20x20x32xf32, #tpu.memory_space<vmem>>, vector<16x16x32xf32>
    %20 = vector.shape_cast %19 : vector<16x16x32xf32> to vector<256x32xf32>
    %c0_29 = arith.constant 0 : index
    %c64 = arith.constant 64 : index
    %21 = vector.load %arg11[%c0_29, %c64] : memref<256x288xf32, #tpu.memory_space<vmem>>, vector<256x32xf32>
    tpu.vector_store %arg11[%c0_29, %c64], %20 {strides = array<i32>} : memref<256x288xf32, #tpu.memory_space<vmem>>, vector<256x32xf32>,
    %c2_30 = arith.constant 2 : index
    %c0_31 = arith.constant 0 : index
    %c0_32 = arith.constant 0 : index
    %22 = vector.load %arg9[%c2_30, %c0_31, %c0_32] : memref<20x20x32xf32, #tpu.memory_space<vmem>>, vector<16x16x32xf32>
    %23 = vector.shape_cast %22 : vector<16x16x32xf32> to vector<256x32xf32>
    %c0_33 = arith.constant 0 : index
    %c96 = arith.constant 96 : index
    %24 = vector.load %arg11[%c0_33, %c96] : memref<256x288xf32, #tpu.memory_space<vmem>>, vector<256x32xf32>
    tpu.vector_store %arg11[%c0_33, %c96], %23 {strides = array<i32>} : memref<256x288xf32, #tpu.memory_space<vmem>>, vector<256x32xf32>,
    %c2_34 = arith.constant 2 : index
    %c2_35 = arith.constant 2 : index
    %c0_36 = arith.constant 0 : index
    %25 = vector.load %arg9[%c2_34, %c2_35, %c0_36] : memref<20x20x32xf32, #tpu.memory_space<vmem>>, vector<16x16x32xf32>
    %26 = vector.shape_cast %25 : vector<16x16x32xf32> to vector<256x32xf32>
    %c0_37 = arith.constant 0 : index
    %c128 = arith.constant 128 : index
    %27 = vector.load %arg11[%c0_37, %c128] : memref<256x288xf32, #tpu.memory_space<vmem>>, vector<256x32xf32>
    tpu.vector_store %arg11[%c0_37, %c128], %26 {strides = array<i32>} : memref<256x288xf32, #tpu.memory_space<vmem>>, vector<256x32xf32>,
    %c2_38 = arith.constant 2 : index
    %c4_39 = arith.constant 4 : index
    %c0_40 = arith.constant 0 : index
    %28 = vector.load %arg9[%c2_38, %c4_39, %c0_40] : memref<20x20x32xf32, #tpu.memory_space<vmem>>, vector<16x16x32xf32>
    %29 = vector.shape_cast %28 : vector<16x16x32xf32> to vector<256x32xf32>
    %c0_41 = arith.constant 0 : index
    %c160 = arith.constant 160 : index
    %30 = vector.load %arg11[%c0_41, %c160] : memref<256x288xf32, #tpu.memory_space<vmem>>, vector<256x32xf32>
    tpu.vector_store %arg11[%c0_41, %c160], %29 {strides = array<i32>} : memref<256x288xf32, #tpu.memory_space<vmem>>, vector<256x32xf32>,
    %c4_42 = arith.constant 4 : index
    %c0_43 = arith.constant 0 : index
    %c0_44 = arith.constant 0 : index
    %31 = vector.load %arg9[%c4_42, %c0_43, %c0_44] : memref<20x20x32xf32, #tpu.memory_space<vmem>>, vector<16x16x32xf32>
    %32 = vector.shape_cast %31 : vector<16x16x32xf32> to vector<256x32xf32>
    %c0_45 = arith.constant 0 : index
    %c192 = arith.constant 192 : index
    %33 = vector.load %arg11[%c0_45, %c192] : memref<256x288xf32, #tpu.memory_space<vmem>>, vector<256x32xf32>
    tpu.vector_store %arg11[%c0_45, %c192], %32 {strides = array<i32>} : memref<256x288xf32, #tpu.memory_space<vmem>>, vector<256x32xf32>,
    %c4_46 = arith.constant 4 : index
    %c2_47 = arith.constant 2 : index
    %c0_48 = arith.constant 0 : index
    %34 = vector.load %arg9[%c4_46, %c2_47, %c0_48] : memref<20x20x32xf32, #tpu.memory_space<vmem>>, vector<16x16x32xf32>
    %35 = vector.shape_cast %34 : vector<16x16x32xf32> to vector<256x32xf32>
    %c0_49 = arith.constant 0 : index
    %c224 = arith.constant 224 : index
    %36 = vector.load %arg11[%c0_49, %c224] : memref<256x288xf32, #tpu.memory_space<vmem>>, vector<256x32xf32>
    tpu.vector_store %arg11[%c0_49, %c224], %35 {strides = array<i32>} : memref<256x288xf32, #tpu.memory_space<vmem>>, vector<256x32xf32>,
    %c4_50 = arith.constant 4 : index
    %c4_51 = arith.constant 4 : index
    %c0_52 = arith.constant 0 : index
    %37 = vector.load %arg9[%c4_50, %c4_51, %c0_52] : memref<20x20x32xf32, #tpu.memory_space<vmem>>, vector<16x16x32xf32>
    %38 = vector.shape_cast %37 : vector<16x16x32xf32> to vector<256x32xf32>
    %c0_53 = arith.constant 0 : index
    %c256 = arith.constant 256 : index
    %39 = vector.load %arg11[%c0_53, %c256] : memref<256x288xf32, #tpu.memory_space<vmem>>, vector<256x32xf32>
    tpu.vector_store %arg11[%c0_53, %c256], %38 {strides = array<i32>} : memref<256x288xf32, #tpu.memory_space<vmem>>, vector<256x32xf32>,
    %c0_54 = arith.constant 0 : index
    %c0_55 = arith.constant 0 : index
    %40 = vector.load %arg11[%c0_54, %c0_55] : memref<256x288xf32, #tpu.memory_space<vmem>>, vector<256x288xf32>
    %c0_56 = arith.constant 0 : index
    %c0_57 = arith.constant 0 : index
    %41 = vector.load %arg2[%c0_56, %c0_57] : memref<288x32xf32, #tpu.memory_space<vmem>>, vector<288x32xf32>
    %cst_58 = arith.constant dense<0.000000e+00> : vector<256x32xf32>
    %42 = tpu.matmul %40, %41, %cst_58 {dimension_numbers = #tpu.dot_dimension_numbers<[1], [0], [0], [1], [0, 0, 1, 1], [], []>} : vector<256x288xf32>, vector<288x32xf32>, vector<256x32xf32> -> vector<256x32xf32>
    %c0_59 = arith.constant 0 : index
    %c0_60 = arith.constant 0 : index
    %43 = vector.load %arg3[%c0_59, %c0_60] : memref<1x32xf32, #tpu.memory_space<vmem>>, vector<1x32xf32>
    %44 = vector.broadcast %43 : vector<1x32xf32> to vector<256x32xf32>
    %45 = arith.mulf %42, %44 : vector<256x32xf32>
    %c0_61 = arith.constant 0 : index
    %c0_62 = arith.constant 0 : index
    %46 = vector.load %arg4[%c0_61, %c0_62] : memref<1x32xf32, #tpu.memory_space<vmem>>, vector<1x32xf32>
    %47 = vector.broadcast %46 : vector<1x32xf32> to vector<256x32xf32>
    %48 = arith.addf %45, %47 : vector<256x32xf32>
    %cst_63 = arith.constant 0.000000e+00 : f32
    %49 = vector.broadcast %cst_63 : f32 to vector<256x32xf32>
    %50 = arith.maximumf %48, %49 : vector<256x32xf32>
    %cst_64 = arith.constant 0.000000e+00 : f32
    %51 = vector.broadcast %cst_64 : f32 to vector<2x20x32xf32>
    %c0_65 = arith.constant 0 : index
    %c0_66 = arith.constant 0 : index
    %c0_67 = arith.constant 0 : index
    %52 = vector.load %arg10[%c0_65, %c0_66, %c0_67] : memref<20x20x32xf32, #tpu.memory_space<vmem>>, vector<2x20x32xf32>
    tpu.vector_store %arg10[%c0_65, %c0_66, %c0_67], %51 {strides = array<i32>} : memref<20x20x32xf32, #tpu.memory_space<vmem>>, vector<2x20x32xf32>,
    %cst_68 = arith.constant 0.000000e+00 : f32
    %53 = vector.broadcast %cst_68 : f32 to vector<2x20x32xf32>
    %c18_69 = arith.constant 18 : index
    %c0_70 = arith.constant 0 : index
    %c0_71 = arith.constant 0 : index
    %54 = vector.load %arg10[%c18_69, %c0_70, %c0_71] : memref<20x20x32xf32, #tpu.memory_space<vmem>>, vector<2x20x32xf32>
    tpu.vector_store %arg10[%c18_69, %c0_70, %c0_71], %53 {strides = array<i32>} : memref<20x20x32xf32, #tpu.memory_space<vmem>>, vector<2x20x32xf32>,
    %cst_72 = arith.constant 0.000000e+00 : f32
    %55 = vector.broadcast %cst_72 : f32 to vector<16x2x32xf32>
    %c2_73 = arith.constant 2 : index
    %c0_74 = arith.constant 0 : index
    %c0_75 = arith.constant 0 : index
    %56 = vector.load %arg10[%c2_73, %c0_74, %c0_75] : memref<20x20x32xf32, #tpu.memory_space<vmem>>, vector<16x2x32xf32>
    tpu.vector_store %arg10[%c2_73, %c0_74, %c0_75], %55 {strides = array<i32>} : memref<20x20x32xf32, #tpu.memory_space<vmem>>, vector<16x2x32xf32>,
    %cst_76 = arith.constant 0.000000e+00 : f32
    %57 = vector.broadcast %cst_76 : f32 to vector<16x2x32xf32>
    %c2_77 = arith.constant 2 : index
    %c18_78 = arith.constant 18 : index
    %c0_79 = arith.constant 0 : index
    %58 = vector.load %arg10[%c2_77, %c18_78, %c0_79] : memref<20x20x32xf32, #tpu.memory_space<vmem>>, vector<16x2x32xf32>
    tpu.vector_store %arg10[%c2_77, %c18_78, %c0_79], %57 {strides = array<i32>} : memref<20x20x32xf32, #tpu.memory_space<vmem>>, vector<16x2x32xf32>,
    %59 = vector.shape_cast %50 : vector<256x32xf32> to vector<16x16x32xf32>
    %c2_80 = arith.constant 2 : index
    %c2_81 = arith.constant 2 : index
    %c0_82 = arith.constant 0 : index
    %60 = vector.load %arg10[%c2_80, %c2_81, %c0_82] : memref<20x20x32xf32, #tpu.memory_space<vmem>>, vector<16x16x32xf32>
    tpu.vector_store %arg10[%c2_80, %c2_81, %c0_82], %59 {strides = array<i32>} : memref<20x20x32xf32, #tpu.memory_space<vmem>>, vector<16x16x32xf32>,
    %c0_83 = arith.constant 0 : index
    %c0_84 = arith.constant 0 : index
    %c0_85 = arith.constant 0 : index
    %61 = vector.load %arg10[%c0_83, %c0_84, %c0_85] : memref<20x20x32xf32, #tpu.memory_space<vmem>>, vector<16x16x32xf32>
    %62 = vector.shape_cast %61 : vector<16x16x32xf32> to vector<256x32xf32>
    %c0_86 = arith.constant 0 : index
    %c0_87 = arith.constant 0 : index
    %63 = vector.load %arg11[%c0_86, %c0_87] : memref<256x288xf32, #tpu.memory_space<vmem>>, vector<256x32xf32>
    tpu.vector_store %arg11[%c0_86, %c0_87], %62 {strides = array<i32>} : memref<256x288xf32, #tpu.memory_space<vmem>>, vector<256x32xf32>,
    %c0_88 = arith.constant 0 : index
    %c2_89 = arith.constant 2 : index
    %c0_90 = arith.constant 0 : index
    %64 = vector.load %arg10[%c0_88, %c2_89, %c0_90] : memref<20x20x32xf32, #tpu.memory_space<vmem>>, vector<16x16x32xf32>
    %65 = vector.shape_cast %64 : vector<16x16x32xf32> to vector<256x32xf32>
    %c0_91 = arith.constant 0 : index
    %c32_92 = arith.constant 32 : index
    %66 = vector.load %arg11[%c0_91, %c32_92] : memref<256x288xf32, #tpu.memory_space<vmem>>, vector<256x32xf32>
    tpu.vector_store %arg11[%c0_91, %c32_92], %65 {strides = array<i32>} : memref<256x288xf32, #tpu.memory_space<vmem>>, vector<256x32xf32>,
    %c0_93 = arith.constant 0 : index
    %c4_94 = arith.constant 4 : index
    %c0_95 = arith.constant 0 : index
    %67 = vector.load %arg10[%c0_93, %c4_94, %c0_95] : memref<20x20x32xf32, #tpu.memory_space<vmem>>, vector<16x16x32xf32>
    %68 = vector.shape_cast %67 : vector<16x16x32xf32> to vector<256x32xf32>
    %c0_96 = arith.constant 0 : index
    %c64_97 = arith.constant 64 : index
    %69 = vector.load %arg11[%c0_96, %c64_97] : memref<256x288xf32, #tpu.memory_space<vmem>>, vector<256x32xf32>
    tpu.vector_store %arg11[%c0_96, %c64_97], %68 {strides = array<i32>} : memref<256x288xf32, #tpu.memory_space<vmem>>, vector<256x32xf32>,
    %c2_98 = arith.constant 2 : index
    %c0_99 = arith.constant 0 : index
    %c0_100 = arith.constant 0 : index
    %70 = vector.load %arg10[%c2_98, %c0_99, %c0_100] : memref<20x20x32xf32, #tpu.memory_space<vmem>>, vector<16x16x32xf32>
    %71 = vector.shape_cast %70 : vector<16x16x32xf32> to vector<256x32xf32>
    %c0_101 = arith.constant 0 : index
    %c96_102 = arith.constant 96 : index
    %72 = vector.load %arg11[%c0_101, %c96_102] : memref<256x288xf32, #tpu.memory_space<vmem>>, vector<256x32xf32>
    tpu.vector_store %arg11[%c0_101, %c96_102], %71 {strides = array<i32>} : memref<256x288xf32, #tpu.memory_space<vmem>>, vector<256x32xf32>,
    %c2_103 = arith.constant 2 : index
    %c2_104 = arith.constant 2 : index
    %c0_105 = arith.constant 0 : index
    %73 = vector.load %arg10[%c2_103, %c2_104, %c0_105] : memref<20x20x32xf32, #tpu.memory_space<vmem>>, vector<16x16x32xf32>
    %74 = vector.shape_cast %73 : vector<16x16x32xf32> to vector<256x32xf32>
    %c0_106 = arith.constant 0 : index
    %c128_107 = arith.constant 128 : index
    %75 = vector.load %arg11[%c0_106, %c128_107] : memref<256x288xf32, #tpu.memory_space<vmem>>, vector<256x32xf32>
    tpu.vector_store %arg11[%c0_106, %c128_107], %74 {strides = array<i32>} : memref<256x288xf32, #tpu.memory_space<vmem>>, vector<256x32xf32>,
    %c2_108 = arith.constant 2 : index
    %c4_109 = arith.constant 4 : index
    %c0_110 = arith.constant 0 : index
    %76 = vector.load %arg10[%c2_108, %c4_109, %c0_110] : memref<20x20x32xf32, #tpu.memory_space<vmem>>, vector<16x16x32xf32>
    %77 = vector.shape_cast %76 : vector<16x16x32xf32> to vector<256x32xf32>
    %c0_111 = arith.constant 0 : index
    %c160_112 = arith.constant 160 : index
    %78 = vector.load %arg11[%c0_111, %c160_112] : memref<256x288xf32, #tpu.memory_space<vmem>>, vector<256x32xf32>
    tpu.vector_store %arg11[%c0_111, %c160_112], %77 {strides = array<i32>} : memref<256x288xf32, #tpu.memory_space<vmem>>, vector<256x32xf32>,
    %c4_113 = arith.constant 4 : index
    %c0_114 = arith.constant 0 : index
    %c0_115 = arith.constant 0 : index
    %79 = vector.load %arg10[%c4_113, %c0_114, %c0_115] : memref<20x20x32xf32, #tpu.memory_space<vmem>>, vector<16x16x32xf32>
    %80 = vector.shape_cast %79 : vector<16x16x32xf32> to vector<256x32xf32>
    %c0_116 = arith.constant 0 : index
    %c192_117 = arith.constant 192 : index
    %81 = vector.load %arg11[%c0_116, %c192_117] : memref<256x288xf32, #tpu.memory_space<vmem>>, vector<256x32xf32>
    tpu.vector_store %arg11[%c0_116, %c192_117], %80 {strides = array<i32>} : memref<256x288xf32, #tpu.memory_space<vmem>>, vector<256x32xf32>,
    %c4_118 = arith.constant 4 : index
    %c2_119 = arith.constant 2 : index
    %c0_120 = arith.constant 0 : index
    %82 = vector.load %arg10[%c4_118, %c2_119, %c0_120] : memref<20x20x32xf32, #tpu.memory_space<vmem>>, vector<16x16x32xf32>
    %83 = vector.shape_cast %82 : vector<16x16x32xf32> to vector<256x32xf32>
    %c0_121 = arith.constant 0 : index
    %c224_122 = arith.constant 224 : index
    %84 = vector.load %arg11[%c0_121, %c224_122] : memref<256x288xf32, #tpu.memory_space<vmem>>, vector<256x32xf32>
    tpu.vector_store %arg11[%c0_121, %c224_122], %83 {strides = array<i32>} : memref<256x288xf32, #tpu.memory_space<vmem>>, vector<256x32xf32>,
    %c4_123 = arith.constant 4 : index
    %c4_124 = arith.constant 4 : index
    %c0_125 = arith.constant 0 : index
    %85 = vector.load %arg10[%c4_123, %c4_124, %c0_125] : memref<20x20x32xf32, #tpu.memory_space<vmem>>, vector<16x16x32xf32>
    %86 = vector.shape_cast %85 : vector<16x16x32xf32> to vector<256x32xf32>
    %c0_126 = arith.constant 0 : index
    %c256_127 = arith.constant 256 : index
    %87 = vector.load %arg11[%c0_126, %c256_127] : memref<256x288xf32, #tpu.memory_space<vmem>>, vector<256x32xf32>
    tpu.vector_store %arg11[%c0_126, %c256_127], %86 {strides = array<i32>} : memref<256x288xf32, #tpu.memory_space<vmem>>, vector<256x32xf32>,
    %c0_128 = arith.constant 0 : index
    %c0_129 = arith.constant 0 : index
    %88 = vector.load %arg11[%c0_128, %c0_129] : memref<256x288xf32, #tpu.memory_space<vmem>>, vector<256x288xf32>
    %c0_130 = arith.constant 0 : index
    %c0_131 = arith.constant 0 : index
    %89 = vector.load %arg5[%c0_130, %c0_131] : memref<288x32xf32, #tpu.memory_space<vmem>>, vector<288x32xf32>
    %cst_132 = arith.constant dense<0.000000e+00> : vector<256x32xf32>
    %90 = tpu.matmul %88, %89, %cst_132 {dimension_numbers = #tpu.dot_dimension_numbers<[1], [0], [0], [1], [0, 0, 1, 1], [], []>} : vector<256x288xf32>, vector<288x32xf32>, vector<256x32xf32> -> vector<256x32xf32>
    %c0_133 = arith.constant 0 : index
    %c0_134 = arith.constant 0 : index
    %91 = vector.load %arg6[%c0_133, %c0_134] : memref<1x32xf32, #tpu.memory_space<vmem>>, vector<1x32xf32>
    %92 = vector.broadcast %91 : vector<1x32xf32> to vector<256x32xf32>
    %93 = arith.mulf %90, %92 : vector<256x32xf32>
    %c0_135 = arith.constant 0 : index
    %c0_136 = arith.constant 0 : index
    %94 = vector.load %arg7[%c0_135, %c0_136] : memref<1x32xf32, #tpu.memory_space<vmem>>, vector<1x32xf32>
    %95 = vector.broadcast %94 : vector<1x32xf32> to vector<256x32xf32>
    %96 = arith.addf %93, %95 : vector<256x32xf32>
    %97 = tpu.transpose %96, [1, 0] : vector<256x32xf32> -> vector<32x256xf32>
    %98 = arith.addf %97, %1 : vector<32x256xf32>
    %cst_137 = arith.constant 0.000000e+00 : f32
    %99 = vector.broadcast %cst_137 : f32 to vector<32x256xf32>
    %100 = arith.maximumf %98, %99 : vector<32x256xf32>
    %c0_138 = arith.constant 0 : index
    %c0_139 = arith.constant 0 : index
    %c0_140 = arith.constant 0 : index
    %101 = vector.load %arg8[%c0_138, %c0_139, %c0_140] : memref<1x32x256xf32, #tpu.memory_space<vmem>>, vector<1x32x256xf32>
    %102 = vector.shape_cast %101 : vector<1x32x256xf32> to vector<32x256xf32>
    %103 = vector.shape_cast %100 : vector<32x256xf32> to vector<1x32x256xf32>
    tpu.vector_store %arg8[%c0_138, %c0_139, %c0_140], %103 {strides = array<i32>} : memref<1x32x256xf32, #tpu.memory_space<vmem>>, vector<1x32x256xf32>,
    return
  }
  func.func @transform_0(%arg0: i32) -> (i32, i32, i32) {
    %c0_i32 = arith.constant 0 : i32
    %c0_i32_0 = arith.constant 0 : i32
    %c0_i32_1 = arith.constant 0 : i32
    return %arg0, %c0_i32, %c0_i32_0 : i32, i32, i32
  }
  func.func @transform_1(%arg0: i32) -> (i32, i32) {
    %c0_i32 = arith.constant 0 : i32
    %c0_i32_0 = arith.constant 0 : i32
    %c0_i32_1 = arith.constant 0 : i32
    return %c0_i32, %c0_i32_0 : i32, i32
  }
  func.func @transform_2(%arg0: i32) -> (i32, i32) {
    %c0_i32 = arith.constant 0 : i32
    %c0_i32_0 = arith.constant 0 : i32
    %c0_i32_1 = arith.constant 0 : i32
    return %c0_i32, %c0_i32_0 : i32, i32
  }
  func.func @transform_3(%arg0: i32) -> (i32, i32) {
    %c0_i32 = arith.constant 0 : i32
    %c0_i32_0 = arith.constant 0 : i32
    %c0_i32_1 = arith.constant 0 : i32
    return %c0_i32, %c0_i32_0 : i32, i32
  }
  func.func @transform_4(%arg0: i32) -> (i32, i32) {
    %c0_i32 = arith.constant 0 : i32
    %c0_i32_0 = arith.constant 0 : i32
    %c0_i32_1 = arith.constant 0 : i32
    return %c0_i32, %c0_i32_0 : i32, i32
  }
  func.func @transform_5(%arg0: i32) -> (i32, i32) {
    %c0_i32 = arith.constant 0 : i32
    %c0_i32_0 = arith.constant 0 : i32
    %c0_i32_1 = arith.constant 0 : i32
    return %c0_i32, %c0_i32_0 : i32, i32
  }
  func.func @transform_6(%arg0: i32) -> (i32, i32) {
    %c0_i32 = arith.constant 0 : i32
    %c0_i32_0 = arith.constant 0 : i32
    %c0_i32_1 = arith.constant 0 : i32
    return %c0_i32, %c0_i32_0 : i32, i32
  }
  func.func @transform_7(%arg0: i32) -> (i32, i32, i32) {
    %c0_i32 = arith.constant 0 : i32
    %c0_i32_0 = arith.constant 0 : i32
    %c0_i32_1 = arith.constant 0 : i32
    return %arg0, %c0_i32, %c0_i32_0 : i32, i32, i32
  }
}

</mosaic_0001>

<bundles_post_ra>
// kernel: tpu_custom_call.1
= control target key start
LH: loop header
LB: loop body
LE: loop exit
PB: predicated region body
PF: predicated region fallthrough
CT: control target
= control target key end

     0   :  { %12 = vsyncpa [#allocation6], 0  ;;  %s7979_s0 = inlined_call_operand.vmem [shape: f32[2,32,256], index: 0, kind: input, shape index: {}]   ;;  %s7980_s1 = inlined_call_operand.vmem [shape: f32[288,32], index: 1, kind: input, shape index: {}]   ;;  %s7981_s2 = inlined_call_operand.vmem [shape: f32[1,32], index: 2, kind: input, shape index: {}]   ;;  %s7982_s3 = inlined_call_operand.vmem [shape: f32[1,32], index: 3, kind: input, shape index: {}]   ;;  %s7983_s4 = inlined_call_operand.vmem [shape: f32[288,32], index: 4, kind: input, shape index: {}]   ;;  %s7984_s5 = inlined_call_operand.vmem [shape: f32[1,32], index: 5, kind: input, shape index: {}]   ;;  %s7985_s6 = inlined_call_operand.vmem [shape: f32[1,32], index: 6, kind: input, shape index: {}]   ;;  %s7986_s7 = inlined_call_operand.hbm [shape: f32[2,32,256], index: 7, kind: output, shape index: {}]  }
   0x1   :  { %14 = vsyncpa [#allocation6 + $0x1], 0  ;;  %s5353_s24 = smov 0   ;;  %s5355_s25 = smov 0  }
   0x2   :  { %s5357_s26 = smov 0   ;;  %s5359_s27 = smov 0  }
   0x3 LB: > { %s5374_s28 = sadd.s32 4294967295, %s5304_s27   ;;  %s4909_s29 = sadd.s32 4294967294, %s5304_s27   ;;  %s5304_s27 = sphi %s5359_s27, %s8041_s27   ;;  %s5300_s26 = sphi %s5357_s26, %s8040_s26   ;;  %s5296_s25 = sphi %s5355_s25, %s8039_s25   ;;  %s5292_s24 = sphi %s5353_s24, %s8038_s24  }
   0x4   : > { %s5378_s30 = sadd.s32 1, %s5304_s27   ;;  %s179_s8 = sadd.s32 1, %s5300_s26 }
   0x5   : > { %s176_s9 = ssub.s32 %s5304_s27, %s5378_s30  ;;  %p189_p0 = scmp.ne.s32.totalorder %s5300_s26, %s5296_s25 }
   0x6   : > { %p177_p1 = scmp.eq.s32.totalorder %s176_s9, 0  ;;  %p190_p2 = scmp.eq.s32.totalorder %s5374_s28, 1 }
   0x7   : > { %p195_p3 = scmp.ne.s32.totalorder %s5296_s25, %s5292_s24  ;;  %p196_p4 = scmp.eq.s32.totalorder %s4909_s29, 1 }
   0x8   : > { %s5389_s10 = scalar_select %p177_p1, %s5300_s26, %s179_s8  }
   0x9   : > { %p5391_p5 = por %p190_p2, %p189_p0  ;;  %p5395_p6 = por %p196_p4, %p195_p3 }
   0xa   : > { %p4912_p7 = scmp.ge.s32.totalorder %s5304_s27, 1  ;;  %p240_p8 = scmp.lt.s32.totalorder %s5304_s27, 3 }
   0xc   : > { %p241_p9 = pnand %p4912_p7, %p240_p8 }
   0xe   : > { %244 = sbr.rel (%p241_p9) target bundleno = 1477 (0x5c5), region = 48 }
  0x13   : > { %p272_p10 = scmp.lt.s32.totalorder %s5374_s28, 1  ;;  %vm285_vm0 = vcmask 261120   ;;  %vm288_vm1 = vcmask 257024   ;;  %v7987_v0 = vmov 0.0   ;;  %vm301_vm2 = vcmask 254976   ;;  %v1909_v9 = vld [vmem:[%s7980_s1 + $0x118] sm:$0xff] }
  0x14   : > { %287 = vst.msk [vmem:[#allocation2 + $0x8] sm:$0xff] %vm285_vm0, %v7987_v0  ;;  %286 = vst.msk [vmem:[#allocation2] sm:$0xff] %vm285_vm0, %v7987_v0  ;;  %2006 = vmatprep.subr.mxu0 %v7987_v0  ;;  %5063 = vmatprep.subr.mxu1 %v1909_v9  ;;  %v1908_v10 = vld [vmem:[%s7980_s1 + $0x110] sm:$0xff]  ;;  %v1907_v11 = vld [vmem:[%s7980_s1 + $0x108] sm:$0xff]  ;;  %s5307_s9 = smov 32   ;;  %s5308_s20 = smov 64  }
  0x15   : > { %289 = vst.msk [vmem:[#allocation2 + $0x10] sm:$0xf] %vm288_vm1, %v7987_v0  ;;  %292 = vst.msk [vmem:[#allocation2 + $0x28] sm:$0xf] %vm288_vm1, %v7987_v0  ;;  %s5454_s13 = scalar_select %p272_p10, %s5374_s28, 1  ;;  %5064 = vmatpush3.msra.mxu1 %v1909_v9  ;;  %v1906_v12 = vld [vmem:[%s7980_s1 + $0x100] sm:$0xff] }
  0x16   : > { %290 = vst.msk [vmem:[#allocation2 + $0x18] sm:$0xff] %vm285_vm0, %v7987_v0  ;;  %291 = vst.msk [vmem:[#allocation2 + $0x20] sm:$0xff] %vm285_vm0, %v7987_v0  ;;  %5065 = vmatprep.subr.mxu1 %v1908_v10  ;;  %vm654_vm3 = vcmask 523520   ;;  %s5309_s15 = smov 96   ;;  %vm847_vm4 = vcmask 785920   ;;  %vm1040_vm5 = vcmask 1048320  }
  0x17   : > { %294 = vst.msk [vmem:[#allocation2 + $0x1b0] sm:$0xff] %vm285_vm0, %v7987_v0  ;;  %295 = vst.msk [vmem:[#allocation2 + $0x1b8] sm:$0xff] %vm285_vm0, %v7987_v0  ;;  %s4989_s14 = sshll.u32 %s5454_s13, 6  ;;  %5066 = vmatpush3.msra.mxu1 %v1908_v10  ;;  %s4990_s19 = sshll.u32 %s5374_s28, 10 }
  0x18   : > { %296 = vst.msk [vmem:[#allocation2 + $0x1c0] sm:$0xf] %vm288_vm1, %v7987_v0  ;;  %299 = vst.msk [vmem:[#allocation2 + $0x1d8] sm:$0xf] %vm288_vm1, %v7987_v0  ;;  %s5590_s17 = scalar_lea.vmem %s7979_s0, %s4989_s14  ;;  %5067 = vmatprep.subr.mxu1 %v1907_v11  ;;  %s269_s14 = sand.u32 1, %s5296_s25  }
  0x19   : > { %297 = vst.msk [vmem:[#allocation2 + $0x1c8] sm:$0xff] %vm285_vm0, %v7987_v0  ;;  %298 = vst.msk [vmem:[#allocation2 + $0x1d0] sm:$0xff] %vm285_vm0, %v7987_v0  ;;  %v277_v1 = vld [vmem:[%s5590_s17] sm:$0xff]  ;;  %v278_v2 = vld [vmem:[%s5590_s17 + $0x8] sm:$0xff]  ;;  %5068 = vmatpush3.msra.mxu1 %v1907_v11  ;;  %s4913_s16 = sshll.u32 %s269_s14, 6  ;;  %s7932_s29 = scalar_lea.hbm %s7986_s7, %s4990_s19 }
  0x1a   : > { %2566 = vst.msk [vmem:[#allocation3] sm:$0xff] %vm285_vm0, %v7987_v0  ;;  %2567 = vst.msk [vmem:[#allocation3 + $0x8] sm:$0xff] %vm285_vm0, %v7987_v0  ;;  %334 = vxpose.xlu0.b32.start [1/4] (short) %v277_v1, 128  ;;  %v279_v3 = vld [vmem:[%s5590_s17 + $0x10] sm:$0xff]  ;;  %366 = vxpose.xlu1.b32.start [1/4] (short) %v278_v2, 128  ;;  %v280_v4 = vld [vmem:[%s5590_s17 + $0x18] sm:$0xff]  ;;  %s7864_s18 = scalar_lea.vmem [#allocation5], %s4913_s16  ;;  %s7939_s8 = scalar_lea.sflag [#allocation6], %s269_s14 }
  0x1b   : > { %2568 = vst.msk [vmem:[#allocation3 + $0x10] sm:$0xf] %vm288_vm1, %v7987_v0  ;;  %2571 = vst.msk [vmem:[#allocation3 + $0x28] sm:$0xf] %vm288_vm1, %v7987_v0  ;;  %v281_v5 = vld [vmem:[%s5590_s17 + $0x20] sm:$0xff]  ;;  %v282_v6 = vld [vmem:[%s5590_s17 + $0x28] sm:$0xff]  ;;  %5069 = vmatprep.subr.mxu1 %v1906_v12 }
  0x1c   : > { %2569 = vst.msk [vmem:[#allocation3 + $0x18] sm:$0xff] %vm285_vm0, %v7987_v0  ;;  %2570 = vst.msk [vmem:[#allocation3 + $0x20] sm:$0xff] %vm285_vm0, %v7987_v0  ;;  %v283_v7 = vld [vmem:[%s5590_s17 + $0x30] sm:$0xff]  ;;  %v284_v8 = vld [vmem:[%s5590_s17 + $0x38] sm:$0xff]  ;;  %5070 = vmatpush3.msra.mxu1 %v1906_v12  ;;  %s4847_s21 = sshll.u32 %s7864_s18, 4  ;;  %s7934_s21 = int_to_ptr.vmem [resolvable:$true] %s4847_s21 }
  0x1d   : > { %2573 = vst.msk [vmem:[#allocation3 + $0x1b0] sm:$0xff] %vm285_vm0, %v7987_v0  ;;  %2574 = vst.msk [vmem:[#allocation3 + $0x1b8] sm:$0xff] %vm285_vm0, %v7987_v0  ;;  %4217 = vmatprep.subr.mxu1 %v7987_v0  ;;  %v495_v13 = vld [vmem:[#allocation2 + $0xa] sm:$0xff]  ;;  %v496_v14 = vld [vmem:[#allocation2 + $0x1a] sm:$0xff]  ;;  %s5244_s28 = scalar_lea.vmem %s7934_s21, 1024 }
  0x1e   : > { %2575 = vst.msk [vmem:[#allocation3 + $0x1c0] sm:$0xf] %vm288_vm1, %v7987_v0  ;;  %2578 = vst.msk [vmem:[#allocation3 + $0x1d8] sm:$0xf] %vm288_vm1, %v7987_v0  ;;  %335 = vxpose.xlu0.b32.cont [2/4] (short) %v279_v3, 128  ;;  %367 = vxpose.xlu1.b32.cont [2/4] (short) %v280_v4, 128  ;;  %v497_v15 = vld [vmem:[#allocation2 + $0x22] sm:$0xff]  ;;  %v432_v18 = vld [vmem:[#allocation2 + $0x18] sm:$0xff]  ;;  %p5245_p11 = scmp.ne.s32.totalorder %s7934_s21, %s5244_s28 }
  0x1f   : > { %2576 = vst.msk [vmem:[#allocation3 + $0x1c8] sm:$0xff] %vm285_vm0, %v7987_v0  ;;  %2577 = vst.msk [vmem:[#allocation3 + $0x1d0] sm:$0xff] %vm285_vm0, %v7987_v0  ;;  %v494_v16 = vld [vmem:[#allocation2 + $0x2] sm:$0xff] }
  0x20   : > { %320 = vst.msk [vmem:[#allocation2 + $0x72] sm:$0x3] %vm301_vm2, %v7987_v0  ;;  %302 = vst.msk [vmem:[#allocation2 + $0x30] sm:$0x3] %vm301_vm2, %v7987_v0  ;;  %v431_v17 = vld [vmem:[#allocation2 + $0x8] sm:$0xff]  ;;  %v433_v19 = vld [vmem:[#allocation2 + $0x20] sm:$0xff]  ;;  %p5246_p12 = pnand %p5245_p11, %p5391_p5 }
  0x21   : > { %303 = vst.msk [vmem:[#allocation2 + $0x48] sm:$0x3] %vm301_vm2, %v7987_v0  ;;  %304 = vst.msk [vmem:[#allocation2 + $0x60] sm:$0x3] %vm301_vm2, %v7987_v0  ;;  %v430_v20 = vld [vmem:[#allocation2] sm:$0xff] }
  0x22   : > { %305 = vst.msk [vmem:[#allocation2 + $0x78] sm:$0x3] %vm301_vm2, %v7987_v0  ;;  %306 = vst.msk [vmem:[#allocation2 + $0x90] sm:$0x3] %vm301_vm2, %v7987_v0  ;;  %336 = vxpose.xlu0.b32.cont [3/4] (short) %v281_v5, 128  ;;  %368 = vxpose.xlu1.b32.cont [3/4] (short) %v282_v6, 128  ;;  %p5247_p13 = pneg %p5246_p12 }
  0x23   : > { %307 = vst.msk [vmem:[#allocation2 + $0xa8] sm:$0x3] %vm301_vm2, %v7987_v0  ;;  %308 = vst.msk [vmem:[#allocation2 + $0xc0] sm:$0x3] %vm301_vm2, %v7987_v0 }
  0x24   : > { %309 = vst.msk [vmem:[#allocation2 + $0xd8] sm:$0x3] %vm301_vm2, %v7987_v0  ;;  %310 = vst.msk [vmem:[#allocation2 + $0xf0] sm:$0x3] %vm301_vm2, %v7987_v0 }
  0x25   : > { %311 = vst.msk [vmem:[#allocation2 + $0x108] sm:$0x3] %vm301_vm2, %v7987_v0  ;;  %312 = vst.msk [vmem:[#allocation2 + $0x120] sm:$0x3] %vm301_vm2, %v7987_v0 }
  0x26   : > { %313 = vst.msk [vmem:[#allocation2 + $0x138] sm:$0x3] %vm301_vm2, %v7987_v0  ;;  %314 = vst.msk [vmem:[#allocation2 + $0x150] sm:$0x3] %vm301_vm2, %v7987_v0  ;;  %337 = vxpose.xlu0.b32.end [4/4] (short) %v283_v7, 128  ;;  %369 = vxpose.xlu1.b32.end [4/4] (short) %v284_v8, 128 }
  0x27   : > { %315 = vst.msk [vmem:[#allocation2 + $0x168] sm:$0x3] %vm301_vm2, %v7987_v0  ;;  %316 = vst.msk [vmem:[#allocation2 + $0x180] sm:$0x3] %vm301_vm2, %v7987_v0 }
  0x28   : > { %317 = vst.msk [vmem:[#allocation2 + $0x198] sm:$0x3] %vm301_vm2, %v7987_v0  ;;  %318 = vst.msk [vmem:[#allocation2 + $0x42] sm:$0x3] %vm301_vm2, %v7987_v0 }
  0x29   : > { %319 = vst.msk [vmem:[#allocation2 + $0x5a] sm:$0x3] %vm301_vm2, %v7987_v0  ;;  %321 = vst.msk [vmem:[#allocation2 + $0x8a] sm:$0x3] %vm301_vm2, %v7987_v0 }
  0x2a   : > { %322 = vst.msk [vmem:[#allocation2 + $0xa2] sm:$0x3] %vm301_vm2, %v7987_v0  ;;  %323 = vst.msk [vmem:[#allocation2 + $0xba] sm:$0x3] %vm301_vm2, %v7987_v0 }
  0x2b   : > { %324 = vst.msk [vmem:[#allocation2 + $0xd2] sm:$0x3] %vm301_vm2, %v7987_v0  ;;  %325 = vst.msk [vmem:[#allocation2 + $0xea] sm:$0x3] %vm301_vm2, %v7987_v0 }
  0x2c   : > { %326 = vst.msk [vmem:[#allocation2 + $0x102] sm:$0x3] %vm301_vm2, %v7987_v0  ;;  %327 = vst.msk [vmem:[#allocation2 + $0x11a] sm:$0x3] %vm301_vm2, %v7987_v0 }
  0x2d   : > { %328 = vst.msk [vmem:[#allocation2 + $0x132] sm:$0x3] %vm301_vm2, %v7987_v0  ;;  %329 = vst.msk [vmem:[#allocation2 + $0x14a] sm:$0x3] %vm301_vm2, %v7987_v0 }
  0x2e   : > { %330 = vst.msk [vmem:[#allocation2 + $0x162] sm:$0x3] %vm301_vm2, %v7987_v0  ;;  %331 = vst.msk [vmem:[#allocation2 + $0x17a] sm:$0x3] %vm301_vm2, %v7987_v0 }
  0x2f   : > { %332 = vst.msk [vmem:[#allocation2 + $0x192] sm:$0x3] %vm301_vm2, %v7987_v0  ;;  %333 = vst.msk [vmem:[#allocation2 + $0x1aa] sm:$0x3] %vm301_vm2, %v7987_v0 }
  0x30   : > { %2580 = vst.msk [vmem:[#allocation3 + $0x30] sm:$0x3] %vm301_vm2, %v7987_v0  ;;  %2581 = vst.msk [vmem:[#allocation3 + $0x48] sm:$0x3] %vm301_vm2, %v7987_v0 }
  0x31   : > { %2582 = vst.msk [vmem:[#allocation3 + $0x60] sm:$0x3] %vm301_vm2, %v7987_v0  ;;  %2583 = vst.msk [vmem:[#allocation3 + $0x78] sm:$0x3] %vm301_vm2, %v7987_v0 }
  0x32   : > { %2584 = vst.msk [vmem:[#allocation3 + $0x90] sm:$0x3] %vm301_vm2, %v7987_v0  ;;  %2585 = vst.msk [vmem:[#allocation3 + $0xa8] sm:$0x3] %vm301_vm2, %v7987_v0 }
  0x33   : > { %2586 = vst.msk [vmem:[#allocation3 + $0xc0] sm:$0x3] %vm301_vm2, %v7987_v0  ;;  %2587 = vst.msk [vmem:[#allocation3 + $0xd8] sm:$0x3] %vm301_vm2, %v7987_v0 }
  0x34   : > { %2588 = vst.msk [vmem:[#allocation3 + $0xf0] sm:$0x3] %vm301_vm2, %v7987_v0  ;;  %2589 = vst.msk [vmem:[#allocation3 + $0x108] sm:$0x3] %vm301_vm2, %v7987_v0 }
  0x35   : > { %2590 = vst.msk [vmem:[#allocation3 + $0x120] sm:$0x3] %vm301_vm2, %v7987_v0  ;;  %2591 = vst.msk [vmem:[#allocation3 + $0x138] sm:$0x3] %vm301_vm2, %v7987_v0 }
  0x36   : > { %2592 = vst.msk [vmem:[#allocation3 + $0x150] sm:$0x3] %vm301_vm2, %v7987_v0  ;;  %2593 = vst.msk [vmem:[#allocation3 + $0x168] sm:$0x3] %vm301_vm2, %v7987_v0 }
  0x37   : > { %2594 = vst.msk [vmem:[#allocation3 + $0x180] sm:$0x3] %vm301_vm2, %v7987_v0  ;;  %2595 = vst.msk [vmem:[#allocation3 + $0x198] sm:$0x3] %vm301_vm2, %v7987_v0 }
  0x38   : > { %2596 = vst.msk [vmem:[#allocation3 + $0x42] sm:$0x3] %vm301_vm2, %v7987_v0  ;;  %2597 = vst.msk [vmem:[#allocation3 + $0x5a] sm:$0x3] %vm301_vm2, %v7987_v0 }
  0x39   : > { %2598 = vst.msk [vmem:[#allocation3 + $0x72] sm:$0x3] %vm301_vm2, %v7987_v0  ;;  %2599 = vst.msk [vmem:[#allocation3 + $0x8a] sm:$0x3] %vm301_vm2, %v7987_v0 }
  0x3a   : > { %2600 = vst.msk [vmem:[#allocation3 + $0xa2] sm:$0x3] %vm301_vm2, %v7987_v0  ;;  %2601 = vst.msk [vmem:[#allocation3 + $0xba] sm:$0x3] %vm301_vm2, %v7987_v0 }
  0x3b   : > { %2602 = vst.msk [vmem:[#allocation3 + $0xd2] sm:$0x3] %vm301_vm2, %v7987_v0  ;;  %2603 = vst.msk [vmem:[#allocation3 + $0xea] sm:$0x3] %vm301_vm2, %v7987_v0 }
  0x3c   : > { %2604 = vst.msk [vmem:[#allocation3 + $0x102] sm:$0x3] %vm301_vm2, %v7987_v0  ;;  %2605 = vst.msk [vmem:[#allocation3 + $0x11a] sm:$0x3] %vm301_vm2, %v7987_v0 }
  0x3d   : > { %2606 = vst.msk [vmem:[#allocation3 + $0x132] sm:$0x3] %vm301_vm2, %v7987_v0  ;;  %2607 = vst.msk [vmem:[#allocation3 + $0x14a] sm:$0x3] %vm301_vm2, %v7987_v0 }
  0x3e   : > { %2608 = vst.msk [vmem:[#allocation3 + $0x162] sm:$0x3] %vm301_vm2, %v7987_v0  ;;  %2609 = vst.msk [vmem:[#allocation3 + $0x17a] sm:$0x3] %vm301_vm2, %v7987_v0 }
  0x3f   : > { %2610 = vst.msk [vmem:[#allocation3 + $0x192] sm:$0x3] %vm301_vm2, %v7987_v0  ;;  %2611 = vst.msk [vmem:[#allocation3 + $0x1aa] sm:$0x3] %vm301_vm2, %v7987_v0 }
  0x40   : > { %463 = vst.msk [vmem:[#allocation4 + $0x18] sm:$0xff] %vm285_vm0, %v431_v17  ;;  %464 = vst.msk [vmem:[#allocation4 + $0x30] sm:$0xff] %vm285_vm0, %v432_v18 }
  0x41   : > { %465 = vst.msk [vmem:[#allocation4 + $0x48] sm:$0xff] %vm285_vm0, %v433_v19  ;;  %462 = vst.msk [vmem:[#allocation4] sm:$0xff] %vm285_vm0, %v430_v20 }
  0x74   : > { %560 = vrot.lane.b32.xlu1 %v495_v13, %s5307_s9 }
  0x78   : > { %562 = vrot.lane.b32.xlu1 %v496_v14, %s5307_s9 }
  0x7c   : > { %564 = vrot.lane.b32.xlu1 %v497_v15, %s5307_s9 }
  0x7f   : > { %558 = vrot.lane.b32.xlu0 %v494_v16, %s5307_s9 }
  0x96   : > { %v350_v21 = vpop.trf.xlu0  ;;  %v382_v22 = vpop.trf.xlu1 }
  0x97   : > { %398 = vst.msk [vmem:[#allocation2 + $0x32] sm:$0xff] %vm285_vm0, %v350_v21  ;;  %414 = vst.msk [vmem:[#allocation2 + $0xf2] sm:$0xff] %vm285_vm0, %v382_v22 }
  0x9a   : > { %v351_v23 = vpop.trf.xlu0  ;;  %v383_v24 = vpop.trf.xlu1 }
  0x9b   : > { %399 = vst.msk [vmem:[#allocation2 + $0x3a] sm:$0xff] %vm285_vm0, %v351_v23  ;;  %415 = vst.msk [vmem:[#allocation2 + $0xfa] sm:$0xff] %vm285_vm0, %v383_v24 }
  0x9e   : > { %v352_v25 = vpop.trf.xlu0  ;;  %v498_v26 = vld [vmem:[#allocation2 + $0x32] sm:$0xff]  ;;  %v384_v29 = vpop.trf.xlu1 }
  0x9f   : > { %v5625_v27 = vld [vmem:[#allocation2 + $0x30] sm:$0xff]  ;;  %400 = vst.msk [vmem:[#allocation2 + $0x4a] sm:$0xff] %vm285_vm0, %v352_v25  ;;  %566 = vrot.lane.b32.xlu1 %v498_v26, %s5307_s9  ;;  %416 = vst.msk [vmem:[#allocation2 + $0x10a] sm:$0xff] %vm285_vm0, %v384_v29 }
  0xa0   : > { %v1073_v28 = vld [vmem:[#allocation2 + $0x32] sm:$0xff]  ;;  %466 = vst.msk [vmem:[#allocation4 + $0x60] sm:$0xff] %vm285_vm0, %v5625_v27 }
  0xa1   : > { %v5631_v30 = vld [vmem:[#allocation2 + $0xf0] sm:$0xff]  ;;  %1105 = vst.msk [vmem:[#allocation4 + $0x8] sm:$0xff] %vm285_vm0, %v1073_v28 }
  0xa2   : > { %v1089_v31 = vld [vmem:[#allocation2 + $0xf2] sm:$0xff]  ;;  %482 = vst.msk [vmem:[#allocation4 + $0x1e0] sm:$0xff] %vm285_vm0, %v5631_v30  ;;  %v353_v32 = vpop.trf.xlu0  ;;  %v499_v33 = vld [vmem:[#allocation2 + $0x3a] sm:$0xff]  ;;  %v385_v36 = vpop.trf.xlu1 }
  0xa3   : > { %1121 = vst.msk [vmem:[#allocation4 + $0x188] sm:$0xff] %vm285_vm0, %v1089_v31  ;;  %401 = vst.msk [vmem:[#allocation2 + $0x52] sm:$0xff] %vm285_vm0, %v353_v32  ;;  %568 = vrot.lane.b32.xlu0 %v499_v33, %s5307_s9  ;;  %v1726_v34 = vld [vmem:[#allocation2 + $0xf4] sm:$0xff]  ;;  %v1727_v35 = vld [vmem:[#allocation2 + $0xfc] sm:$0xff] }
  0xa4   : > { %1758 = vst.msk [vmem:[#allocation4 + $0x130] sm:$0xff] %vm285_vm0, %v1726_v34  ;;  %1759 = vst.msk [vmem:[#allocation4 + $0x148] sm:$0xff] %vm285_vm0, %v1727_v35  ;;  %v5643_v37 = vld [vmem:[#allocation2 + $0x38] sm:$0xff] }
  0xa5   : > { %417 = vst.msk [vmem:[#allocation2 + $0x112] sm:$0xff] %vm285_vm0, %v385_v36  ;;  %v5645_v38 = vld [vmem:[#allocation2 + $0xf8] sm:$0xff]  ;;  %467 = vst.msk [vmem:[#allocation4 + $0x78] sm:$0xff] %vm285_vm0, %v5643_v37  ;;  %v1888_v36 = vld [vmem:[%s7980_s1 + $0x70] sm:$0xff] }
  0xa6   : > { %v5647_v39 = vld [vmem:[#allocation2 + $0xfa] sm:$0xff]  ;;  %483 = vst.msk [vmem:[#allocation4 + $0x1f8] sm:$0xff] %vm285_vm0, %v5645_v38  ;;  %v354_v41 = vpop.trf.xlu0  ;;  %v500_v42 = vld [vmem:[#allocation2 + $0x4a] sm:$0xff]  ;;  %v386_v45 = vpop.trf.xlu1  ;;  %v5757_v19 = vld [vmem:[#allocation2 + $0xf2] sm:$0xff] }
  0xa7   : > { %v1074_v40 = vld [vmem:[#allocation2 + $0x3a] sm:$0xff]  ;;  %1122 = vst.msk [vmem:[#allocation4 + $0x1a0] sm:$0xff] %vm285_vm0, %v5647_v39  ;;  %v5655_v43 = vld [vmem:[#allocation2 + $0x48] sm:$0xff]  ;;  %402 = vst.msk [vmem:[#allocation2 + $0x62] sm:$0xff] %vm285_vm0, %v354_v41  ;;  %570 = vrot.lane.b32.xlu1 %v500_v42, %s5307_s9 }
  0xa8   : > { %1106 = vst.msk [vmem:[#allocation4 + $0x20] sm:$0xff] %vm285_vm0, %v1074_v40  ;;  %v1075_v44 = vld [vmem:[#allocation2 + $0x4a] sm:$0xff]  ;;  %468 = vst.msk [vmem:[#allocation4 + $0x90] sm:$0xff] %vm285_vm0, %v5655_v43  ;;  %v1889_v32 = vld [vmem:[%s7980_s1 + $0x78] sm:$0xff] }
  0xa9   : > { %v5662_v46 = vld [vmem:[#allocation2 + $0x108] sm:$0xff]  ;;  %1107 = vst.msk [vmem:[#allocation4 + $0x38] sm:$0xff] %vm285_vm0, %v1075_v44  ;;  %418 = vst.msk [vmem:[#allocation2 + $0x122] sm:$0xff] %vm285_vm0, %v386_v45  ;;  %2007 = vmatpush1.msra.mxu0 %v1889_v32  ;;  %v515_v40 = vld [vmem:[#allocation2 + $0xfa] sm:$0xff] }
  0xaa   : > { %v5664_v47 = vld [vmem:[#allocation2 + $0x10a] sm:$0xff]  ;;  %484 = vst.msk [vmem:[#allocation4 + $0x210] sm:$0xff] %vm285_vm0, %v5662_v46  ;;  %v355_v48 = vpop.trf.xlu0  ;;  %v501_v49 = vld [vmem:[#allocation2 + $0x52] sm:$0xff]  ;;  %v387_v52 = vpop.trf.xlu1  ;;  %2008 = vmatprep.subr.mxu0 %v7987_v0 }
  0xab   : > { %1123 = vst.msk [vmem:[#allocation4 + $0x1b8] sm:$0xff] %vm285_vm0, %v5664_v47  ;;  %403 = vst.msk [vmem:[#allocation2 + $0x6a] sm:$0xff] %vm285_vm0, %v355_v48  ;;  %572 = vrot.lane.b32.xlu0 %v501_v49, %s5307_s9  ;;  %v5677_v53 = vld [vmem:[#allocation2 + $0x50] sm:$0xff]  ;;  %v1887_v42 = vld [vmem:[%s7980_s1 + $0x68] sm:$0xff]  ;;  %2009 = vmatpush1.msra.mxu0 %v1888_v36 }
  0xac   : > { %v1728_v50 = vld [vmem:[#allocation2 + $0x10c] sm:$0xff]  ;;  %v1729_v51 = vld [vmem:[#allocation2 + $0x114] sm:$0xff]  ;;  %419 = vst.msk [vmem:[#allocation2 + $0x12a] sm:$0xff] %vm285_vm0, %v387_v52  ;;  %469 = vst.msk [vmem:[#allocation4 + $0xa8] sm:$0xff] %vm285_vm0, %v5677_v53  ;;  %2010 = vmatprep.subr.mxu0 %v7987_v0 }
  0xad   : > { %1760 = vst.msk [vmem:[#allocation4 + $0x160] sm:$0xff] %vm285_vm0, %v1728_v50  ;;  %1761 = vst.msk [vmem:[#allocation4 + $0x178] sm:$0xff] %vm285_vm0, %v1729_v51  ;;  %v5681_v54 = vld [vmem:[#allocation2 + $0x110] sm:$0xff]  ;;  %v1886_v50 = vld [vmem:[%s7980_s1 + $0x60] sm:$0xff]  ;;  %2011 = vmatpush1.msra.mxu0 %v1887_v42 }
  0xae   : > { %v5683_v55 = vld [vmem:[#allocation2 + $0x112] sm:$0xff]  ;;  %v356_v57 = vpop.trf.xlu0  ;;  %v5685_v58 = vld [vmem:[#allocation2 + $0x62] sm:$0xff]  ;;  %485 = vst.msk [vmem:[#allocation4 + $0x228] sm:$0xff] %vm285_vm0, %v5681_v54  ;;  %v388_v61 = vpop.trf.xlu1  ;;  %v516_v45 = vld [vmem:[#allocation2 + $0x10a] sm:$0xff]  ;;  %2012 = vmatprep.subr.mxu0 %v7987_v0 }
  0xaf   : > { %v1076_v56 = vld [vmem:[#allocation2 + $0x52] sm:$0xff]  ;;  %v5687_v59 = vld [vmem:[#allocation2 + $0x60] sm:$0xff]  ;;  %1124 = vst.msk [vmem:[#allocation4 + $0x1d0] sm:$0xff] %vm285_vm0, %v5683_v55  ;;  %404 = vst.msk [vmem:[#allocation2 + $0x7a] sm:$0xff] %vm285_vm0, %v356_v57  ;;  %574 = vrot.lane.b32.xlu1 %v5685_v58, %s5307_s9  ;;  %2013 = vmatpush1.msra.mxu0 %v1886_v50 }
  0xb0   : > { %1108 = vst.msk [vmem:[#allocation4 + $0x50] sm:$0xff] %vm285_vm0, %v1076_v56  ;;  %v1077_v60 = vld [vmem:[#allocation2 + $0x62] sm:$0xff]  ;;  %470 = vst.msk [vmem:[#allocation4 + $0xc0] sm:$0xff] %vm285_vm0, %v5687_v59  ;;  %2014 = vmatprep.subr.mxu0 %v7987_v0 }
  0xb1   : > { %v5699_v62 = vld [vmem:[#allocation2 + $0x120] sm:$0xff]  ;;  %1109 = vst.msk [vmem:[#allocation4 + $0x68] sm:$0xff] %vm285_vm0, %v1077_v60  ;;  %420 = vst.msk [vmem:[#allocation2 + $0x13a] sm:$0xff] %vm285_vm0, %v388_v61 }
  0xb2   : > { %v5702_v63 = vld [vmem:[#allocation2 + $0x122] sm:$0xff]  ;;  %486 = vst.msk [vmem:[#allocation4 + $0x240] sm:$0xff] %vm285_vm0, %v5699_v62  ;;  %v5709_v1 = vld [vmem:[#allocation2 + $0x6c] sm:$0xff]  ;;  %v357_v2 = vpop.trf.xlu0  ;;  %v389_v7 = vpop.trf.xlu1 }
  0xb3   : > { %1125 = vst.msk [vmem:[#allocation4 + $0x1e8] sm:$0xff] %vm285_vm0, %v5702_v63  ;;  %v5711_v3 = vld [vmem:[#allocation2 + $0x6a] sm:$0xff]  ;;  %1747 = vst.msk [vmem:[#allocation4 + $0x28] sm:$0xff] %vm285_vm0, %v5709_v1 }
  0xb4   : > { %v5713_v4 = vld [vmem:[#allocation2 + $0x64] sm:$0xff]  ;;  %405 = vst.msk [vmem:[#allocation2 + $0x82] sm:$0xff] %vm285_vm0, %v357_v2  ;;  %576 = vrot.lane.b32.xlu0 %v5711_v3, %s5307_s9  ;;  %v1731_v6 = vld [vmem:[#allocation2 + $0x12c] sm:$0xff]  ;;  %421 = vst.msk [vmem:[#allocation2 + $0x142] sm:$0xff] %vm285_vm0, %v389_v7 }
  0xb5   : > { %1746 = vst.msk [vmem:[#allocation4 + $0x10] sm:$0xff] %vm285_vm0, %v5713_v4  ;;  %v1730_v5 = vld [vmem:[#allocation2 + $0x124] sm:$0xff]  ;;  %1763 = vst.msk [vmem:[#allocation4 + $0x1a8] sm:$0xff] %vm285_vm0, %v1731_v6 }
  0xb6   : > { %1762 = vst.msk [vmem:[#allocation4 + $0x190] sm:$0xff] %vm285_vm0, %v1730_v5  ;;  %v5725_v8 = vld [vmem:[#allocation2 + $0x68] sm:$0xff]  ;;  %v358_v12 = vpop.trf.xlu0  ;;  %v5733_v13 = vld [vmem:[#allocation2 + $0x7a] sm:$0xff]  ;;  %v390_v16 = vpop.trf.xlu1 }
  0xb7   : > { %471 = vst.msk [vmem:[#allocation4 + $0xd8] sm:$0xff] %vm285_vm0, %v5725_v8  ;;  %v5729_v9 = vld [vmem:[#allocation2 + $0x128] sm:$0xff]  ;;  %v5735_v14 = vld [vmem:[#allocation2 + $0x78] sm:$0xff]  ;;  %406 = vst.msk [vmem:[#allocation2 + $0x92] sm:$0xff] %vm285_vm0, %v358_v12  ;;  %578 = vrot.lane.b32.xlu1 %v5733_v13, %s5307_s9 }
  0xb8   : > { %v1078_v10 = vld [vmem:[#allocation2 + $0x6a] sm:$0xff]  ;;  %487 = vst.msk [vmem:[#allocation4 + $0x258] sm:$0xff] %vm285_vm0, %v5729_v9  ;;  %v1079_v15 = vld [vmem:[#allocation2 + $0x7a] sm:$0xff]  ;;  %472 = vst.msk [vmem:[#allocation4 + $0xf0] sm:$0xff] %vm285_vm0, %v5735_v14 }
  0xb9   : > { %v5731_v11 = vld [vmem:[#allocation2 + $0x12a] sm:$0xff]  ;;  %1110 = vst.msk [vmem:[#allocation4 + $0x80] sm:$0xff] %vm285_vm0, %v1078_v10  ;;  %v5747_v17 = vld [vmem:[#allocation2 + $0x138] sm:$0xff]  ;;  %1111 = vst.msk [vmem:[#allocation4 + $0x98] sm:$0xff] %vm285_vm0, %v1079_v15 }
  0xba   : > { %1126 = vst.msk [vmem:[#allocation4 + $0x200] sm:$0xff] %vm285_vm0, %v5731_v11  ;;  %v5750_v18 = vld [vmem:[#allocation2 + $0x13a] sm:$0xff]  ;;  %422 = vst.msk [vmem:[#allocation2 + $0x152] sm:$0xff] %vm285_vm0, %v390_v16  ;;  %v359_v22 = vpop.trf.xlu0  ;;  %v1783_v25 = vld [vmem:[#allocation4 + $0x28] sm:$0xff]  ;;  %v391_v28 = vpop.trf.xlu1 }
  0xbb   : > { %8009 = vst [vmem:[#allocation8_spill] sm:$0xff] %v5750_v18  ;;  %488 = vst.msk [vmem:[#allocation4 + $0x270] sm:$0xff] %vm285_vm0, %v5747_v17  ;;  %v5759_v20 = vld [vmem:[#allocation2 + $0x7c] sm:$0xff]  ;;  %v5761_v21 = vld [vmem:[#allocation2 + $0x84] sm:$0xff]  ;;  %598 = vrot.lane.b32.xlu1 %v5757_v19, %s5307_s9 }
  0xbc   : > { %1127 = vst.msk [vmem:[#allocation4 + $0x218] sm:$0xff] %vm285_vm0, %v5750_v18  ;;  %v1780_v23 = vld [vmem:[#allocation4 + $0x10] sm:$0xff]  ;;  %1748 = vst.msk [vmem:[#allocation4 + $0x40] sm:$0xff] %vm285_vm0, %v5759_v20  ;;  %v5771_v24 = vld [vmem:[#allocation2 + $0x82] sm:$0xff] }
  0xbd   : > { %1749 = vst.msk [vmem:[#allocation4 + $0x58] sm:$0xff] %vm285_vm0, %v5761_v21  ;;  %407 = vst.msk [vmem:[#allocation2 + $0x9a] sm:$0xff] %vm285_vm0, %v359_v22  ;;  %5071 = vmatprep.mubr.msk.f32.mxu1 %vm285_vm0, %v1780_v23  ;;  %v1732_v26 = vld [vmem:[#allocation2 + $0x13c] sm:$0xff]  ;;  %580 = vrot.lane.b32.xlu0 %v5771_v24, %s5307_s9  ;;  %v1733_v29 = vld [vmem:[#allocation2 + $0x144] sm:$0xff] }
  0xbe   : > { %5072 = vmatmul.mubr.msk.f32.vlgmr.msra.gmra.mxu1 %vm285_vm0, %v1783_v25  ;;  %1764 = vst.msk [vmem:[#allocation4 + $0x1c0] sm:$0xff] %vm285_vm0, %v1732_v26  ;;  %423 = vst.msk [vmem:[#allocation2 + $0x15a] sm:$0xff] %vm285_vm0, %v391_v28  ;;  %v5779_v31 = vld [vmem:[#allocation2 + $0x80] sm:$0xff]  ;;  %v360_v33 = vpop.trf.xlu0  ;;  %v5784_v34 = vld [vmem:[#allocation2 + $0x92] sm:$0xff]  ;;  %v392_v41 = vpop.trf.xlu1 }
  0xbf   : > { %1765 = vst.msk [vmem:[#allocation4 + $0x1d8] sm:$0xff] %vm285_vm0, %v1733_v29  ;;  %v5786_v35 = vld [vmem:[#allocation2 + $0x90] sm:$0xff]  ;;  %473 = vst.msk [vmem:[#allocation4 + $0x108] sm:$0xff] %vm285_vm0, %v5779_v31  ;;  %582 = vrot.lane.b32.xlu1 %v5784_v34, %s5307_s9  ;;  %v5802_v44 = vld [vmem:[#allocation2 + $0x140] sm:$0xff] }
  0xc0   : > { %408 = vst.msk [vmem:[#allocation2 + $0xaa] sm:$0xff] %vm285_vm0, %v360_v33  ;;  %474 = vst.msk [vmem:[#allocation4 + $0x120] sm:$0xff] %vm285_vm0, %v5786_v35  ;;  %v1080_v49 = vld [vmem:[#allocation2 + $0x82] sm:$0xff]  ;;  %v1081_v52 = vld [vmem:[#allocation2 + $0x92] sm:$0xff] }
  0xc1   : > { %8010 = vst [vmem:[#allocation9_spill] sm:$0xff] %v5802_v44  ;;  %600 = vrot.lane.b32.xlu0 %v515_v40, %s5307_s9  ;;  %424 = vst.msk [vmem:[#allocation2 + $0x16a] sm:$0xff] %vm285_vm0, %v392_v41  ;;  %v5808_v48 = vld [vmem:[#allocation2 + $0x150] sm:$0xff]  ;;  %v5817_v51 = vld [vmem:[#allocation2 + $0x142] sm:$0xff] }
  0xc2   : > { %489 = vst.msk [vmem:[#allocation4 + $0x288] sm:$0xff] %vm285_vm0, %v5802_v44  ;;  %8011 = vst [vmem:[#allocation10_spill] sm:$0xff] %v5808_v48  ;;  %v5819_v56 = vld [vmem:[#allocation2 + $0x152] sm:$0xff]  ;;  %v361_v61 = vpop.trf.xlu0  ;;  %v393_v10 = vpop.trf.xlu1  ;;  %v518_v33 = vld [vmem:[#allocation2 + $0x122] sm:$0xff] }
  0xc3   : > { %490 = vst.msk [vmem:[#allocation4 + $0x2a0] sm:$0xff] %vm285_vm0, %v5808_v48  ;;  %1112 = vst.msk [vmem:[#allocation4 + $0xb0] sm:$0xff] %vm285_vm0, %v1080_v49  ;;  %v1786_v2 = vld [vmem:[#allocation4 + $0x40] sm:$0xff]  ;;  %602 = vrot.lane.b32.xlu1 %v516_v45, %s5307_s9  ;;  %v1885_v16 = vld [vmem:[%s7980_s1 + $0x58] sm:$0xff] }
  0xc4   : > { %8012 = vst [vmem:[#allocation11_spill] sm:$0xff] %v5817_v51  ;;  %8013 = vst [vmem:[#allocation12_spill] sm:$0xff] %v5819_v56  ;;  %v5821_v57 = vld [vmem:[#allocation2 + $0x94] sm:$0xff]  ;;  %v5823_v60 = vld [vmem:[#allocation2 + $0x9c] sm:$0xff]  ;;  %5074 = vmatprep.mubr.msk.f32.mxu1 %vm285_vm0, %v1786_v2  ;;  %2015 = vmatpush1.msra.mxu0 %v1885_v16 }
  0xc5   : > { %1113 = vst.msk [vmem:[#allocation4 + $0xc8] sm:$0xff] %vm285_vm0, %v1081_v52  ;;  %1128 = vst.msk [vmem:[#allocation4 + $0x230] sm:$0xff] %vm285_vm0, %v5817_v51  ;;  %v5837_v5 = vld [vmem:[#allocation2 + $0x9a] sm:$0xff]  ;;  %v517_v26 = vld [vmem:[#allocation2 + $0x112] sm:$0xff]  ;;  %2016 = vmatprep.subr.mxu0 %v7987_v0 }
  0xc6   : > { %1129 = vst.msk [vmem:[#allocation4 + $0x248] sm:$0xff] %vm285_vm0, %v5819_v56  ;;  %1750 = vst.msk [vmem:[#allocation4 + $0x70] sm:$0xff] %vm285_vm0, %v5821_v57  ;;  %v1789_v6 = vld [vmem:[#allocation4 + $0x58] sm:$0xff]  ;;  %584 = vrot.lane.b32.xlu0 %v5837_v5, %s5307_s9  ;;  %v362_v22 = vpop.trf.xlu0  ;;  %v394_v28 = vpop.trf.xlu1  ;;  %v1884_v29 = vld [vmem:[%s7980_s1 + $0x50] sm:$0xff] }
  0xc7   : > { %1751 = vst.msk [vmem:[#allocation4 + $0x88] sm:$0xff] %vm285_vm0, %v5823_v60  ;;  %409 = vst.msk [vmem:[#allocation2 + $0xb2] sm:$0xff] %vm285_vm0, %v361_v61  ;;  %v1734_v7 = vld [vmem:[#allocation2 + $0x154] sm:$0xff]  ;;  %5075 = vmatmul.mubr.msk.f32.gmra.mxu1 %vm285_vm0, %v1789_v6  ;;  %v1735_v12 = vld [vmem:[#allocation2 + $0x15c] sm:$0xff]  ;;  %2017 = vmatpush1.msra.mxu0 %v1884_v29 }
  0xc8   : > { %1766 = vst.msk [vmem:[#allocation4 + $0x1f0] sm:$0xff] %vm285_vm0, %v1734_v7  ;;  %425 = vst.msk [vmem:[#allocation2 + $0x172] sm:$0xff] %vm285_vm0, %v393_v10  ;;  %v5845_v15 = vld [vmem:[#allocation2 + $0x98] sm:$0xff]  ;;  %v5851_v23 = vld [vmem:[#allocation2 + $0xaa] sm:$0xff]  ;;  %2018 = vmatprep.subr.mxu0 %v7987_v0 }
  0xc9   : > { %1767 = vst.msk [vmem:[#allocation4 + $0x208] sm:$0xff] %vm285_vm0, %v1735_v12  ;;  %v5853_v25 = vld [vmem:[#allocation2 + $0xa8] sm:$0xff]  ;;  %475 = vst.msk [vmem:[#allocation4 + $0x138] sm:$0xff] %vm285_vm0, %v5845_v15  ;;  %586 = vrot.lane.b32.xlu1 %v5851_v23, %s5307_s9  ;;  %v5872_v36 = vld [vmem:[#allocation2 + $0x158] sm:$0xff] }
  0xca   : > { %410 = vst.msk [vmem:[#allocation2 + $0xc2] sm:$0xff] %vm285_vm0, %v362_v22  ;;  %476 = vst.msk [vmem:[#allocation4 + $0x150] sm:$0xff] %vm285_vm0, %v5853_v25  ;;  %v5866_v32 = vld [vmem:[#allocation2 + $0x168] sm:$0xff]  ;;  %604 = vrot.lane.b32.xlu0 %v517_v26, %s5307_s9  ;;  %v1082_v41 = vld [vmem:[#allocation2 + $0x9a] sm:$0xff]  ;;  %v363_v52 = vpop.trf.xlu0  ;;  %v395_v10 = vpop.trf.xlu1 }
  0xcb   : > { %8014 = vst [vmem:[#allocation13_spill] sm:$0xff] %v5866_v32  ;;  %426 = vst.msk [vmem:[#allocation2 + $0x182] sm:$0xff] %vm285_vm0, %v394_v28  ;;  %v1883_v40 = vld [vmem:[%s7980_s1 + $0x48] sm:$0xff]  ;;  %v5880_v45 = vld [vmem:[#allocation2 + $0x15a] sm:$0xff] }
  0xcc   : > { %492 = vst.msk [vmem:[#allocation4 + $0x2d0] sm:$0xff] %vm285_vm0, %v5866_v32  ;;  %8015 = vst [vmem:[#allocation14_spill] sm:$0xff] %v5872_v36  ;;  %v1083_v42 = vld [vmem:[#allocation2 + $0xaa] sm:$0xff]  ;;  %v1882_v22 = vld [vmem:[%s7980_s1 + $0x40] sm:$0xff]  ;;  %2019 = vmatpush1.msra.mxu0 %v1883_v40 }
  0xcd   : > { %491 = vst.msk [vmem:[#allocation4 + $0x2b8] sm:$0xff] %vm285_vm0, %v5872_v36  ;;  %8016 = vst [vmem:[#allocation15_spill] sm:$0xff] %v5880_v45  ;;  %v1792_v61 = vld [vmem:[#allocation4 + $0x70] sm:$0xff]  ;;  %606 = vrot.lane.b32.xlu1 %v518_v33, %s5307_s9  ;;  %2020 = vmatprep.subr.mxu0 %v7987_v0  ;;  %v520_v40 = vld [vmem:[#allocation2 + $0x13a] sm:$0xff] }
  0xce   : > { %v5882_v49 = vld [vmem:[#allocation2 + $0xac] sm:$0xff]  ;;  %v5884_v50 = vld [vmem:[#allocation2 + $0xb4] sm:$0xff]  ;;  %1114 = vst.msk [vmem:[#allocation4 + $0xe0] sm:$0xff] %vm285_vm0, %v1082_v41  ;;  %1115 = vst.msk [vmem:[#allocation4 + $0xf8] sm:$0xff] %vm285_vm0, %v1083_v42  ;;  %5077 = vmatprep.mubr.msk.f32.mxu1 %vm285_vm0, %v1792_v61  ;;  %v364_v26 = vpop.trf.xlu0  ;;  %v396_v41 = vpop.trf.xlu1  ;;  %2021 = vmatpush1.msra.mxu0 %v1882_v22 }
  0xcf   : > { %1130 = vst.msk [vmem:[#allocation4 + $0x260] sm:$0xff] %vm285_vm0, %v5880_v45  ;;  %1752 = vst.msk [vmem:[#allocation4 + $0xa0] sm:$0xff] %vm285_vm0, %v5882_v49  ;;  %v5897_v2 = vld [vmem:[#allocation2 + $0xb2] sm:$0xff]  ;;  %v1795_v6 = vld [vmem:[#allocation4 + $0x88] sm:$0xff]  ;;  %2022 = vmatprep.subr.mxu0 %v7987_v0 }
  0xd0   : > { %1753 = vst.msk [vmem:[#allocation4 + $0xb8] sm:$0xff] %vm285_vm0, %v5884_v50  ;;  %411 = vst.msk [vmem:[#allocation2 + $0xca] sm:$0xff] %vm285_vm0, %v363_v52  ;;  %v1736_v7 = vld [vmem:[#allocation2 + $0x16c] sm:$0xff]  ;;  %588 = vrot.lane.b32.xlu0 %v5897_v2, %s5307_s9  ;;  %5078 = vmatmul.mubr.msk.f32.gmra.mxu1 %vm285_vm0, %v1795_v6  ;;  %v1737_v12 = vld [vmem:[#allocation2 + $0x174] sm:$0xff] }
  0xd1   : > { %1768 = vst.msk [vmem:[#allocation4 + $0x220] sm:$0xff] %vm285_vm0, %v1736_v7  ;;  %427 = vst.msk [vmem:[#allocation2 + $0x18a] sm:$0xff] %vm285_vm0, %v395_v10  ;;  %v5905_v16 = vld [vmem:[#allocation2 + $0xb0] sm:$0xff]  ;;  %v5911_v28 = vld [vmem:[#allocation2 + $0xc2] sm:$0xff] }
  0xd2   : > { %1769 = vst.msk [vmem:[#allocation4 + $0x238] sm:$0xff] %vm285_vm0, %v1737_v12  ;;  %v5913_v29 = vld [vmem:[#allocation2 + $0xc0] sm:$0xff]  ;;  %477 = vst.msk [vmem:[#allocation4 + $0x168] sm:$0xff] %vm285_vm0, %v5905_v16  ;;  %v519_v33 = vld [vmem:[#allocation2 + $0x12a] sm:$0xff]  ;;  %590 = vrot.lane.b32.xlu1 %v5911_v28, %s5307_s9 }
  0xd3   : > { %412 = vst.msk [vmem:[#allocation2 + $0xda] sm:$0xff] %vm285_vm0, %v364_v26  ;;  %478 = vst.msk [vmem:[#allocation4 + $0x180] sm:$0xff] %vm285_vm0, %v5913_v29  ;;  %v1881_v42 = vld [vmem:[%s7980_s1 + $0x38] sm:$0xff]  ;;  %v5926_v52 = vld [vmem:[#allocation2 + $0x170] sm:$0xff]  ;;  %v365_v26 = vpop.trf.xlu0 }
  0xd4   : > { %8017 = vst [vmem:[#allocation16_spill] sm:$0xff] %v5926_v52  ;;  %608 = vrot.lane.b32.xlu0 %v519_v33, %s5307_s9  ;;  %428 = vst.msk [vmem:[#allocation2 + $0x19a] sm:$0xff] %vm285_vm0, %v396_v41  ;;  %v1880_v61 = vld [vmem:[%s7980_s1 + $0x30] sm:$0xff]  ;;  %2023 = vmatpush1.msra.mxu0 %v1881_v42  ;;  %v1877_v32 = vld [vmem:[%s7980_s1 + $0x18] sm:$0xff] }
  0xd5   : > { %493 = vst.msk [vmem:[#allocation4 + $0x2e8] sm:$0xff] %vm285_vm0, %v5926_v52  ;;  %v1084_v6 = vld [vmem:[#allocation2 + $0xb2] sm:$0xff]  ;;  %v5936_v7 = vld [vmem:[#allocation2 + $0x16a] sm:$0xff]  ;;  %413 = vst.msk [vmem:[#allocation2 + $0xe2] sm:$0xff] %vm285_vm0, %v365_v26 }
  0xd6   : > { %8018 = vst [vmem:[#allocation17_spill] sm:$0xff] %v5936_v7  ;;  %v1798_v33 = vld [vmem:[#allocation4 + $0xa0] sm:$0xff]  ;;  %1116 = vst.msk [vmem:[#allocation4 + $0x110] sm:$0xff] %vm285_vm0, %v1084_v6  ;;  %610 = vrot.lane.b32.xlu1 %v520_v40, %s5307_s9  ;;  %v397_v6 = vpop.trf.xlu1  ;;  %v8019_v40 = vmov 0.0   ;;  %v525_v51 = vld [vmem:[#allocation2 + $0x172] sm:$0xff] }
  0xd7   : > { %v5938_v10 = vld [vmem:[#allocation2 + $0xc4] sm:$0xff]  ;;  %v5940_v12 = vld [vmem:[#allocation2 + $0xcc] sm:$0xff]  ;;  %1131 = vst.msk [vmem:[#allocation4 + $0x278] sm:$0xff] %vm285_vm0, %v5936_v7  ;;  %5080 = vmatprep.mubr.msk.f32.mxu1 %vm285_vm0, %v1798_v33  ;;  %v1801_v41 = vld [vmem:[#allocation4 + $0xb8] sm:$0xff]  ;;  %2024 = vmatprep.subr.mxu0 %v8019_v40 }
  0xd8   : > { %1754 = vst.msk [vmem:[#allocation4 + $0xd0] sm:$0xff] %vm285_vm0, %v5938_v10  ;;  %1755 = vst.msk [vmem:[#allocation4 + $0xe8] sm:$0xff] %vm285_vm0, %v5940_v12  ;;  %v5952_v22 = vld [vmem:[#allocation2 + $0xca] sm:$0xff]  ;;  %5081 = vmatmul.mubr.msk.f32.gmra.mxu1 %vm285_vm0, %v1801_v41  ;;  %2025 = vmatpush1.msra.mxu0 %v1880_v61  ;;  %v522_v7 = vld [vmem:[#allocation2 + $0x152] sm:$0xff] }
  0xd9   : > { %v1738_v42 = vld [vmem:[#allocation2 + $0x184] sm:$0xff]  ;;  %592 = vrot.lane.b32.xlu0 %v5952_v22, %s5307_s9  ;;  %v1739_v0 = vld [vmem:[#allocation2 + $0x18c] sm:$0xff]  ;;  %429 = vst.msk [vmem:[#allocation2 + $0x1a2] sm:$0xff] %vm285_vm0, %v397_v6  ;;  %2026 = vmatprep.subr.mxu0 %v8019_v40 }
  0xda   : > { %1770 = vst.msk [vmem:[#allocation4 + $0x250] sm:$0xff] %vm285_vm0, %v1738_v42  ;;  %1771 = vst.msk [vmem:[#allocation4 + $0x268] sm:$0xff] %vm285_vm0, %v1739_v0  ;;  %v5960_v26 = vld [vmem:[#allocation2 + $0xc8] sm:$0xff]  ;;  %v5966_v52 = vld [vmem:[#allocation2 + $0xda] sm:$0xff] }
  0xdb   : > { %v1879_v33 = vld [vmem:[%s7980_s1 + $0x28] sm:$0xff]  ;;  %479 = vst.msk [vmem:[#allocation4 + $0x198] sm:$0xff] %vm285_vm0, %v5960_v26  ;;  %v5970_v41 = vld [vmem:[#allocation2 + $0xd8] sm:$0xff]  ;;  %594 = vrot.lane.b32.xlu1 %v5966_v52, %s5307_s9  ;;  %v1878_v0 = vld [vmem:[%s7980_s1 + $0x20] sm:$0xff] }
  0xdc   : > { %v521_v42 = vld [vmem:[#allocation2 + $0x142] sm:$0xff]  ;;  %480 = vst.msk [vmem:[#allocation4 + $0x1b0] sm:$0xff] %vm285_vm0, %v5970_v41  ;;  %2027 = vmatpush1.msra.mxu0 %v1879_v33  ;;  %v5982_v61 = vld [vmem:[#allocation2 + $0x172] sm:$0xff]  ;;  %v1086_v45 = vld [vmem:[#allocation2 + $0xca] sm:$0xff] }
  0xdd   : > { %v1085_v6 = vld [vmem:[#allocation2 + $0xc2] sm:$0xff]  ;;  %612 = vrot.lane.b32.xlu0 %v521_v42, %s5307_s9  ;;  %8020 = vst [vmem:[#allocation18_spill] sm:$0xff] %v5982_v61  ;;  %2028 = vmatprep.subr.mxu0 %v8019_v40  ;;  %1132 = vst.msk [vmem:[#allocation4 + $0x290] sm:$0xff] %vm285_vm0, %v5982_v61 }
  0xde   : > { %1117 = vst.msk [vmem:[#allocation4 + $0x128] sm:$0xff] %vm285_vm0, %v1085_v6  ;;  %v5988_v36 = vld [vmem:[#allocation2 + $0x182] sm:$0xff]  ;;  %2029 = vmatpush1.msra.mxu0 %v1878_v0  ;;  %1118 = vst.msk [vmem:[#allocation4 + $0x140] sm:$0xff] %vm285_vm0, %v1086_v45  ;;  %v524_v45 = vld [vmem:[#allocation2 + $0x16a] sm:$0xff] }
  0xdf   : > { %8021 = vst [vmem:[#allocation19_spill] sm:$0xff] %v5988_v36  ;;  %v5992_v56 = vld [vmem:[#allocation2 + $0xdc] sm:$0xff]  ;;  %v1725_v42 = vld [vmem:[#allocation2 + $0xe4] sm:$0xff]  ;;  %v1804_v33 = vld [vmem:[#allocation4 + $0xd0] sm:$0xff]  ;;  %614 = vrot.lane.b32.xlu1 %v522_v7, %s5307_s9  ;;  %2030 = vmatprep.subr.mxu0 %v8019_v40 }
  0xe0   : > { %1133 = vst.msk [vmem:[#allocation4 + $0x2a8] sm:$0xff] %vm285_vm0, %v5988_v36  ;;  %1756 = vst.msk [vmem:[#allocation4 + $0x100] sm:$0xff] %vm285_vm0, %v5992_v56  ;;  %5083 = vmatprep.mubr.msk.f32.mxu1 %vm285_vm0, %v1804_v33  ;;  %v6002_v6 = vld [vmem:[#allocation2 + $0xe2] sm:$0xff]  ;;  %v1876_v7 = vld [vmem:[%s7980_s1 + $0x10] sm:$0xff]  ;;  %2031 = vmatpush1.msra.mxu0 %v1877_v32 }
  0xe1   : > { %1757 = vst.msk [vmem:[#allocation4 + $0x118] sm:$0xff] %vm285_vm0, %v1725_v42  ;;  %v1807_v61 = vld [vmem:[#allocation4 + $0xe8] sm:$0xff]  ;;  %v1740_v48 = vld [vmem:[#allocation2 + $0x19c] sm:$0xff]  ;;  %596 = vrot.lane.b32.xlu0 %v6002_v6, %s5307_s9  ;;  %2032 = vmatprep.subr.mxu0 %v8019_v40 }
  0xe2   : > { %5084 = vmatmul.mubr.msk.f32.gmra.mxu1 %vm285_vm0, %v1807_v61  ;;  %v1741_v0 = vld [vmem:[#allocation2 + $0x1a4] sm:$0xff]  ;;  %1772 = vst.msk [vmem:[#allocation4 + $0x280] sm:$0xff] %vm285_vm0, %v1740_v48  ;;  %v523_v61 = vld [vmem:[#allocation2 + $0x15a] sm:$0xff]  ;;  %2033 = vmatpush1.msra.mxu0 %v1876_v7 }
  0xe3   : > { %1773 = vst.msk [vmem:[#allocation4 + $0x298] sm:$0xff] %vm285_vm0, %v1741_v0  ;;  %v6009_v42 = vld [vmem:[#allocation2 + $0xe0] sm:$0xff]  ;;  %618 = vrot.lane.b32.xlu1 %v524_v45, %s5307_s9  ;;  %v1875_v48 = vld [vmem:[%s7980_s1 + $0x8] sm:$0xff]  ;;  %2034 = vmatprep.subr.mxu0 %v8019_v40 }
  0xe4   : > { %481 = vst.msk [vmem:[#allocation4 + $0x1c8] sm:$0xff] %vm285_vm0, %v6009_v42  ;;  %v1087_v33 = vld [vmem:[#allocation2 + $0xda] sm:$0xff]  ;;  %v687_v0 = vld [vmem:[#allocation2 + $0x4] sm:$0xff]  ;;  %2035 = vmatpush1.msra.mxu0 %v1875_v48 }
  0xe5   : > { %616 = vrot.lane.b32.xlu0 %v523_v61, %s5307_s9  ;;  %1119 = vst.msk [vmem:[#allocation4 + $0x158] sm:$0xff] %vm285_vm0, %v1087_v33  ;;  %v6024_v36 = vld [vmem:[#allocation2 + $0x18a] sm:$0xff]  ;;  %v1088_v32 = vld [vmem:[#allocation2 + $0xe2] sm:$0xff]  ;;  %v6027_v45 = vld [vmem:[#allocation2 + $0x19a] sm:$0xff]  ;;  %2036 = vmatprep.subr.mxu0 %v8019_v40 }
  0xe6   : > { %8022 = vst [vmem:[#allocation20_spill] sm:$0xff] %v6027_v45  ;;  %1134 = vst.msk [vmem:[#allocation4 + $0x2c0] sm:$0xff] %vm285_vm0, %v6024_v36  ;;  %v1874_v7 = vld [vmem:[%s7980_s1] sm:$0xff]  ;;  %v1816_v61 = vld [vmem:[#allocation4 + $0x130] sm:$0xff] }
  0xe7   : > { %v1810_v44 = vld [vmem:[#allocation4 + $0x100] sm:$0xff]  ;;  %1120 = vst.msk [vmem:[#allocation4 + $0x170] sm:$0xff] %vm285_vm0, %v1088_v32  ;;  %1135 = vst.msk [vmem:[#allocation4 + $0x2d8] sm:$0xff] %vm285_vm0, %v6027_v45  ;;  %751 = vrot.lane.b32.xlu1 %v687_v0, %s5308_s20  ;;  %v688_v32 = vld [vmem:[#allocation2 + $0xc] sm:$0xff]  ;;  %2037 = vmatpush1.msra.mxu0 %v1874_v7 }
  0xe8   : > { %v1813_v18 = vld [vmem:[#allocation4 + $0x118] sm:$0xff]  ;;  %5086 = vmatprep.mubr.msk.f32.mxu1 %vm285_vm0, %v1810_v44  ;;  %v6041_v33 = vld [vmem:[#allocation2 + $0x1a2] sm:$0xff]  ;;  %2038 = vmatprep.subr.mxu0 %v8019_v40  ;;  %v1904_v7 = vld [vmem:[%s7980_s1 + $0xf0] sm:$0xff] }
  0xe9   : > { %620 = vrot.lane.b32.xlu0 %v525_v51, %s5307_s9  ;;  %5087 = vmatmul.mubr.msk.f32.gmra.mxu1 %vm285_vm0, %v1813_v18  ;;  %v689_v48 = vld [vmem:[#allocation2 + $0x1c] sm:$0xff]  ;;  %8023 = vst [vmem:[#allocation21_spill] sm:$0xff] %v6041_v33  ;;  %1136 = vst.msk [vmem:[#allocation4 + $0x2f0] sm:$0xff] %vm285_vm0, %v6041_v33  ;;  %v1819_v18 = vld [vmem:[#allocation4 + $0x148] sm:$0xff]  ;;  %v561_v51 = vpop.permute.xlu1 %560 }
  0xea   : > { %5089 = vmatprep.mubr.msk.f32.mxu1 %vm285_vm0, %v1816_v61  ;;  %v1905_v44 = vld [vmem:[%s7980_s1 + $0xf8] sm:$0xff]  ;;  %v1822_v0 = vld [vmem:[#allocation4 + $0x160] sm:$0xff]  ;;  %656 = vst.msk [vmem:[#allocation4 + $0x18] sm:$0xff] %vm654_vm3, %v561_v51  ;;  %v1828_v51 = vld [vmem:[#allocation4 + $0x190] sm:$0xff] }
  0xeb   : > { %755 = vrot.lane.b32.xlu1 %v689_v48, %s5308_s20  ;;  %v690_v61 = vld [vmem:[#allocation2 + $0x24] sm:$0xff]  ;;  %2039 = vmatpush2.msra.mxu0 %v1905_v44  ;;  %v691_v48 = vld [vmem:[#allocation2 + $0x34] sm:$0xff]  ;;  %v6069_v44 = vld [vmem:[#allocation2 + $0x4c] sm:$0xff] }
  0xec   : > { %2040 = vmatprep.subr.mxu0 %v8019_v40  ;;  %v1825_v33 = vld [vmem:[#allocation4 + $0x178] sm:$0xff] }
  0xed   : > { %753 = vrot.lane.b32.xlu0 %v688_v32, %s5308_s20  ;;  %5090 = vmatmul.mubr.msk.f32.gmra.mxu1 %vm285_vm0, %v1819_v18  ;;  %v563_v32 = vpop.permute.xlu1 %562  ;;  %v1903_v18 = vld [vmem:[%s7980_s1 + $0xe8] sm:$0xff]  ;;  %v6088_v45 = vld [vmem:[#allocation2 + $0x54] sm:$0xff] }
  0xee   : > { %5092 = vmatprep.mubr.msk.f32.mxu1 %vm285_vm0, %v1822_v0  ;;  %2041 = vmatpush2.msra.mxu0 %v1904_v7  ;;  %657 = vst.msk [vmem:[#allocation4 + $0x30] sm:$0xff] %vm654_vm3, %v563_v32  ;;  %v1902_v0 = vld [vmem:[%s7980_s1 + $0xe0] sm:$0xff] }
  0xef   : > { %759 = vrot.lane.b32.xlu1 %v691_v48, %s5308_s20  ;;  %2042 = vmatprep.subr.mxu0 %v8019_v40  ;;  %v692_v7 = vld [vmem:[#allocation2 + $0x3c] sm:$0xff] }
  0xf0   : > { %2043 = vmatpush2.msra.mxu0 %v1903_v18  ;;  %v1834_v32 = vld [vmem:[#allocation4 + $0x1c0] sm:$0xff]  ;;  %v1901_v18 = vld [vmem:[%s7980_s1 + $0xd8] sm:$0xff] }
  0xf1   : > { %757 = vrot.lane.b32.xlu0 %v690_v61, %s5308_s20  ;;  %5093 = vmatmul.mubr.msk.f32.gmra.mxu1 %vm285_vm0, %v1825_v33  ;;  %v1831_v61 = vld [vmem:[#allocation4 + $0x1a8] sm:$0xff]  ;;  %v565_v33 = vpop.permute.xlu1 %564 }
  0xf2   : > { %5095 = vmatprep.mubr.msk.f32.mxu1 %vm285_vm0, %v1828_v51  ;;  %2044 = vmatprep.subr.mxu0 %v8019_v40  ;;  %658 = vst.msk [vmem:[#allocation4 + $0x48] sm:$0xff] %vm654_vm3, %v565_v33  ;;  %v559_v51 = vpop.permute.xlu0 %558  ;;  %v1900_v33 = vld [vmem:[%s7980_s1 + $0xd0] sm:$0xff] }
  0xf3   : > { %763 = vrot.lane.b32.xlu1 %v6069_v44, %s5308_s20  ;;  %2045 = vmatpush2.msra.mxu0 %v1902_v0  ;;  %655 = vst.msk [vmem:[#allocation4] sm:$0xff] %vm654_vm3, %v559_v51  ;;  %v1840_v0 = vld [vmem:[#allocation4 + $0x1f0] sm:$0xff]  ;;  %v1846_v51 = vld [vmem:[#allocation4 + $0x220] sm:$0xff] }
  0xf4   : > { %2046 = vmatprep.subr.mxu0 %v8019_v40 }
  0xf5   : > { %761 = vrot.lane.b32.xlu0 %v692_v7, %s5308_s20  ;;  %5096 = vmatmul.mubr.msk.f32.gmra.mxu1 %vm285_vm0, %v1831_v61  ;;  %v1837_v61 = vld [vmem:[#allocation4 + $0x1d8] sm:$0xff] }
  0xf6   : > { %5098 = vmatprep.mubr.msk.f32.mxu1 %vm285_vm0, %v1834_v32  ;;  %2047 = vmatpush2.msra.mxu0 %v1901_v18  ;;  %v1899_v32 = vld [vmem:[%s7980_s1 + $0xc8] sm:$0xff] }
  0xf7   : > { %767 = vrot.lane.b32.xlu1 %v5713_v4, %s5308_s20  ;;  %2048 = vmatprep.subr.mxu0 %v8019_v40  ;;  %v1843_v18 = vld [vmem:[#allocation4 + $0x208] sm:$0xff] }
  0xf8   : > { %2049 = vmatpush2.msra.mxu0 %v1900_v33  ;;  %v1852_v33 = vld [vmem:[#allocation4 + $0x250] sm:$0xff] }
  0xf9   : > { %765 = vrot.lane.b32.xlu0 %v6088_v45, %s5308_s20  ;;  %5099 = vmatmul.mubr.msk.f32.gmra.mxu1 %vm285_vm0, %v1837_v61  ;;  %v1898_v61 = vld [vmem:[%s7980_s1 + $0xc0] sm:$0xff] }
  0xfa   : > { %5101 = vmatprep.mubr.msk.f32.mxu1 %vm285_vm0, %v1840_v0  ;;  %2050 = vmatprep.subr.mxu0 %v8019_v40  ;;  %v1897_v0 = vld [vmem:[%s7980_s1 + $0xb8] sm:$0xff] }
  0xfb   : > { %1201 = vrot.lane.b32.xlu1 %v691_v48, %s5307_s9  ;;  %2051 = vmatpush2.msra.mxu0 %v1899_v32  ;;  %v1849_v48 = vld [vmem:[#allocation4 + $0x238] sm:$0xff]  ;;  %v1855_v32 = vld [vmem:[#allocation4 + $0x268] sm:$0xff] }
  0xfc   : > { %2052 = vmatprep.subr.mxu0 %v8019_v40 }
  0xfd   : > { %769 = vrot.lane.b32.xlu0 %v5709_v1, %s5308_s20  ;;  %5102 = vmatmul.mubr.msk.f32.gmra.mxu1 %vm285_vm0, %v1843_v18  ;;  %v1858_v18 = vld [vmem:[#allocation4 + $0x280] sm:$0xff] }
  0xfe   : > { %5104 = vmatprep.mubr.msk.f32.mxu1 %vm285_vm0, %v1846_v51  ;;  %2053 = vmatpush2.msra.mxu0 %v1898_v61  ;;  %v1895_v51 = vld [vmem:[%s7980_s1 + $0xa8] sm:$0xff]  ;;  %v1861_v61 = vld [vmem:[#allocation4 + $0x298] sm:$0xff] }
  0xff   : > { %1586 = vrot.lane.b32.xlu1 %v5685_v58, %s5309_s15  ;;  %2054 = vmatprep.subr.mxu0 %v8019_v40  ;;  %v1896_v58 = vld [vmem:[%s7980_s1 + $0xb0] sm:$0xff] }
 0x100   : > { %2055 = vmatpush2.msra.mxu0 %v1897_v0 }
 0x101   : > { %1394 = vrot.lane.b32.xlu0 %v5687_v59, %s5308_s20  ;;  %5105 = vmatmul.mubr.msk.f32.gmra.mxu1 %vm285_vm0, %v1849_v48 }
 0x102   : > { %5107 = vmatprep.mubr.msk.f32.mxu1 %vm285_vm0, %v1852_v33  ;;  %2056 = vmatprep.subr.mxu0 %v8019_v40  ;;  %v1891_v33 = vld [vmem:[%s7980_s1 + $0x88] sm:$0xff] }
 0x103   : > { %1203 = vrot.lane.b32.xlu1 %v692_v7, %s5307_s9  ;;  %2057 = vmatpush2.msra.mxu0 %v1896_v58  ;;  %v1893_v7 = vld [vmem:[%s7980_s1 + $0x98] sm:$0xff] }
 0x104   : > { %2058 = vmatprep.subr.mxu0 %v8019_v40 }
 0x105   : > { %944 = vrot.lane.b32.xlu0 %v5625_v27, %s5309_s15  ;;  %5108 = vmatmul.mubr.msk.f32.gmra.mxu1 %vm285_vm0, %v1855_v32  ;;  %v1894_v27 = vld [vmem:[%s7980_s1 + $0xa0] sm:$0xff] }
 0x106   : > { %5110 = vmatprep.mubr.msk.f32.mxu1 %vm285_vm0, %v1858_v18  ;;  %2059 = vmatpush2.msra.mxu0 %v1895_v51 }
 0x107   : > { %1588 = vrot.lane.b32.xlu1 %v5711_v3, %s5309_s15  ;;  %2060 = vmatprep.subr.mxu0 %v8019_v40  ;;  %v1892_v3 = vld [vmem:[%s7980_s1 + $0x90] sm:$0xff] }
 0x108   : > { %2061 = vmatpush2.msra.mxu0 %v1894_v27 }
 0x109   : > { %1396 = vrot.lane.b32.xlu0 %v5725_v8, %s5308_s20  ;;  %5111 = vmatmul.mubr.msk.f32.gmra.mxu1 %vm285_vm0, %v1861_v61 }
 0x10a   : > { %2062 = vmatprep.subr.mxu0 %v8019_v40 }
 0x10b   : > { %1205 = vrot.lane.b32.xlu1 %v6069_v44, %s5307_s9  ;;  %2063 = vmatpush2.msra.mxu0 %v1893_v7  ;;  %v1890_v44 = vld [vmem:[%s7980_s1 + $0x80] sm:$0xff] }
 0x10c   : > { %2064 = vmatprep.subr.mxu0 %v8019_v40 }
 0x10d   : > { %946 = vrot.lane.b32.xlu0 %v5643_v37, %s5309_s15  ;;  %2065 = vmatpush2.msra.mxu0 %v1892_v3  ;;  %v701_v3 = vld [vmem:[#allocation2 + $0xac] sm:$0xff] }
 0x10e   : > { %2066 = vmatprep.subr.mxu0 %v8019_v40 }
 0x10f   : > { %1590 = vrot.lane.b32.xlu1 %v5733_v13, %s5309_s15  ;;  %2067 = vmatpush2.msra.mxu0 %v1891_v33 }
 0x110   : > { %2068 = vmatprep.subr.mxu0 %v8019_v40 }
 0x111   : > { %1398 = vrot.lane.b32.xlu0 %v5735_v14, %s5308_s20  ;;  %2069 = vmatpush2.msra.mxu0 %v1890_v44  ;;  %v567_v37 = vpop.permute.xlu1 %566 }
 0x112   : > { %659 = vst.msk [vmem:[#allocation4 + $0x60] sm:$0xff] %vm654_vm3, %v567_v37 }
 0x113   : > { %1207 = vrot.lane.b32.xlu1 %v6088_v45, %s5307_s9 }
 0x115   : > { %948 = vrot.lane.b32.xlu0 %v5655_v43, %s5309_s15  ;;  %v569_v13 = vpop.permute.xlu0 %568 }
 0x116   : > { %660 = vst.msk [vmem:[#allocation4 + $0x78] sm:$0xff] %vm654_vm3, %v569_v13 }
 0x117   : > { %1592 = vrot.lane.b32.xlu1 %v5771_v24, %s5309_s15 }
 0x119   : > { %1400 = vrot.lane.b32.xlu0 %v5779_v31, %s5308_s20  ;;  %v571_v45 = vpop.permute.xlu1 %570 }
 0x11a   : > { %661 = vst.msk [vmem:[#allocation4 + $0x90] sm:$0xff] %vm654_vm3, %v571_v45  ;;  %v6322_v45 = vld [vmem:[#allocation2 + $0xe4] sm:$0xff] }
 0x11b   : > { %1209 = vrot.lane.b32.xlu1 %v5713_v4, %s5307_s9 }
 0x11d   : > { %950 = vrot.lane.b32.xlu0 %v5677_v53, %s5309_s15  ;;  %v573_v43 = vpop.permute.xlu0 %572 }
 0x11e   : > { %662 = vst.msk [vmem:[#allocation4 + $0xa8] sm:$0xff] %vm654_vm3, %v573_v43 }
 0x11f   : > { %1594 = vrot.lane.b32.xlu1 %v5784_v34, %s5309_s15 }
 0x121   : > { %1402 = vrot.lane.b32.xlu0 %v5786_v35, %s5308_s20  ;;  %v575_v4 = vpop.permute.xlu1 %574 }
 0x122   : > { %663 = vst.msk [vmem:[#allocation4 + $0xc0] sm:$0xff] %vm654_vm3, %v575_v4 }
 0x123   : > { %1211 = vrot.lane.b32.xlu1 %v5709_v1, %s5307_s9 }
 0x125   : > { %952 = vrot.lane.b32.xlu0 %v5687_v59, %s5309_s15 }
 0x126   : > { %v577_v53 = vpop.permute.xlu0 %576 }
 0x127   : > { %1596 = vrot.lane.b32.xlu1 %v5837_v5, %s5309_s15  ;;  %664 = vst.msk [vmem:[#allocation4 + $0xd8] sm:$0xff] %vm654_vm3, %v577_v53 }
 0x129   : > { %1404 = vrot.lane.b32.xlu0 %v5845_v15, %s5308_s20  ;;  %v579_v1 = vpop.permute.xlu1 %578 }
 0x12a   : > { %665 = vst.msk [vmem:[#allocation4 + $0xf0] sm:$0xff] %vm654_vm3, %v579_v1 }
 0x12b   : > { %1213 = vrot.lane.b32.xlu1 %v5759_v20, %s5307_s9 }
 0x12d   : > { %954 = vrot.lane.b32.xlu0 %v5725_v8, %s5309_s15  ;;  %v599_v59 = vpop.permute.xlu1 %598 }
 0x12e   : > { %675 = vst.msk [vmem:[#allocation4 + $0x1e0] sm:$0xff] %vm654_vm3, %v599_v59 }
 0x12f   : > { %1598 = vrot.lane.b32.xlu1 %v5851_v23, %s5309_s15  ;;  %v581_v24 = vpop.permute.xlu0 %580 }
 0x130   : > { %666 = vst.msk [vmem:[#allocation4 + $0x108] sm:$0xff] %vm654_vm3, %v581_v24  ;;  %v6332_v24 = vld [vmem:[#allocation2 + $0xf4] sm:$0xff] }
 0x131   : > { %1406 = vrot.lane.b32.xlu0 %v5853_v25, %s5308_s20  ;;  %v583_v8 = vpop.permute.xlu1 %582 }
 0x132   : > { %667 = vst.msk [vmem:[#allocation4 + $0x120] sm:$0xff] %vm654_vm3, %v583_v8 }
 0x133   : > { %1215 = vrot.lane.b32.xlu1 %v5761_v21, %s5307_s9  ;;  %v601_v34 = vpop.permute.xlu0 %600 }
 0x134   : > { %676 = vst.msk [vmem:[#allocation4 + $0x1f8] sm:$0xff] %vm654_vm3, %v601_v34  ;;  %v703_v34 = vld [vmem:[#allocation2 + $0xc4] sm:$0xff] }
 0x135   : > { %956 = vrot.lane.b32.xlu0 %v5735_v14, %s5309_s15  ;;  %v603_v5 = vpop.permute.xlu1 %602 }
 0x136   : > { %677 = vst.msk [vmem:[#allocation4 + $0x210] sm:$0xff] %vm654_vm3, %v603_v5 }
 0x137   : > { %1600 = vrot.lane.b32.xlu1 %v5897_v2, %s5309_s15 }
 0x138   : > { %v585_v23 = vpop.permute.xlu0 %584 }
 0x139   : > { %1408 = vrot.lane.b32.xlu0 %v5905_v16, %s5308_s20  ;;  %668 = vst.msk [vmem:[#allocation4 + $0x138] sm:$0xff] %vm654_vm3, %v585_v23 }
 0x13b   : > { %1217 = vrot.lane.b32.xlu1 %v5821_v57, %s5307_s9  ;;  %v587_v14 = vpop.permute.xlu1 %586 }
 0x13c   : > { %669 = vst.msk [vmem:[#allocation4 + $0x150] sm:$0xff] %vm654_vm3, %v587_v14  ;;  %v605_v48 = vpop.permute.xlu0 %604 }
 0x13d   : > { %958 = vrot.lane.b32.xlu0 %v5779_v31, %s5309_s15  ;;  %678 = vst.msk [vmem:[#allocation4 + $0x228] sm:$0xff] %vm654_vm3, %v605_v48 }
 0x13f   : > { %1602 = vrot.lane.b32.xlu1 %v5911_v28, %s5309_s15  ;;  %v607_v2 = vpop.permute.xlu1 %606 }
 0x140   : > { %679 = vst.msk [vmem:[#allocation4 + $0x240] sm:$0xff] %vm654_vm3, %v607_v2 }
 0x141   : > { %1410 = vrot.lane.b32.xlu0 %v5913_v29, %s5308_s20 }
 0x142   : > { %v589_v0 = vpop.permute.xlu0 %588 }
 0x143   : > { %670 = vst.msk [vmem:[#allocation4 + $0x168] sm:$0xff] %vm654_vm3, %v589_v0  ;;  %1219 = vrot.lane.b32.xlu1 %v5823_v60, %s5307_s9  ;;  %v6353_v0 = vld [vmem:[#allocation2 + $0xfc] sm:$0xff] }
 0x144   : > { %v591_v31 = vpop.permute.xlu1 %590 }
 0x145   : > { %960 = vrot.lane.b32.xlu0 %v5786_v35, %s5309_s15  ;;  %671 = vst.msk [vmem:[#allocation4 + $0x180] sm:$0xff] %vm654_vm3, %v591_v31 }
 0x146   : > { %v609_v32 = vpop.permute.xlu0 %608 }
 0x147   : > { %680 = vst.msk [vmem:[#allocation4 + $0x258] sm:$0xff] %vm654_vm3, %v609_v32  ;;  %1604 = vrot.lane.b32.xlu1 %v5952_v22, %s5309_s15 }
 0x148   : > { %v611_v28 = vpop.permute.xlu1 %610 }
 0x149   : > { %1412 = vrot.lane.b32.xlu0 %v5960_v26, %s5308_s20  ;;  %681 = vst.msk [vmem:[#allocation4 + $0x270] sm:$0xff] %vm654_vm3, %v611_v28  ;;  %v704_v28 = vld [vmem:[#allocation2 + $0xcc] sm:$0xff] }
 0x14b   : > { %v593_v18 = vpop.permute.xlu0 %592  ;;  %1221 = vrot.lane.b32.xlu1 %v5882_v49, %s5307_s9 }
 0x14c   : > { %672 = vst.msk [vmem:[#allocation4 + $0x198] sm:$0xff] %vm654_vm3, %v593_v18 }
 0x14d   : > { %962 = vrot.lane.b32.xlu0 %v5845_v15, %s5309_s15  ;;  %v595_v35 = vpop.permute.xlu1 %594 }
 0x14e   : > { %673 = vst.msk [vmem:[#allocation4 + $0x1b0] sm:$0xff] %vm654_vm3, %v595_v35 }
 0x14f   : > { %v613_v60 = vpop.permute.xlu0 %612  ;;  %771 = vrot.lane.b32.xlu1 %v5759_v20, %s5308_s20 }
 0x150   : > { %682 = vst.msk [vmem:[#allocation4 + $0x288] sm:$0xff] %vm654_vm3, %v613_v60  ;;  %v6363_v60 = vld [vmem:[#allocation2 + $0x10c] sm:$0xff] }
 0x151   : > { %1414 = vrot.lane.b32.xlu0 %v5970_v41, %s5308_s20  ;;  %v615_v22 = vpop.permute.xlu1 %614 }
 0x152   : > { %683 = vst.msk [vmem:[#allocation4 + $0x2a0] sm:$0xff] %vm654_vm3, %v615_v22 }
 0x153   : > { %v597_v58 = vpop.permute.xlu0 %596  ;;  %964 = vrot.lane.b32.xlu1 %v5853_v25, %s5309_s15 }
 0x154   : > { %674 = vst.msk [vmem:[#allocation4 + $0x1c8] sm:$0xff] %vm654_vm3, %v597_v58 }
 0x155   : > { %1606 = vrot.lane.b32.xlu0 %v5966_v52, %s5309_s15  ;;  %v619_v15 = vpop.permute.xlu1 %618 }
 0x156   : > { %685 = vst.msk [vmem:[#allocation4 + $0x2d0] sm:$0xff] %vm654_vm3, %v619_v15 }
 0x157   : > { %v617_v49 = vpop.permute.xlu0 %616  ;;  %1416 = vrot.lane.b32.xlu1 %v6009_v42, %s5308_s20 }
 0x158   : > { %684 = vst.msk [vmem:[#allocation4 + $0x2b8] sm:$0xff] %vm654_vm3, %v617_v49  ;;  %v705_v49 = vld [vmem:[#allocation2 + $0xdc] sm:$0xff] }
 0x159   : > { %1223 = vrot.lane.b32.xlu0 %v5884_v50, %s5307_s9  ;;  %v752_v20 = vpop.permute.xlu1 %751 }
 0x15a   : > { %848 = vst.msk [vmem:[#allocation4] sm:$0xff] %vm847_vm4, %v752_v20 }
 0x15b   : > { %v621_v25 = vpop.permute.xlu0 %620  ;;  %1608 = vrot.lane.b32.xlu1 %v6002_v6, %s5309_s15 }
 0x15c   : > { %686 = vst.msk [vmem:[#allocation4 + $0x2e8] sm:$0xff] %vm654_vm3, %v621_v25 }
 0x15d   : > { %773 = vrot.lane.b32.xlu0 %v5761_v21, %s5308_s20  ;;  %v756_v52 = vpop.permute.xlu1 %755 }
 0x15e   : > { %850 = vst.msk [vmem:[#allocation4 + $0x30] sm:$0xff] %vm847_vm4, %v756_v52  ;;  %v8024_v52 = vld [vmem:[#allocation8_spill] sm:$0xff] }
 0x15f   : > { %v754_v51 = vpop.permute.xlu0 %753  ;;  %1225 = vrot.lane.b32.xlu1 %v5938_v10, %s5307_s9 }
 0x160   : > { %849 = vst.msk [vmem:[#allocation4 + $0x18] sm:$0xff] %vm847_vm4, %v754_v51 }
 0x161   : > { %966 = vrot.lane.b32.xlu0 %v5905_v16, %s5309_s15  ;;  %v760_v50 = vpop.permute.xlu1 %759 }
 0x162   : > { %852 = vst.msk [vmem:[#allocation4 + $0x60] sm:$0xff] %vm847_vm4, %v760_v50 }
 0x163   : > { %v758_v61 = vpop.permute.xlu0 %757  ;;  %775 = vrot.lane.b32.xlu1 %v5821_v57, %s5308_s20 }
 0x164   : > { %851 = vst.msk [vmem:[#allocation4 + $0x48] sm:$0xff] %vm847_vm4, %v758_v61 }
 0x165   : > { %1418 = vrot.lane.b32.xlu0 %v5631_v30, %s5308_s20  ;;  %v764_v21 = vpop.permute.xlu1 %763 }
 0x166   : > { %854 = vst.msk [vmem:[#allocation4 + $0x90] sm:$0xff] %vm847_vm4, %v764_v21  ;;  %v8025_v21 = vld [vmem:[#allocation9_spill] sm:$0xff] }
 0x167   : > { %v762_v6 = vpop.permute.xlu0 %761  ;;  %968 = vrot.lane.b32.xlu1 %v5913_v29, %s5309_s15 }
 0x168   : > { %853 = vst.msk [vmem:[#allocation4 + $0x78] sm:$0xff] %vm847_vm4, %v762_v6  ;;  %v6386_v6 = vld [vmem:[#allocation2 + $0x114] sm:$0xff] }
 0x169   : > { %1610 = vrot.lane.b32.xlu0 %v5757_v19, %s5309_s15  ;;  %v768_v16 = vpop.permute.xlu1 %767  ;;  %v700_v19 = vld [vmem:[#allocation2 + $0x9c] sm:$0xff] }
 0x16a   : > { %856 = vst.msk [vmem:[#allocation4 + $0xc0] sm:$0xff] %vm847_vm4, %v768_v16 }
 0x16b   : > { %v766_v10 = vpop.permute.xlu0 %765  ;;  %1420 = vrot.lane.b32.xlu1 %v5645_v38, %s5308_s20 }
 0x16c   : > { %855 = vst.msk [vmem:[#allocation4 + $0xa8] sm:$0xff] %vm847_vm4, %v766_v10  ;;  %v8026_v10 = vld [vmem:[#allocation11_spill] sm:$0xff] }
 0x16d   : > { %1227 = vrot.lane.b32.xlu0 %v5940_v12, %s5307_s9  ;;  %v1202_v57 = vpop.permute.xlu1 %1201 }
 0x16e   : > { %1297 = vst.msk [vmem:[#allocation4 + $0x8] sm:$0xff] %vm654_vm3, %v1202_v57 }
 0x16f   : > { %v770_v27 = vpop.permute.xlu0 %769  ;;  %1612 = vrot.lane.b32.xlu1 %v5647_v39, %s5309_s15 }
 0x170   : > { %857 = vst.msk [vmem:[#allocation4 + $0xd8] sm:$0xff] %vm847_vm4, %v770_v27 }
 0x171   : > { %777 = vrot.lane.b32.xlu0 %v700_v19, %s5308_s20  ;;  %v1587_v29 = vpop.permute.xlu1 %1586 }
 0x173   : > { %v1395_v7 = vpop.permute.xlu0 %1394  ;;  %1229 = vrot.lane.b32.xlu1 %v5992_v56, %s5307_s9 }
 0x174   : > { %1490 = vst.msk [vmem:[#allocation4 + $0x8] sm:$0xff] %vm847_vm4, %v1395_v7  ;;  %v6397_v7 = vld [vmem:[#allocation2 + $0x124] sm:$0xff] }
 0x175   : > { %1682 = vst.msk [vmem:[#allocation4 + $0x8] sm:$0xff] %vm1040_vm5, %v1587_v29  ;;  %970 = vrot.lane.b32.xlu0 %v5960_v26, %s5309_s15  ;;  %v1204_v12 = vpop.permute.xlu1 %1203 }
 0x176   : > { %1298 = vst.msk [vmem:[#allocation4 + $0x20] sm:$0xff] %vm654_vm3, %v1204_v12 }
 0x177   : > { %v945_v39 = vpop.permute.xlu0 %944  ;;  %779 = vrot.lane.b32.xlu1 %v701_v3, %s5308_s20 }
 0x178   : > { %1041 = vst.msk [vmem:[#allocation4] sm:$0xff] %vm1040_vm5, %v945_v39 }
 0x179   : > { %1422 = vrot.lane.b32.xlu0 %v5662_v46, %s5308_s20  ;;  %v1589_v33 = vpop.permute.xlu1 %1588 }
 0x17b   : > { %v1397_v44 = vpop.permute.xlu0 %1396  ;;  %972 = vrot.lane.b32.xlu1 %v5970_v41, %s5309_s15 }
 0x17c   : > { %1491 = vst.msk [vmem:[#allocation4 + $0x20] sm:$0xff] %vm847_vm4, %v1397_v44  ;;  %v1779_v56 = vld [vmem:[#allocation4 + $0x8] sm:$0xff] }
 0x17d   : > { %1683 = vst.msk [vmem:[#allocation4 + $0x20] sm:$0xff] %vm1040_vm5, %v1589_v33  ;;  %1614 = vrot.lane.b32.xlu0 %v5664_v47, %s5309_s15  ;;  %2070 = vmatprep.mubr.f32.mxu0 %v1779_v56  ;;  %v1206_v26 = vpop.permute.xlu1 %1205  ;;  %v702_v47 = vld [vmem:[#allocation2 + $0xb4] sm:$0xff] }
 0x17e   : > { %1299 = vst.msk [vmem:[#allocation4 + $0x38] sm:$0xff] %vm654_vm3, %v1206_v26  ;;  %v8027_v33 = vld [vmem:[#allocation10_spill] sm:$0xff] }
 0x17f   : > { %v947_v37 = vpop.permute.xlu0 %946  ;;  %v1778_v13 = vld [vmem:[#allocation4] sm:$0xff]  ;;  %1424 = vrot.lane.b32.xlu1 %v5681_v54, %s5308_s20 }
 0x180   : > { %1042 = vst.msk [vmem:[#allocation4 + $0x18] sm:$0xff] %vm1040_vm5, %v947_v37  ;;  %2071 = vmatmul.mubr.f32.vlgmr.msra.gmra.mxu0 %v1778_v13 }
 0x181   : > { %1231 = vrot.lane.b32.xlu0 %v6322_v45, %s5307_s9  ;;  %v1591_v41 = vpop.permute.xlu1 %1590 }
 0x183   : > { %v1399_v43 = vpop.permute.xlu0 %1398  ;;  %1616 = vrot.lane.b32.xlu1 %v5683_v55, %s5309_s15 }
 0x184   : > { %1492 = vst.msk [vmem:[#allocation4 + $0x38] sm:$0xff] %vm847_vm4, %v1399_v43  ;;  %v1782_v4 = vld [vmem:[#allocation4 + $0x20] sm:$0xff] }
 0x185   : > { %1684 = vst.msk [vmem:[#allocation4 + $0x38] sm:$0xff] %vm1040_vm5, %v1591_v41  ;;  %781 = vrot.lane.b32.xlu0 %v702_v47, %s5308_s20  ;;  %2075 = vmatprep.mubr.f32.mxu0 %v1782_v4  ;;  %v1208_v53 = vpop.permute.xlu1 %1207  ;;  %v6419_v41 = vld [vmem:[#allocation2 + $0x12c] sm:$0xff] }
 0x186   : > { %1300 = vst.msk [vmem:[#allocation4 + $0x50] sm:$0xff] %vm654_vm3, %v1208_v53  ;;  %v8030_v53 = vld [vmem:[#allocation15_spill] sm:$0xff] }
 0x187   : > { %v949_v1 = vpop.permute.xlu0 %948  ;;  %v1781_v59 = vld [vmem:[#allocation4 + $0x18] sm:$0xff]  ;;  %1233 = vrot.lane.b32.xlu1 %v6332_v24, %s5307_s9 }
 0x188   : > { %1043 = vst.msk [vmem:[#allocation4 + $0x30] sm:$0xff] %vm1040_vm5, %v949_v1  ;;  %2076 = vmatmul.mubr.f32.gmra.mxu0 %v1781_v59 }
 0x189   : > { %974 = vrot.lane.b32.xlu0 %v6009_v42, %s5309_s15  ;;  %v1593_v55 = vpop.permute.xlu1 %1592 }
 0x18b   : > { %v1401_v8 = vpop.permute.xlu0 %1400  ;;  %783 = vrot.lane.b32.xlu1 %v703_v34, %s5308_s20 }
 0x18c   : > { %1493 = vst.msk [vmem:[#allocation4 + $0x50] sm:$0xff] %vm847_vm4, %v1401_v8  ;;  %v1785_v5 = vld [vmem:[#allocation4 + $0x38] sm:$0xff] }
 0x18d   : > { %1685 = vst.msk [vmem:[#allocation4 + $0x50] sm:$0xff] %vm1040_vm5, %v1593_v55  ;;  %1426 = vrot.lane.b32.xlu0 %v5699_v62, %s5308_s20  ;;  %2080 = vmatprep.mubr.f32.mxu0 %v1785_v5  ;;  %v1210_v23 = vpop.permute.xlu1 %1209 }
 0x18e   : > { %1301 = vst.msk [vmem:[#allocation4 + $0x68] sm:$0xff] %vm654_vm3, %v1210_v23  ;;  %v8031_v23 = vld [vmem:[#allocation13_spill] sm:$0xff] }
 0x18f   : > { %v951_v14 = vpop.permute.xlu0 %950  ;;  %v1784_v48 = vld [vmem:[#allocation4 + $0x30] sm:$0xff]  ;;  %976 = vrot.lane.b32.xlu1 %v5631_v30, %s5309_s15 }
 0x190   : > { %1044 = vst.msk [vmem:[#allocation4 + $0x48] sm:$0xff] %vm1040_vm5, %v951_v14  ;;  %2081 = vmatmul.mubr.f32.gmra.mxu0 %v1784_v48 }
 0x191   : > { %1618 = vrot.lane.b32.xlu0 %v5702_v63, %s5309_s15  ;;  %v1595_v42 = vpop.permute.xlu1 %1594 }
 0x193   : > { %v1403_v2 = vpop.permute.xlu0 %1402  ;;  %1428 = vrot.lane.b32.xlu1 %v5729_v9, %s5308_s20 }
 0x194   : > { %1494 = vst.msk [vmem:[#allocation4 + $0x68] sm:$0xff] %vm847_vm4, %v1403_v2  ;;  %v1788_v31 = vld [vmem:[#allocation4 + $0x50] sm:$0xff] }
 0x195   : > { %1686 = vst.msk [vmem:[#allocation4 + $0x68] sm:$0xff] %vm1040_vm5, %v1595_v42  ;;  %1235 = vrot.lane.b32.xlu0 %v6353_v0, %s5307_s9  ;;  %2085 = vmatprep.mubr.f32.mxu0 %v1788_v31  ;;  %v1212_v30 = vpop.permute.xlu1 %1211 }
 0x196   : > { %1302 = vst.msk [vmem:[#allocation4 + $0x80] sm:$0xff] %vm654_vm3, %v1212_v30  ;;  %v8033_v30 = vld [vmem:[#allocation16_spill] sm:$0xff] }
 0x197   : > { %v953_v63 = vpop.permute.xlu0 %952  ;;  %v1787_v32 = vld [vmem:[#allocation4 + $0x48] sm:$0xff]  ;;  %1620 = vrot.lane.b32.xlu1 %v5731_v11, %s5309_s15 }
 0x198   : > { %1045 = vst.msk [vmem:[#allocation4 + $0x60] sm:$0xff] %vm1040_vm5, %v953_v63  ;;  %2086 = vmatmul.mubr.f32.gmra.mxu0 %v1787_v32  ;;  %v6454_v63 = vld [vmem:[#allocation2 + $0x144] sm:$0xff] }
 0x199   : > { %785 = vrot.lane.b32.xlu0 %v704_v28, %s5308_s20  ;;  %v1597_v18 = vpop.permute.xlu1 %1596  ;;  %v8034_v28 = vld [vmem:[#allocation18_spill] sm:$0xff] }
 0x19b   : > { %v1405_v35 = vpop.permute.xlu0 %1404  ;;  %1237 = vrot.lane.b32.xlu1 %v6363_v60, %s5307_s9 }
 0x19c   : > { %1495 = vst.msk [vmem:[#allocation4 + $0x80] sm:$0xff] %vm847_vm4, %v1405_v35  ;;  %v1791_v22 = vld [vmem:[#allocation4 + $0x68] sm:$0xff] }
 0x19d   : > { %1687 = vst.msk [vmem:[#allocation4 + $0x80] sm:$0xff] %vm1040_vm5, %v1597_v18  ;;  %978 = vrot.lane.b32.xlu0 %v5645_v38, %s5309_s15  ;;  %2090 = vmatprep.mubr.f32.mxu0 %v1791_v22  ;;  %v1214_v11 = vpop.permute.xlu1 %1213  ;;  %v6465_v22 = vld [vmem:[#allocation2 + $0x154] sm:$0xff] }
 0x19e   : > { %1303 = vst.msk [vmem:[#allocation4 + $0x98] sm:$0xff] %vm654_vm3, %v1214_v11 }
 0x19f   : > { %v955_v58 = vpop.permute.xlu0 %954  ;;  %v1790_v15 = vld [vmem:[#allocation4 + $0x60] sm:$0xff]  ;;  %787 = vrot.lane.b32.xlu1 %v705_v49, %s5308_s20 }
 0x1a0   : > { %1046 = vst.msk [vmem:[#allocation4 + $0x78] sm:$0xff] %vm1040_vm5, %v955_v58  ;;  %2091 = vmatmul.mubr.f32.gmra.mxu0 %v1790_v15  ;;  %v6476_v49 = vld [vmem:[#allocation2 + $0x180] sm:$0xff] }
 0x1a1   : > { %1430 = vrot.lane.b32.xlu0 %v5747_v17, %s5308_s20  ;;  %v1599_v20 = vpop.permute.xlu1 %1598 }
 0x1a3   : > { %v1407_v25 = vpop.permute.xlu0 %1406  ;;  %980 = vrot.lane.b32.xlu1 %v5662_v46, %s5309_s15 }
 0x1a4   : > { %1496 = vst.msk [vmem:[#allocation4 + $0x98] sm:$0xff] %vm847_vm4, %v1407_v25  ;;  %v1794_v38 = vld [vmem:[#allocation4 + $0x80] sm:$0xff] }
 0x1a5   : > { %1688 = vst.msk [vmem:[#allocation4 + $0x98] sm:$0xff] %vm1040_vm5, %v1599_v20  ;;  %1622 = vrot.lane.b32.xlu0 %v8024_v52, %s5309_s15  ;;  %2095 = vmatprep.mubr.f32.mxu0 %v1794_v38  ;;  %v1216_v51 = vpop.permute.xlu1 %1215  ;;  %v8035_v38 = vld [vmem:[#allocation19_spill] sm:$0xff] }
 0x1a6   : > { %1304 = vst.msk [vmem:[#allocation4 + $0xb0] sm:$0xff] %vm654_vm3, %v1216_v51 }
 0x1a7   : > { %v957_v50 = vpop.permute.xlu0 %956  ;;  %v1793_v61 = vld [vmem:[#allocation4 + $0x78] sm:$0xff]  ;;  %1432 = vrot.lane.b32.xlu1 %v8025_v21, %s5308_s20 }
 0x1a8   : > { %1047 = vst.msk [vmem:[#allocation4 + $0x90] sm:$0xff] %vm1040_vm5, %v957_v50  ;;  %2096 = vmatmul.mubr.f32.gmra.mxu0 %v1793_v61 }
 0x1a9   : > { %1239 = vrot.lane.b32.xlu0 %v6386_v6, %s5307_s9  ;;  %v1601_v46 = vpop.permute.xlu1 %1600 }
 0x1ab   : > { %v1409_v16 = vpop.permute.xlu0 %1408  ;;  %1624 = vrot.lane.b32.xlu1 %v8026_v10, %s5309_s15 }
 0x1ac   : > { %1497 = vst.msk [vmem:[#allocation4 + $0xb0] sm:$0xff] %vm847_vm4, %v1409_v16  ;;  %v1797_v57 = vld [vmem:[#allocation4 + $0x98] sm:$0xff] }
 0x1ad   : > { %1689 = vst.msk [vmem:[#allocation4 + $0xb0] sm:$0xff] %vm1040_vm5, %v1601_v46  ;;  %789 = vrot.lane.b32.xlu0 %v6322_v45, %s5308_s20  ;;  %2100 = vmatprep.mubr.f32.mxu0 %v1797_v57  ;;  %v1218_v27 = vpop.permute.xlu1 %1217  ;;  %v8029_v45 = vld [vmem:[#allocation14_spill] sm:$0xff] }
 0x1ae   : > { %1305 = vst.msk [vmem:[#allocation4 + $0xc8] sm:$0xff] %vm654_vm3, %v1218_v27 }
 0x1af   : > { %v959_v19 = vpop.permute.xlu0 %958  ;;  %v1796_v29 = vld [vmem:[#allocation4 + $0x90] sm:$0xff]  ;;  %1241 = vrot.lane.b32.xlu1 %v6397_v7, %s5307_s9 }
 0x1b0   : > { %1048 = vst.msk [vmem:[#allocation4 + $0xa8] sm:$0xff] %vm1040_vm5, %v959_v19  ;;  %2101 = vmatmul.mubr.f32.gmra.mxu0 %v1796_v29  ;;  %v6503_v19 = vld [vmem:[#allocation2 + $0x16c] sm:$0xff] }
 0x1b1   : > { %982 = vrot.lane.b32.xlu0 %v5681_v54, %s5309_s15  ;;  %v1603_v12 = vpop.permute.xlu1 %1602  ;;  %v8028_v54 = vld [vmem:[#allocation12_spill] sm:$0xff] }
 0x1b3   : > { %v1411_v39 = vpop.permute.xlu0 %1410  ;;  %791 = vrot.lane.b32.xlu1 %v6332_v24, %s5308_s20  ;;  %v6431_v24 = vld [vmem:[#allocation2 + $0x13c] sm:$0xff] }
 0x1b4   : > { %1498 = vst.msk [vmem:[#allocation4 + $0xc8] sm:$0xff] %vm847_vm4, %v1411_v39  ;;  %v1800_v3 = vld [vmem:[#allocation4 + $0xb0] sm:$0xff] }
 0x1b5   : > { %1690 = vst.msk [vmem:[#allocation4 + $0xc8] sm:$0xff] %vm1040_vm5, %v1603_v12  ;;  %1434 = vrot.lane.b32.xlu0 %v8027_v33, %s5308_s20  ;;  %2105 = vmatprep.mubr.f32.mxu0 %v1800_v3  ;;  %v1220_v44 = vpop.permute.xlu1 %1219  ;;  %v6514_v12 = vld [vmem:[#allocation2 + $0x198] sm:$0xff] }
 0x1b6   : > { %1306 = vst.msk [vmem:[#allocation4 + $0xe0] sm:$0xff] %vm654_vm3, %v1220_v44 }
 0x1b7   : > { %v961_v56 = vpop.permute.xlu0 %960  ;;  %v1799_v26 = vld [vmem:[#allocation4 + $0xa8] sm:$0xff]  ;;  %984 = vrot.lane.b32.xlu1 %v5699_v62, %s5309_s15 }
 0x1b8   : > { %1049 = vst.msk [vmem:[#allocation4 + $0xc0] sm:$0xff] %vm1040_vm5, %v961_v56  ;;  %2106 = vmatmul.mubr.f32.gmra.mxu0 %v1799_v26 }
 0x1b9   : > { %1626 = vrot.lane.b32.xlu0 %v8028_v54, %s5309_s15  ;;  %v1605_v37 = vpop.permute.xlu1 %1604 }
 0x1bb   : > { %v1413_v13 = vpop.permute.xlu0 %1412  ;;  %1436 = vrot.lane.b32.xlu1 %v8029_v45, %s5308_s20 }
 0x1bc   : > { %1499 = vst.msk [vmem:[#allocation4 + $0xe0] sm:$0xff] %vm847_vm4, %v1413_v13  ;;  %v1803_v43 = vld [vmem:[#allocation4 + $0xc8] sm:$0xff]  ;;  %v6530_v13 = vld [vmem:[#allocation2 + $0x174] sm:$0xff] }
 0x1bd   : > { %1691 = vst.msk [vmem:[#allocation4 + $0xe0] sm:$0xff] %vm1040_vm5, %v1605_v37  ;;  %1243 = vrot.lane.b32.xlu0 %v6419_v41, %s5307_s9  ;;  %2110 = vmatprep.mubr.f32.mxu0 %v1803_v43  ;;  %v1222_v62 = vpop.permute.xlu1 %1221  ;;  %v6525_v37 = vld [vmem:[#allocation2 + $0x1a0] sm:$0xff]  ;;  %v8037_v43 = vld [vmem:[#allocation21_spill] sm:$0xff] }
 0x1be   : > { %1307 = vst.msk [vmem:[#allocation4 + $0xf8] sm:$0xff] %vm654_vm3, %v1222_v62 }
 0x1bf   : > { %v963_v47 = vpop.permute.xlu0 %962  ;;  %v1802_v4 = vld [vmem:[#allocation4 + $0xc0] sm:$0xff]  ;;  %1628 = vrot.lane.b32.xlu1 %v8030_v53, %s5309_s15 }
 0x1c0   : > { %1050 = vst.msk [vmem:[#allocation4 + $0xd8] sm:$0xff] %vm1040_vm5, %v963_v47  ;;  %2111 = vmatmul.mubr.f32.gmra.mxu0 %v1802_v4  ;;  %v1165_v53 = vld [vmem:[#allocation2 + $0x184] sm:$0xff] }
 0x1c1   : > { %793 = vrot.lane.b32.xlu0 %v6353_v0, %s5308_s20  ;;  %v772_v1 = vpop.permute.xlu1 %771 }
 0x1c2   : > { %858 = vst.msk [vmem:[#allocation4 + $0xf0] sm:$0xff] %vm847_vm4, %v772_v1  ;;  %v907_v1 = vld [vmem:[#allocation2 + $0x170] sm:$0xff] }
 0x1c3   : > { %v1415_v59 = vpop.permute.xlu0 %1414  ;;  %1245 = vrot.lane.b32.xlu1 %v6431_v24, %s5307_s9 }
 0x1c4   : > { %1500 = vst.msk [vmem:[#allocation4 + $0xf8] sm:$0xff] %vm847_vm4, %v1415_v59  ;;  %v1806_v55 = vld [vmem:[#allocation4 + $0xe0] sm:$0xff]  ;;  %v1742_v59 = vld [vmem:[#allocation2 + $0x1b4] sm:$0xff] }
 0x1c5   : > { %986 = vrot.lane.b32.xlu0 %v5729_v9, %s5309_s15  ;;  %2115 = vmatprep.mubr.f32.mxu0 %v1806_v55  ;;  %v965_v8 = vpop.permute.xlu1 %964  ;;  %v8032_v9 = vld [vmem:[#allocation17_spill] sm:$0xff]  ;;  %v1358_v55 = vld [vmem:[#allocation2 + $0x1b0] sm:$0xff]  ;;  %1774 = vst.msk [vmem:[#allocation4 + $0x2b0] sm:$0xff] %vm285_vm0, %v1742_v59 }
 0x1c6   : > { %1051 = vst.msk [vmem:[#allocation4 + $0xf0] sm:$0xff] %vm1040_vm5, %v965_v8  ;;  %v1743_v8 = vld [vmem:[#allocation2 + $0x1bc] sm:$0xff] }
 0x1c7   : > { %v1607_v34 = vpop.permute.xlu0 %1606  ;;  %v1805_v5 = vld [vmem:[#allocation4 + $0xd8] sm:$0xff]  ;;  %795 = vrot.lane.b32.xlu1 %v6363_v60, %s5308_s20  ;;  %1775 = vst.msk [vmem:[#allocation4 + $0x2c8] sm:$0xff] %vm285_vm0, %v1743_v8 }
 0x1c8   : > { %1692 = vst.msk [vmem:[#allocation4 + $0xf8] sm:$0xff] %vm1040_vm5, %v1607_v34  ;;  %2116 = vmatmul.mubr.f32.gmra.mxu0 %v1805_v5 }
 0x1c9   : > { %1438 = vrot.lane.b32.xlu0 %v8031_v23, %s5308_s20  ;;  %v1417_v14 = vpop.permute.xlu1 %1416 }
 0x1cb   : > { %v1224_v48 = vpop.permute.xlu0 %1223  ;;  %988 = vrot.lane.b32.xlu1 %v5747_v17, %s5309_s15 }
 0x1cc   : > { %1308 = vst.msk [vmem:[#allocation4 + $0x110] sm:$0xff] %vm654_vm3, %v1224_v48 }
 0x1cd   : > { %1501 = vst.msk [vmem:[#allocation4 + $0x110] sm:$0xff] %vm847_vm4, %v1417_v14  ;;  %1630 = vrot.lane.b32.xlu0 %v8032_v9, %s5309_s15  ;;  %v1609_v42 = vpop.permute.xlu1 %1608  ;;  %v1808_v2 = vld [vmem:[#allocation4 + $0xf0] sm:$0xff]  ;;  %v1359_v9 = vld [vmem:[#allocation2 + $0x1b8] sm:$0xff] }
 0x1ce   : > { %1693 = vst.msk [vmem:[#allocation4 + $0x110] sm:$0xff] %vm1040_vm5, %v1609_v42  ;;  %v1550_v14 = vld [vmem:[#allocation2 + $0x1b2] sm:$0xff] }
 0x1cf   : > { %v774_v0 = vpop.permute.xlu0 %773  ;;  %v1809_v31 = vld [vmem:[#allocation4 + $0xf8] sm:$0xff]  ;;  %1440 = vrot.lane.b32.xlu1 %v8033_v30, %s5308_s20  ;;  %v1864_v42 = vld [vmem:[#allocation4 + $0x2b0] sm:$0xff] }
 0x1d0   : > { %859 = vst.msk [vmem:[#allocation4 + $0x108] sm:$0xff] %vm847_vm4, %v774_v0  ;;  %2120 = vmatprep.mubr.f32.mxu0 %v1809_v31  ;;  %v3954_v0 = vld [vmem:[#allocation3 + $0x1bc] sm:$0xff]  ;;  %5113 = vmatprep.mubr.msk.f32.mxu1 %vm285_vm0, %v1864_v42  ;;  %v5073_v42 = vpop.f32.mrf.mxu1 }
 0x1d1   : > { %1247 = vrot.lane.b32.xlu0 %v6454_v63, %s5307_s9  ;;  %2121 = vmatmul.mubr.f32.gmra.mxu0 %v1808_v2  ;;  %v1226_v17 = vpop.permute.xlu1 %1225  ;;  %v3953_v2 = vld [vmem:[#allocation3 + $0x1b4] sm:$0xff] }
 0x1d2   : > { %1309 = vst.msk [vmem:[#allocation4 + $0x128] sm:$0xff] %vm654_vm3, %v1226_v17 }
 0x1d3   : > { %v967_v32 = vpop.permute.xlu0 %966  ;;  %1632 = vrot.lane.b32.xlu1 %v8034_v28, %s5309_s15  ;;  %3985 = vst.msk [vmem:[#allocation4 + $0x2b0] sm:$0xff] %vm285_vm0, %v3953_v2  ;;  %v1166_v28 = vld [vmem:[#allocation2 + $0x18c] sm:$0xff] }
 0x1d4   : > { %1052 = vst.msk [vmem:[#allocation4 + $0x108] sm:$0xff] %vm1040_vm5, %v967_v32  ;;  %v4098_v2 = vld [vmem:[%s7983_s4 + $0x68] sm:$0xff] }
 0x1d5   : > { %797 = vrot.lane.b32.xlu0 %v6386_v6, %s5308_s20  ;;  %v776_v18 = vpop.permute.xlu1 %775  ;;  %v1812_v35 = vld [vmem:[#allocation4 + $0x110] sm:$0xff]  ;;  %v6492_v6 = vld [vmem:[#allocation2 + $0x15c] sm:$0xff] }
 0x1d6   : > { %860 = vst.msk [vmem:[#allocation4 + $0x120] sm:$0xff] %vm847_vm4, %v776_v18  ;;  %2125 = vmatprep.mubr.f32.mxu0 %v1812_v35  ;;  %v1551_v18 = vld [vmem:[#allocation2 + $0x1ba] sm:$0xff] }
 0x1d7   : > { %v1419_v60 = vpop.permute.xlu0 %1418  ;;  %1249 = vrot.lane.b32.xlu1 %v6465_v22, %s5307_s9 }
 0x1d8   : > { %1502 = vst.msk [vmem:[#allocation4 + $0x128] sm:$0xff] %vm847_vm4, %v1419_v60 }
 0x1d9   : > { %990 = vrot.lane.b32.xlu0 %v8025_v21, %s5309_s15  ;;  %v969_v11 = vpop.permute.xlu1 %968  ;;  %v6487_v21 = vld [vmem:[#allocation2 + $0x188] sm:$0xff] }
 0x1da   : > { %1053 = vst.msk [vmem:[#allocation4 + $0x120] sm:$0xff] %vm1040_vm5, %v969_v11 }
 0x1db   : > { %v1611_v58 = vpop.permute.xlu0 %1610  ;;  %v1811_v15 = vld [vmem:[#allocation4 + $0x108] sm:$0xff]  ;;  %799 = vrot.lane.b32.xlu1 %v6397_v7, %s5308_s20 }
 0x1dc   : > { %1694 = vst.msk [vmem:[#allocation4 + $0x128] sm:$0xff] %vm1040_vm5, %v1611_v58  ;;  %2126 = vmatmul.mubr.f32.gmra.mxu0 %v1811_v15  ;;  %v1167_v15 = vld [vmem:[#allocation2 + $0x19c] sm:$0xff] }
 0x1dd   : > { %1442 = vrot.lane.b32.xlu0 %v6476_v49, %s5308_s20  ;;  %v1421_v20 = vpop.permute.xlu1 %1420 }
 0x1df   : > { %v1228_v25 = vpop.permute.xlu0 %1227  ;;  %992 = vrot.lane.b32.xlu1 %v8027_v33, %s5309_s15  ;;  %v8036_v33 = vld [vmem:[#allocation20_spill] sm:$0xff] }
 0x1e0   : > { %1310 = vst.msk [vmem:[#allocation4 + $0x140] sm:$0xff] %vm654_vm3, %v1228_v25  ;;  %v1360_v25 = vld [vmem:[#allocation2 + $0x1c8] sm:$0xff] }
 0x1e1   : > { %1503 = vst.msk [vmem:[#allocation4 + $0x140] sm:$0xff] %vm847_vm4, %v1421_v20  ;;  %1634 = vrot.lane.b32.xlu0 %v8035_v38, %s5309_s15  ;;  %v1613_v52 = vpop.permute.xlu1 %1612  ;;  %v1814_v51 = vld [vmem:[#allocation4 + $0x120] sm:$0xff]  ;;  %v1745_v38 = vld [vmem:[#allocation2 + $0x1d4] sm:$0xff] }
 0x1e2   : > { %1695 = vst.msk [vmem:[#allocation4 + $0x140] sm:$0xff] %vm1040_vm5, %v1613_v52 }
 0x1e3   : > { %v778_v50 = vpop.permute.xlu0 %777  ;;  %v1815_v61 = vld [vmem:[#allocation4 + $0x128] sm:$0xff]  ;;  %1444 = vrot.lane.b32.xlu1 %v6487_v21, %s5308_s20  ;;  %1777 = vst.msk [vmem:[#allocation4 + $0x2f8] sm:$0xff] %vm285_vm0, %v1745_v38 }
 0x1e4   : > { %861 = vst.msk [vmem:[#allocation4 + $0x138] sm:$0xff] %vm847_vm4, %v778_v50  ;;  %2130 = vmatprep.mubr.f32.mxu0 %v1815_v61  ;;  %v1552_v61 = vld [vmem:[#allocation2 + $0x1ca] sm:$0xff] }
 0x1e5   : > { %1251 = vrot.lane.b32.xlu0 %v6492_v6, %s5307_s9  ;;  %2131 = vmatmul.mubr.f32.gmra.mxu0 %v1814_v51  ;;  %v1230_v46 = vpop.permute.xlu1 %1229 }
 0x1e6   : > { %1311 = vst.msk [vmem:[#allocation4 + $0x158] sm:$0xff] %vm654_vm3, %v1230_v46  ;;  %v3956_v46 = vld [vmem:[#allocation3 + $0x1d4] sm:$0xff] }
 0x1e7   : > { %v971_v16 = vpop.permute.xlu0 %970  ;;  %1636 = vrot.lane.b32.xlu1 %v6024_v36, %s5309_s15 }
 0x1e8   : > { %1054 = vst.msk [vmem:[#allocation4 + $0x138] sm:$0xff] %vm1040_vm5, %v971_v16  ;;  %v1361_v16 = vld [vmem:[#allocation2 + $0x1d0] sm:$0xff] }
 0x1e9   : > { %801 = vrot.lane.b32.xlu0 %v6419_v41, %s5308_s20  ;;  %v780_v10 = vpop.permute.xlu1 %779  ;;  %v1818_v57 = vld [vmem:[#allocation4 + $0x140] sm:$0xff] }
 0x1ea   : > { %862 = vst.msk [vmem:[#allocation4 + $0x150] sm:$0xff] %vm847_vm4, %v780_v10  ;;  %2135 = vmatprep.mubr.f32.mxu0 %v1818_v57 }
 0x1eb   : > { %v1423_v27 = vpop.permute.xlu0 %1422  ;;  %1253 = vrot.lane.b32.xlu1 %v6503_v19, %s5307_s9 }
 0x1ec   : > { %1504 = vst.msk [vmem:[#allocation4 + $0x158] sm:$0xff] %vm847_vm4, %v1423_v27 }
 0x1ed   : > { %994 = vrot.lane.b32.xlu0 %v8029_v45, %s5309_s15  ;;  %v973_v36 = vpop.permute.xlu1 %972 }
 0x1ee   : > { %1055 = vst.msk [vmem:[#allocation4 + $0x150] sm:$0xff] %vm1040_vm5, %v973_v36 }
 0x1ef   : > { %v1615_v29 = vpop.permute.xlu0 %1614  ;;  %v1817_v7 = vld [vmem:[#allocation4 + $0x138] sm:$0xff]  ;;  %803 = vrot.lane.b32.xlu1 %v6431_v24, %s5308_s20 }
 0x1f0   : > { %1696 = vst.msk [vmem:[#allocation4 + $0x158] sm:$0xff] %vm1040_vm5, %v1615_v29  ;;  %2136 = vmatmul.mubr.f32.gmra.mxu0 %v1817_v7  ;;  %v1168_v7 = vld [vmem:[#allocation2 + $0x1a4] sm:$0xff] }
 0x1f1   : > { %1446 = vrot.lane.b32.xlu0 %v6514_v12, %s5308_s20  ;;  %v1425_v39 = vpop.permute.xlu1 %1424 }
 0x1f3   : > { %v1232_v3 = vpop.permute.xlu0 %1231  ;;  %996 = vrot.lane.b32.xlu1 %v8031_v23, %s5309_s15 }
 0x1f4   : > { %1312 = vst.msk [vmem:[#allocation4 + $0x170] sm:$0xff] %vm654_vm3, %v1232_v3 }
 0x1f5   : > { %1505 = vst.msk [vmem:[#allocation4 + $0x170] sm:$0xff] %vm847_vm4, %v1425_v39  ;;  %1638 = vrot.lane.b32.xlu0 %v8036_v33, %s5309_s15  ;;  %v1617_v44 = vpop.permute.xlu1 %1616  ;;  %v1820_v56 = vld [vmem:[#allocation4 + $0x150] sm:$0xff] }
 0x1f6   : > { %1697 = vst.msk [vmem:[#allocation4 + $0x170] sm:$0xff] %vm1040_vm5, %v1617_v44 }
 0x1f7   : > { %v782_v26 = vpop.permute.xlu0 %781  ;;  %v1821_v54 = vld [vmem:[#allocation4 + $0x158] sm:$0xff]  ;;  %1448 = vrot.lane.b32.xlu1 %v6525_v37, %s5308_s20 }
 0x1f8   : > { %863 = vst.msk [vmem:[#allocation4 + $0x168] sm:$0xff] %vm847_vm4, %v782_v26  ;;  %2140 = vmatprep.mubr.f32.mxu0 %v1821_v54  ;;  %v6603_v26 = vld [vmem:[%s7983_s4 + $0x118] sm:$0xff]  ;;  %v4119_v54 = vld [vmem:[%s7983_s4 + $0x110] sm:$0xff] }
 0x1f9   : > { %1255 = vrot.lane.b32.xlu0 %v6530_v13, %s5307_s9  ;;  %2141 = vmatmul.mubr.f32.gmra.mxu0 %v1820_v56  ;;  %v1234_v45 = vpop.permute.xlu1 %1233 }
 0x1fa   : > { %1313 = vst.msk [vmem:[#allocation4 + $0x188] sm:$0xff] %vm654_vm3, %v1234_v45  ;;  %5119 = vmatprep.subr.mxu0 %v6603_v26  ;;  %v2708_v45 = vld [vmem:[#allocation3 + $0x2] sm:$0xff] }
 0x1fb   : > { %v975_v41 = vpop.permute.xlu0 %974  ;;  %1640 = vrot.lane.b32.xlu1 %v8037_v43, %s5309_s15  ;;  %5120 = vmatpush3.msra.mxu0 %v6603_v26 }
 0x1fc   : > { %1056 = vst.msk [vmem:[#allocation4 + $0x168] sm:$0xff] %vm1040_vm5, %v975_v41  ;;  %5121 = vmatprep.subr.mxu0 %v4119_v54 }
 0x1fd   : > { %805 = vrot.lane.b32.xlu0 %v6454_v63, %s5308_s20  ;;  %v784_v62 = vpop.permute.xlu1 %783  ;;  %v1824_v47 = vld [vmem:[#allocation4 + $0x170] sm:$0xff]  ;;  %v1867_v63 = vld [vmem:[#allocation4 + $0x2c8] sm:$0xff]  ;;  %5122 = vmatpush3.msra.mxu0 %v4119_v54  ;;  %v4089_v54 = vld [vmem:[%s7983_s4 + $0x20] sm:$0xff] }
 0x1fe   : > { %864 = vst.msk [vmem:[#allocation4 + $0x180] sm:$0xff] %vm847_vm4, %v784_v62  ;;  %2145 = vmatprep.mubr.f32.mxu0 %v1824_v47  ;;  %5114 = vmatmul.mubr.msk.f32.gmra.mxu1 %vm285_vm0, %v1867_v63  ;;  %v4118_v62 = vld [vmem:[%s7983_s4 + $0x108] sm:$0xff]  ;;  %v4097_v63 = vld [vmem:[%s7983_s4 + $0x60] sm:$0xff] }
 0x1ff   : > { %v1427_v4 = vpop.permute.xlu0 %1426  ;;  %1257 = vrot.lane.b32.xlu1 %v1165_v53, %s5307_s9  ;;  %3986 = vst.msk [vmem:[#allocation4 + $0x2c8] sm:$0xff] %vm285_vm0, %v3954_v0  ;;  %5123 = vmatprep.subr.mxu0 %v4118_v62 }
 0x200   : > { %1506 = vst.msk [vmem:[#allocation4 + $0x188] sm:$0xff] %vm847_vm4, %v1427_v4  ;;  %5124 = vmatpush3.msra.mxu0 %v4118_v62  ;;  %v2900_v4 = vld [vmem:[#allocation3 + $0x4] sm:$0xff] }
 0x201   : > { %998 = vrot.lane.b32.xlu0 %v907_v1, %s5309_s15  ;;  %v977_v24 = vpop.permute.xlu1 %976 }
 0x202   : > { %1057 = vst.msk [vmem:[#allocation4 + $0x180] sm:$0xff] %vm1040_vm5, %v977_v24 }
 0x203   : > { %v1619_v34 = vpop.permute.xlu0 %1618  ;;  %v1823_v5 = vld [vmem:[#allocation4 + $0x168] sm:$0xff]  ;;  %807 = vrot.lane.b32.xlu1 %v6465_v22, %s5308_s20 }
 0x204   : > { %1698 = vst.msk [vmem:[#allocation4 + $0x188] sm:$0xff] %vm1040_vm5, %v1619_v34  ;;  %2146 = vmatmul.mubr.f32.gmra.mxu0 %v1823_v5  ;;  %v4100_v5 = vld [vmem:[%s7983_s4 + $0x78] sm:$0xff] }
 0x205   : > { %1450 = vrot.lane.b32.xlu0 %v1358_v55, %s5308_s20  ;;  %v1429_v23 = vpop.permute.xlu1 %1428  ;;  %4218 = vmatpush1.msra.mxu1 %v4100_v5 }
 0x206   : > { %4219 = vmatprep.subr.mxu1 %v8019_v40 }
 0x207   : > { %v1236_v48 = vpop.permute.xlu0 %1235  ;;  %1000 = vrot.lane.b32.xlu1 %v6476_v49, %s5309_s15  ;;  %v1744_v49 = vld [vmem:[#allocation2 + $0x1cc] sm:$0xff] }
 0x208   : > { %1314 = vst.msk [vmem:[#allocation4 + $0x1a0] sm:$0xff] %vm654_vm3, %v1236_v48 }
 0x209   : > { %1507 = vst.msk [vmem:[#allocation4 + $0x1a0] sm:$0xff] %vm847_vm4, %v1429_v23  ;;  %1642 = vrot.lane.b32.xlu0 %v1550_v14, %s5309_s15  ;;  %v1621_v31 = vpop.permute.xlu1 %1620  ;;  %v1826_v30 = vld [vmem:[#allocation4 + $0x180] sm:$0xff] }
 0x20a   : > { %1699 = vst.msk [vmem:[#allocation4 + $0x1a0] sm:$0xff] %vm1040_vm5, %v1621_v31 }
 0x20b   : > { %v786_v17 = vpop.permute.xlu0 %785  ;;  %v1827_v32 = vld [vmem:[#allocation4 + $0x188] sm:$0xff]  ;;  %1452 = vrot.lane.b32.xlu1 %v1359_v9, %s5308_s20  ;;  %1776 = vst.msk [vmem:[#allocation4 + $0x2e0] sm:$0xff] %vm285_vm0, %v1744_v49  ;;  %v4099_v9 = vld [vmem:[%s7983_s4 + $0x70] sm:$0xff] }
 0x20c   : > { %865 = vst.msk [vmem:[#allocation4 + $0x198] sm:$0xff] %vm847_vm4, %v786_v17  ;;  %2150 = vmatprep.mubr.f32.mxu0 %v1827_v32  ;;  %4220 = vmatpush1.msra.mxu1 %v4099_v9  ;;  %v2297_v17 = vpop.f32.mrf.mxu1  ;;  %v4085_v9 = vld [vmem:[%s7983_s4] sm:$0xff] }
 0x20d   : > { %1259 = vrot.lane.b32.xlu0 %v1166_v28, %s5307_s9  ;;  %2151 = vmatmul.mubr.f32.gmra.mxu0 %v1826_v30  ;;  %v1238_v35 = vpop.permute.xlu1 %1237  ;;  %v6651_v28 = vld [vmem:[%s7981_s2] ss:$0 sm:$0xff] }
 0x20e   : > { %1315 = vst.msk [vmem:[#allocation4 + $0x1b8] sm:$0xff] %vm654_vm3, %v1238_v35  ;;  %4221 = vmatprep.subr.mxu1 %v8019_v40  ;;  %v4096_v35 = vld [vmem:[%s7983_s4 + $0x58] sm:$0xff] }
 0x20f   : > { %v979_v60 = vpop.permute.xlu0 %978  ;;  %1644 = vrot.lane.b32.xlu1 %v1551_v18, %s5309_s15  ;;  %4222 = vmatpush1.msra.mxu1 %v4098_v2 }
 0x210   : > { %1058 = vst.msk [vmem:[#allocation4 + $0x198] sm:$0xff] %vm1040_vm5, %v979_v60  ;;  %4223 = vmatprep.subr.mxu1 %v8019_v40  ;;  %v6660_v60 = vld [vmem:[%s7982_s3] ss:$0 sm:$0xff] }
 0x211   : > { %809 = vrot.lane.b32.xlu0 %v6492_v6, %s5308_s20  ;;  %v788_v22 = vpop.permute.xlu1 %787  ;;  %v1830_v11 = vld [vmem:[#allocation4 + $0x1a0] sm:$0xff]  ;;  %v3955_v6 = vld [vmem:[#allocation3 + $0x1cc] sm:$0xff]  ;;  %4224 = vmatpush1.msra.mxu1 %v4097_v63  ;;  %v4116_v63 = vld [vmem:[%s7983_s4 + $0xf8] sm:$0xff] }
 0x212   : > { %866 = vst.msk [vmem:[#allocation4 + $0x1b0] sm:$0xff] %vm847_vm4, %v788_v22  ;;  %2155 = vmatprep.mubr.f32.mxu0 %v1830_v11  ;;  %v1870_v10 = vld [vmem:[#allocation4 + $0x2e0] sm:$0xff]  ;;  %4225 = vmatprep.subr.mxu1 %v8019_v40 }
 0x213   : > { %v1431_v58 = vpop.permute.xlu0 %1430  ;;  %1261 = vrot.lane.b32.xlu1 %v1167_v15, %s5307_s9  ;;  %5116 = vmatprep.mubr.msk.f32.mxu1 %vm285_vm0, %v1870_v10  ;;  %3987 = vst.msk [vmem:[#allocation4 + $0x2e0] sm:$0xff] %vm285_vm0, %v3955_v6  ;;  %v4095_v15 = vld [vmem:[%s7983_s4 + $0x50] sm:$0xff] }
 0x214   : > { %1508 = vst.msk [vmem:[#allocation4 + $0x1b8] sm:$0xff] %vm847_vm4, %v1431_v58  ;;  %4226 = vmatpush1.msra.mxu1 %v4096_v35  ;;  %v2644_v58 = vld [vmem:[#allocation3] sm:$0xff] }
 0x215   : > { %1002 = vrot.lane.b32.xlu0 %v6487_v21, %s5309_s15  ;;  %v981_v20 = vpop.permute.xlu1 %980  ;;  %4227 = vmatprep.subr.mxu1 %v8019_v40  ;;  %2676 = vst.msk [vmem:[#allocation4] sm:$0xff] %vm285_vm0, %v2644_v58 }
 0x216   : > { %1059 = vst.msk [vmem:[#allocation4 + $0x1b0] sm:$0xff] %vm1040_vm5, %v981_v20  ;;  %4228 = vmatpush1.msra.mxu1 %v4095_v15 }
 0x217   : > { %v1623_v52 = vpop.permute.xlu0 %1622  ;;  %v1829_v51 = vld [vmem:[#allocation4 + $0x198] sm:$0xff]  ;;  %811 = vrot.lane.b32.xlu1 %v6503_v19, %s5308_s20  ;;  %4229 = vmatprep.subr.mxu1 %v8019_v40 }
 0x218   : > { %1700 = vst.msk [vmem:[#allocation4 + $0x1b8] sm:$0xff] %vm1040_vm5, %v1623_v52  ;;  %2156 = vmatmul.mubr.f32.gmra.mxu0 %v1829_v51  ;;  %v1873_v19 = vld [vmem:[#allocation4 + $0x2f8] sm:$0xff]  ;;  %v4093_v52 = vld [vmem:[%s7983_s4 + $0x40] sm:$0xff] }
 0x219   : > { %1454 = vrot.lane.b32.xlu0 %v1360_v25, %s5308_s20  ;;  %v1433_v50 = vpop.permute.xlu1 %1432  ;;  %5117 = vmatmul.mubr.msk.f32.gmra.mxu1 %vm285_vm0, %v1873_v19  ;;  %3988 = vst.msk [vmem:[#allocation4 + $0x2f8] sm:$0xff] %vm285_vm0, %v3956_v46  ;;  %v4094_v25 = vld [vmem:[%s7983_s4 + $0x48] sm:$0xff]  ;;  %v4092_v46 = vld [vmem:[%s7983_s4 + $0x38] sm:$0xff] }
 0x21a   : > { %4230 = vmatpush1.msra.mxu1 %v4094_v25 }
 0x21b   : > { %v1240_v21 = vpop.permute.xlu0 %1239  ;;  %1004 = vrot.lane.b32.xlu1 %v6514_v12, %s5309_s15  ;;  %v1553_v12 = vld [vmem:[#allocation2 + $0x1d2] sm:$0xff]  ;;  %4231 = vmatprep.subr.mxu1 %v8019_v40 }
 0x21c   : > { %1316 = vst.msk [vmem:[#allocation4 + $0x1d0] sm:$0xff] %vm654_vm3, %v1240_v21  ;;  %4232 = vmatpush1.msra.mxu1 %v4093_v52 }
 0x21d   : > { %1509 = vst.msk [vmem:[#allocation4 + $0x1d0] sm:$0xff] %vm847_vm4, %v1433_v50  ;;  %1646 = vrot.lane.b32.xlu0 %v1552_v61, %s5309_s15  ;;  %v1625_v57 = vpop.permute.xlu1 %1624  ;;  %v1832_v27 = vld [vmem:[#allocation4 + $0x1b0] sm:$0xff]  ;;  %4233 = vmatprep.subr.mxu1 %v8019_v40 }
 0x21e   : > { %1701 = vst.msk [vmem:[#allocation4 + $0x1d0] sm:$0xff] %vm1040_vm5, %v1625_v57  ;;  %4234 = vmatpush1.msra.mxu1 %v4092_v46  ;;  %v4113_v46 = vld [vmem:[%s7983_s4 + $0xe0] sm:$0xff] }
 0x21f   : > { %v790_v36 = vpop.permute.xlu0 %789  ;;  %v1833_v29 = vld [vmem:[#allocation4 + $0x1b8] sm:$0xff]  ;;  %1456 = vrot.lane.b32.xlu1 %v1361_v16, %s5308_s20  ;;  %4235 = vmatprep.subr.mxu1 %v8019_v40 }
 0x220   : > { %867 = vst.msk [vmem:[#allocation4 + $0x1c8] sm:$0xff] %vm847_vm4, %v790_v36  ;;  %2160 = vmatprep.mubr.f32.mxu0 %v1833_v29  ;;  %v4091_v29 = vld [vmem:[%s7983_s4 + $0x30] sm:$0xff] }
 0x221   : > { %1263 = vrot.lane.b32.xlu0 %v1168_v7, %s5307_s9  ;;  %2161 = vmatmul.mubr.f32.gmra.mxu0 %v1832_v27  ;;  %v1242_v39 = vpop.permute.xlu1 %1241  ;;  %v6692_v7 = vpop.f32.mrf.mxu1 }
 0x222   : > { %1317 = vst.msk [vmem:[#allocation4 + $0x1e8] sm:$0xff] %vm654_vm3, %v1242_v39  ;;  %4236 = vmatpush1.msra.mxu1 %v4091_v29  ;;  %v4090_v39 = vld [vmem:[%s7983_s4 + $0x28] sm:$0xff] }
 0x223   : > { %v983_v3 = vpop.permute.xlu0 %982  ;;  %1648 = vrot.lane.b32.xlu1 %v1553_v12, %s5309_s15  ;;  %4237 = vmatprep.subr.mxu1 %v8019_v40 }
 0x224   : > { %1060 = vst.msk [vmem:[#allocation4 + $0x1c8] sm:$0xff] %vm1040_vm5, %v983_v3  ;;  %4238 = vmatpush1.msra.mxu1 %v4090_v39  ;;  %v2902_v39 = vld [vmem:[#allocation3 + $0x1c] sm:$0xff] }
 0x225   : > { %813 = vrot.lane.b32.xlu0 %v6530_v13, %s5308_s20  ;;  %v792_v33 = vpop.permute.xlu1 %791  ;;  %v1836_v44 = vld [vmem:[#allocation4 + $0x1d0] sm:$0xff]  ;;  %4239 = vmatprep.subr.mxu1 %v8019_v40 }
 0x226   : > { %868 = vst.msk [vmem:[#allocation4 + $0x1e0] sm:$0xff] %vm847_vm4, %v792_v33  ;;  %2165 = vmatprep.mubr.f32.mxu0 %v1836_v44  ;;  %4240 = vmatpush1.msra.mxu1 %v4089_v54  ;;  %v4110_v54 = vld [vmem:[%s7983_s4 + $0xc8] sm:$0xff] }
 0x227   : > { %v1435_v56 = vpop.permute.xlu0 %1434  ;;  %4241 = vmatprep.subr.mxu1 %v8019_v40 }
 0x228   : > { %1510 = vst.msk [vmem:[#allocation4 + $0x1e8] sm:$0xff] %vm847_vm4, %v1435_v56 }
 0x229   : > { %1006 = vrot.lane.b32.xlu0 %v6525_v37, %s5309_s15  ;;  %v985_v13 = vpop.permute.xlu1 %984  ;;  %v4117_v37 = vld [vmem:[%s7983_s4 + $0x100] sm:$0xff] }
 0x22a   : > { %1061 = vst.msk [vmem:[#allocation4 + $0x1e0] sm:$0xff] %vm1040_vm5, %v985_v13  ;;  %5125 = vmatprep.subr.mxu0 %v4117_v37  ;;  %v2307_v13 = vpop.f32.mrf.mxu1 }
 0x22b   : > { %v1627_v41 = vpop.permute.xlu0 %1626  ;;  %v1835_v43 = vld [vmem:[#allocation4 + $0x1c8] sm:$0xff]  ;;  %5126 = vmatpush3.msra.mxu0 %v4117_v37 }
 0x22c   : > { %1702 = vst.msk [vmem:[#allocation4 + $0x1e8] sm:$0xff] %vm1040_vm5, %v1627_v41  ;;  %2166 = vmatmul.mubr.f32.gmra.mxu0 %v1835_v43  ;;  %v5079_v25 = vpop.f32.mrf.mxu1 }
 0x22d   : > { %2772 = vrot.lane.b32.xlu0 %v2708_v45, %s5307_s9  ;;  %v1437_v47 = vpop.permute.xlu1 %1436 }
 0x22f   : > { %v1244_v53 = vpop.permute.xlu0 %1243 }
 0x230   : > { %1318 = vst.msk [vmem:[#allocation4 + $0x200] sm:$0xff] %vm654_vm3, %v1244_v53 }
 0x231   : > { %1511 = vst.msk [vmem:[#allocation4 + $0x200] sm:$0xff] %vm847_vm4, %v1437_v47  ;;  %2964 = vrot.lane.b32.xlu0 %v2900_v4, %s5308_s20  ;;  %v1629_v1 = vpop.permute.xlu1 %1628  ;;  %v1838_v59 = vld [vmem:[#allocation4 + $0x1e0] sm:$0xff]  ;;  %v4088_v47 = vld [vmem:[%s7983_s4 + $0x18] sm:$0xff] }
 0x232   : > { %1703 = vst.msk [vmem:[#allocation4 + $0x200] sm:$0xff] %vm1040_vm5, %v1629_v1  ;;  %v2709_v1 = vld [vmem:[#allocation3 + $0xa] sm:$0xff]  ;;  %4242 = vmatpush1.msra.mxu1 %v4088_v47 }
 0x233   : > { %v794_v24 = vpop.permute.xlu0 %793  ;;  %v1839_v55 = vld [vmem:[#allocation4 + $0x1e8] sm:$0xff]  ;;  %4243 = vmatprep.subr.mxu1 %v8019_v40 }
 0x234   : > { %869 = vst.msk [vmem:[#allocation4 + $0x1f8] sm:$0xff] %vm847_vm4, %v794_v24  ;;  %2170 = vmatprep.mubr.f32.mxu0 %v1839_v55 }
 0x235   : > { %2171 = vmatmul.mubr.f32.gmra.mxu0 %v1838_v59  ;;  %v1246_v8 = vpop.permute.xlu1 %1245 }
 0x236   : > { %1319 = vst.msk [vmem:[#allocation4 + $0x218] sm:$0xff] %vm654_vm3, %v1246_v8  ;;  %v4087_v8 = vld [vmem:[%s7983_s4 + $0x10] sm:$0xff] }
 0x237   : > { %v987_v34 = vpop.permute.xlu0 %986  ;;  %4244 = vmatpush1.msra.mxu1 %v4087_v8 }
 0x238   : > { %1062 = vst.msk [vmem:[#allocation4 + $0x1f8] sm:$0xff] %vm1040_vm5, %v987_v34  ;;  %v2645_v34 = vld [vmem:[#allocation3 + $0x8] sm:$0xff]  ;;  %4245 = vmatprep.subr.mxu1 %v8019_v40 }
 0x239   : > { %v796_v23 = vpop.permute.xlu1 %795  ;;  %v1842_v14 = vld [vmem:[#allocation4 + $0x200] sm:$0xff]  ;;  %2677 = vst.msk [vmem:[#allocation4 + $0x18] sm:$0xff] %vm285_vm0, %v2645_v34 }
 0x23a   : > { %870 = vst.msk [vmem:[#allocation4 + $0x210] sm:$0xff] %vm847_vm4, %v796_v23  ;;  %2175 = vmatprep.mubr.f32.mxu0 %v1842_v14  ;;  %v4086_v23 = vld [vmem:[%s7983_s4 + $0x8] sm:$0xff] }
 0x23b   : > { %v1439_v48 = vpop.permute.xlu0 %1438  ;;  %4246 = vmatpush1.msra.mxu1 %v4086_v23  ;;  %v2711_v34 = vld [vmem:[#allocation3 + $0x22] sm:$0xff] }
 0x23c   : > { %1512 = vst.msk [vmem:[#allocation4 + $0x218] sm:$0xff] %vm847_vm4, %v1439_v48  ;;  %v2901_v48 = vld [vmem:[#allocation3 + $0xc] sm:$0xff]  ;;  %4247 = vmatprep.subr.mxu1 %v8019_v40 }
 0x23d   : > { %v989_v0 = vpop.permute.xlu1 %988  ;;  %4248 = vmatpush1.msra.mxu1 %v4085_v9 }
 0x23e   : > { %1063 = vst.msk [vmem:[#allocation4 + $0x210] sm:$0xff] %vm1040_vm5, %v989_v0  ;;  %4249 = vmatprep.subr.mxu1 %v8019_v40 }
 0x23f   : > { %v1631_v31 = vpop.permute.xlu0 %1630  ;;  %v1841_v30 = vld [vmem:[#allocation4 + $0x1f8] sm:$0xff]  ;;  %4250 = vmatpush2.msra.mxu1 %v4116_v63 }
 0x240   : > { %1704 = vst.msk [vmem:[#allocation4 + $0x218] sm:$0xff] %vm1040_vm5, %v1631_v31  ;;  %v2072_v32 = vpop.f32.mrf.mxu0  ;;  %2176 = vmatmul.mubr.f32.gmra.mxu0 %v1841_v30  ;;  %4251 = vmatprep.subr.mxu1 %v8019_v40 }
 0x241   : > { %v2298_v18 = vadd.f32 %v2297_v17, %v2072_v32  ;;  %v1441_v11 = vpop.permute.xlu1 %1440 }
 0x242   : > { %v2074_v22 = vpop.f32.mrf.mxu0 }
 0x243   : > { %v2463_v49 = vmul.f32 %v6651_v28, %v2298_v18  ;;  %v1248_v20 = vpop.permute.xlu0 %1247 }
 0x244   : > { %1320 = vst.msk [vmem:[#allocation4 + $0x230] sm:$0xff] %vm654_vm3, %v1248_v20  ;;  %v4115_v20 = vld [vmem:[%s7983_s4 + $0xf0] sm:$0xff] }
 0x245   : > { %v2502_v38 = vadd.f32 %v6660_v60, %v2463_v49  ;;  %1513 = vst.msk [vmem:[#allocation4 + $0x230] sm:$0xff] %vm847_vm4, %v1441_v11  ;;  %v1633_v51 = vpop.permute.xlu1 %1632  ;;  %v1844_v50 = vld [vmem:[#allocation4 + $0x210] sm:$0xff]  ;;  %4252 = vmatpush2.msra.mxu1 %v4115_v20 }
 0x246   : > { %1705 = vst.msk [vmem:[#allocation4 + $0x230] sm:$0xff] %vm1040_vm5, %v1633_v51  ;;  %v4114_v51 = vld [vmem:[%s7983_s4 + $0xe8] sm:$0xff]  ;;  %4253 = vmatprep.subr.mxu1 %v8019_v40 }
 0x247   : > { %v2534_v61 = vmax.f32 %v2502_v38, 0.0  ;;  %v798_v21 = vpop.permute.xlu0 %797  ;;  %v1845_v6 = vld [vmem:[#allocation4 + $0x218] sm:$0xff]  ;;  %4254 = vmatpush2.msra.mxu1 %v4114_v51 }
 0x248   : > { %871 = vst.msk [vmem:[#allocation4 + $0x228] sm:$0xff] %vm847_vm4, %v798_v21  ;;  %v2077_v16 = vpop.f32.mrf.mxu0  ;;  %2180 = vmatprep.mubr.f32.mxu0 %v1845_v6  ;;  %4255 = vmatprep.subr.mxu1 %v8019_v40 }
 0x249   : > { %2612 = vst.msk [vmem:[#allocation3 + $0x32] sm:$0xff] %vm285_vm0, %v2534_v61  ;;  %v2303_v10 = vadd.f32 %v5073_v42, %v2077_v16  ;;  %2181 = vmatmul.mubr.f32.gmra.mxu0 %v1844_v50  ;;  %v1250_v27 = vpop.permute.xlu1 %1249  ;;  %v2646_v42 = vld [vmem:[#allocation3 + $0x18] sm:$0xff]  ;;  %v2317_v16 = vpop.f32.mrf.mxu1  ;;  %4256 = vmatpush2.msra.mxu1 %v4113_v46 }
 0x24a   : > { %v2079_v57 = vpop.f32.mrf.mxu0  ;;  %1321 = vst.msk [vmem:[#allocation4 + $0x248] sm:$0xff] %vm654_vm3, %v1250_v27  ;;  %v2710_v61 = vld [vmem:[#allocation3 + $0x1a] sm:$0xff]  ;;  %4257 = vmatprep.subr.mxu1 %v8019_v40 }
 0x24b   : > { %v2464_v19 = vmul.f32 %v6651_v28, %v2303_v10  ;;  %v991_v36 = vpop.permute.xlu0 %990  ;;  %2678 = vst.msk [vmem:[#allocation4 + $0x30] sm:$0xff] %vm285_vm0, %v2646_v42  ;;  %v6818_v9 = vpop.f32.mrf.mxu1 }
 0x24c   : > { %1064 = vst.msk [vmem:[#allocation4 + $0x228] sm:$0xff] %vm1040_vm5, %v991_v36  ;;  %v4112_v36 = vld [vmem:[%s7983_s4 + $0xd8] sm:$0xff] }
 0x24d   : > { %v2503_v12 = vadd.f32 %v6660_v60, %v2464_v19  ;;  %v800_v3 = vpop.permute.xlu1 %799  ;;  %v1848_v33 = vld [vmem:[#allocation4 + $0x230] sm:$0xff]  ;;  %4258 = vmatpush2.msra.mxu1 %v4112_v36 }
 0x24e   : > { %872 = vst.msk [vmem:[#allocation4 + $0x240] sm:$0xff] %vm847_vm4, %v800_v3  ;;  %2185 = vmatprep.mubr.f32.mxu0 %v1848_v33  ;;  %4259 = vmatprep.subr.mxu1 %v8019_v40 }
 0x24f   : > { %v2535_v44 = vmax.f32 %v2503_v12, 0.0  ;;  %v1443_v56 = vpop.permute.xlu0 %1442 }
 0x250   : > { %1514 = vst.msk [vmem:[#allocation4 + $0x248] sm:$0xff] %vm847_vm4, %v1443_v56  ;;  %v2082_v45 = vpop.f32.mrf.mxu0  ;;  %v3092_v41 = vld [vmem:[#allocation3 + $0x30] sm:$0xff] }
 0x251   : > { %v6706_v43 = vld [vmem:[#allocation3 + $0x32] sm:$0xff]  ;;  %2613 = vst.msk [vmem:[#allocation3 + $0x3a] sm:$0xff] %vm285_vm0, %v2535_v44  ;;  %v2308_v37 = vadd.f32 %v2307_v13, %v2082_v45  ;;  %3156 = vrot.lane.b32.xlu0 %v3092_v41, %s5309_s15  ;;  %v993_v53 = vpop.permute.xlu1 %992 }
 0x252   : > { %v2648_v62 = vld [vmem:[#allocation3 + $0x30] sm:$0xff]  ;;  %3316 = vst.msk [vmem:[#allocation4 + $0x8] sm:$0xff] %vm285_vm0, %v6706_v43  ;;  %v2084_v4 = vpop.f32.mrf.mxu0 }
 0x253   : > { %2680 = vst.msk [vmem:[#allocation4 + $0x60] sm:$0xff] %vm285_vm0, %v2648_v62  ;;  %v2465_v59 = vmul.f32 %v6651_v28, %v2308_v37  ;;  %v1635_v24 = vpop.permute.xlu0 %1634  ;;  %v1847_v55 = vld [vmem:[#allocation4 + $0x228] sm:$0xff]  ;;  %v4111_v44 = vld [vmem:[%s7983_s4 + $0xd0] sm:$0xff]  ;;  %v4109_v37 = vld [vmem:[%s7983_s4 + $0xc0] sm:$0xff] }
 0x254   : > { %1065 = vst.msk [vmem:[#allocation4 + $0x240] sm:$0xff] %vm1040_vm5, %v993_v53  ;;  %1706 = vst.msk [vmem:[#allocation4 + $0x248] sm:$0xff] %vm1040_vm5, %v1635_v24  ;;  %2186 = vmatmul.mubr.f32.gmra.mxu0 %v1847_v55  ;;  %4260 = vmatpush2.msra.mxu1 %v4111_v44  ;;  %v4108_v24 = vld [vmem:[%s7983_s4 + $0xb8] sm:$0xff] }
 0x255   : > { %v2504_v5 = vadd.f32 %v6660_v60, %v2465_v59  ;;  %2774 = vrot.lane.b32.xlu0 %v2709_v1, %s5307_s9  ;;  %v1445_v14 = vpop.permute.xlu1 %1444  ;;  %4261 = vmatprep.subr.mxu1 %v8019_v40  ;;  %v2647_v59 = vld [vmem:[#allocation3 + $0x20] sm:$0xff] }
 0x256   : > { %4262 = vmatpush2.msra.mxu1 %v4110_v54  ;;  %2679 = vst.msk [vmem:[#allocation4 + $0x48] sm:$0xff] %vm285_vm0, %v2647_v59 }
 0x257   : > { %v2536_v2 = vmax.f32 %v2504_v5, 0.0  ;;  %v1252_v0 = vpop.permute.xlu0 %1251  ;;  %4263 = vmatprep.subr.mxu1 %v8019_v40 }
 0x258   : > { %1322 = vst.msk [vmem:[#allocation4 + $0x260] sm:$0xff] %vm654_vm3, %v1252_v0  ;;  %v2087_v31 = vpop.f32.mrf.mxu0  ;;  %v6737_v30 = vld [vmem:[#allocation3 + $0x34] sm:$0xff]  ;;  %4264 = vmatpush2.msra.mxu1 %v4109_v37 }
 0x259   : > { %2614 = vst.msk [vmem:[#allocation3 + $0x4a] sm:$0xff] %vm285_vm0, %v2536_v2  ;;  %v2313_v17 = vadd.f32 %v6692_v7, %v2087_v31  ;;  %3412 = vrot.lane.b32.xlu1 %v6737_v30, %s5307_s9  ;;  %2966 = vrot.lane.b32.xlu0 %v2901_v48, %s5308_s20  ;;  %v6748_v32 = vld [vmem:[#allocation3 + $0x3a] sm:$0xff]  ;;  %v1637_v22 = vpop.permute.xlu1 %1636  ;;  %v4106_v2 = vld [vmem:[%s7983_s4 + $0xa8] sm:$0xff] }
 0x25a   : > { %1515 = vst.msk [vmem:[#allocation4 + $0x260] sm:$0xff] %vm847_vm4, %v1445_v14  ;;  %v2649_v18 = vld [vmem:[#allocation3 + $0x38] sm:$0xff]  ;;  %v2089_v35 = vpop.f32.mrf.mxu0  ;;  %4265 = vmatprep.subr.mxu1 %v8019_v40  ;;  %v4107_v14 = vld [vmem:[%s7983_s4 + $0xb0] sm:$0xff]  ;;  %v2903_v31 = vld [vmem:[#allocation3 + $0x24] sm:$0xff] }
 0x25b   : > { %v1850_v11 = vld [vmem:[#allocation4 + $0x240] sm:$0xff]  ;;  %3317 = vst.msk [vmem:[#allocation4 + $0x20] sm:$0xff] %vm285_vm0, %v6748_v32  ;;  %2681 = vst.msk [vmem:[#allocation4 + $0x78] sm:$0xff] %vm285_vm0, %v2649_v18  ;;  %v2466_v58 = vmul.f32 %v6651_v28, %v2313_v17  ;;  %v802_v15 = vpop.permute.xlu0 %801  ;;  %v1851_v49 = vld [vmem:[#allocation4 + $0x248] sm:$0xff]  ;;  %4266 = vmatpush2.msra.mxu1 %v4108_v24 }
 0x25c   : > { %1707 = vst.msk [vmem:[#allocation4 + $0x260] sm:$0xff] %vm1040_vm5, %v1637_v22  ;;  %2190 = vmatprep.mubr.f32.mxu0 %v1851_v49  ;;  %v3093_v38 = vld [vmem:[#allocation3 + $0x38] sm:$0xff]  ;;  %4267 = vmatprep.subr.mxu1 %v8019_v40  ;;  %v2327_v22 = vpop.f32.mrf.mxu1 }
 0x25d   : > { %873 = vst.msk [vmem:[#allocation4 + $0x258] sm:$0xff] %vm847_vm4, %v802_v15  ;;  %v2505_v52 = vadd.f32 %v6660_v60, %v2466_v58  ;;  %3158 = vrot.lane.b32.xlu0 %v3093_v38, %s5309_s15  ;;  %2191 = vmatmul.mubr.f32.gmra.mxu0 %v1850_v11  ;;  %v1254_v50 = vpop.permute.xlu1 %1253  ;;  %v4105_v15 = vld [vmem:[%s7983_s4 + $0xa0] sm:$0xff] }
 0x25e   : > { %1323 = vst.msk [vmem:[#allocation4 + $0x278] sm:$0xff] %vm654_vm3, %v1254_v50  ;;  %4268 = vmatpush2.msra.mxu1 %v4107_v14  ;;  %v5085_v37 = vpop.f32.mrf.mxu1 }
 0x25f   : > { %v2537_v21 = vmax.f32 %v2505_v52, 0.0  ;;  %v995_v6 = vpop.permute.xlu0 %994  ;;  %4269 = vmatprep.subr.mxu1 %v8019_v40 }
 0x260   : > { %1066 = vst.msk [vmem:[#allocation4 + $0x258] sm:$0xff] %vm1040_vm5, %v995_v6  ;;  %v2092_v10 = vpop.f32.mrf.mxu0  ;;  %v6772_v57 = vld [vmem:[#allocation3 + $0x4a] sm:$0xff]  ;;  %4270 = vmatpush2.msra.mxu1 %v4106_v2 }
 0x261   : > { %v2650_v27 = vld [vmem:[#allocation3 + $0x48] sm:$0xff]  ;;  %2615 = vst.msk [vmem:[#allocation3 + $0x52] sm:$0xff] %vm285_vm0, %v2537_v21  ;;  %v2318_v19 = vadd.f32 %v2317_v16, %v2092_v10  ;;  %2776 = vrot.lane.b32.xlu0 %v2710_v61, %s5307_s9  ;;  %3318 = vst.msk [vmem:[#allocation4 + $0x38] sm:$0xff] %vm285_vm0, %v6772_v57  ;;  %v804_v7 = vpop.permute.xlu1 %803  ;;  %4271 = vmatprep.subr.mxu1 %v8019_v40  ;;  %v4104_v61 = vld [vmem:[%s7983_s4 + $0x98] sm:$0xff] }
 0x262   : > { %2682 = vst.msk [vmem:[#allocation4 + $0x90] sm:$0xff] %vm285_vm0, %v2650_v27  ;;  %v2094_v29 = vpop.f32.mrf.mxu0  ;;  %v3094_v4 = vld [vmem:[#allocation3 + $0x48] sm:$0xff]  ;;  %4272 = vmatpush2.msra.mxu1 %v4105_v15  ;;  %v4103_v16 = vld [vmem:[%s7983_s4 + $0x90] sm:$0xff] }
 0x263   : > { %v1854_v12 = vld [vmem:[#allocation4 + $0x260] sm:$0xff]  ;;  %v2467_v3 = vmul.f32 %v6651_v28, %v2318_v19  ;;  %874 = vst.msk [vmem:[#allocation4 + $0x270] sm:$0xff] %vm847_vm4, %v804_v7  ;;  %v1447_v33 = vpop.permute.xlu0 %1446  ;;  %4273 = vmatprep.subr.mxu1 %v8019_v40 }
 0x264   : > { %2195 = vmatprep.mubr.f32.mxu0 %v1854_v12  ;;  %1516 = vst.msk [vmem:[#allocation4 + $0x278] sm:$0xff] %vm847_vm4, %v1447_v33  ;;  %4274 = vmatpush2.msra.mxu1 %v4104_v61  ;;  %v6861_v29 = vld [vmem:[#allocation3 + $0x3c] sm:$0xff] }
 0x265   : > { %v2506_v56 = vadd.f32 %v6660_v60, %v2467_v3  ;;  %2968 = vrot.lane.b32.xlu0 %v2902_v39, %s5308_s20  ;;  %v997_v13 = vpop.permute.xlu1 %996  ;;  %4275 = vmatprep.subr.mxu1 %v8019_v40  ;;  %v4102_v3 = vld [vmem:[%s7983_s4 + $0x88] sm:$0xff] }
 0x266   : > { %1067 = vst.msk [vmem:[#allocation4 + $0x270] sm:$0xff] %vm1040_vm5, %v997_v13  ;;  %4276 = vmatpush2.msra.mxu1 %v4103_v16 }
 0x267   : > { %v2538_v45 = vmax.f32 %v2506_v56, 0.0  ;;  %v1639_v41 = vpop.permute.xlu0 %1638  ;;  %v1853_v62 = vld [vmem:[#allocation4 + $0x258] sm:$0xff]  ;;  %4277 = vmatprep.subr.mxu1 %v8019_v40 }
 0x268   : > { %1708 = vst.msk [vmem:[#allocation4 + $0x278] sm:$0xff] %vm1040_vm5, %v1639_v41  ;;  %v2097_v47 = vpop.f32.mrf.mxu0  ;;  %2196 = vmatmul.mubr.f32.gmra.mxu0 %v1853_v62  ;;  %v6804_v1 = vld [vmem:[#allocation3 + $0x52] sm:$0xff]  ;;  %4278 = vmatpush2.msra.mxu1 %v4102_v3 }
 0x269   : > { %2616 = vst.msk [vmem:[#allocation3 + $0x62] sm:$0xff] %vm285_vm0, %v2538_v45  ;;  %v2323_v53 = vadd.f32 %v5079_v25, %v2097_v47  ;;  %3160 = vrot.lane.b32.xlu0 %v3094_v4, %s5309_s15  ;;  %v1449_v8 = vpop.permute.xlu1 %1448  ;;  %3319 = vst.msk [vmem:[#allocation4 + $0x50] sm:$0xff] %vm285_vm0, %v6804_v1  ;;  %v2651_v48 = vld [vmem:[#allocation3 + $0x50] sm:$0xff]  ;;  %4279 = vmatprep.subr.mxu1 %v8019_v40 }
 0x26a   : > { %v2099_v55 = vpop.f32.mrf.mxu0  ;;  %2683 = vst.msk [vmem:[#allocation4 + $0xa8] sm:$0xff] %vm285_vm0, %v2651_v48  ;;  %v3095_v6 = vld [vmem:[#allocation3 + $0x50] sm:$0xff] }
 0x26b   : > { %v2468_v5 = vmul.f32 %v6651_v28, %v2323_v53  ;;  %v1256_v23 = vpop.permute.xlu0 %1255  ;;  %v2337_v55 = vpop.f32.mrf.mxu1  ;;  %v3350_v2 = vld [vmem:[#allocation3 + $0x4c] sm:$0xff] }
 0x26c   : > { %1324 = vst.msk [vmem:[#allocation4 + $0x290] sm:$0xff] %vm654_vm3, %v1256_v23 }
 0x26d   : > { %v2507_v42 = vadd.f32 %v6660_v60, %v2468_v5  ;;  %1517 = vst.msk [vmem:[#allocation4 + $0x290] sm:$0xff] %vm847_vm4, %v1449_v8  ;;  %2778 = vrot.lane.b32.xlu0 %v2711_v34, %s5307_s9  ;;  %v1641_v0 = vpop.permute.xlu1 %1640  ;;  %v1856_v35 = vld [vmem:[#allocation4 + $0x270] sm:$0xff] }
 0x26e   : > { %1709 = vst.msk [vmem:[#allocation4 + $0x290] sm:$0xff] %vm1040_vm5, %v1641_v0 }
 0x26f   : > { %v2539_v63 = vmax.f32 %v2507_v42, 0.0  ;;  %v806_v17 = vpop.permute.xlu0 %805  ;;  %v1857_v18 = vld [vmem:[#allocation4 + $0x278] sm:$0xff] }
 0x270   : > { %875 = vst.msk [vmem:[#allocation4 + $0x288] sm:$0xff] %vm847_vm4, %v806_v17  ;;  %v2102_v11 = vpop.f32.mrf.mxu0  ;;  %2200 = vmatprep.mubr.f32.mxu0 %v1857_v18  ;;  %v6832_v58 = vld [vmem:[#allocation3 + $0x60] sm:$0xff] }
 0x271   : > { %v3288_v49 = vld [vmem:[#allocation3 + $0x62] sm:$0xff]  ;;  %2617 = vst.msk [vmem:[#allocation3 + $0x6a] sm:$0xff] %vm285_vm0, %v2539_v63  ;;  %v2328_v20 = vadd.f32 %v2327_v22, %v2102_v11  ;;  %3605 = vrot.lane.b32.xlu1 %v6832_v58, %s5308_s20  ;;  %2970 = vrot.lane.b32.xlu0 %v2903_v31, %s5308_s20  ;;  %v1258_v52 = vpop.permute.xlu1 %1257 }
 0x272   : > { %3320 = vst.msk [vmem:[#allocation4 + $0x68] sm:$0xff] %vm285_vm0, %v3288_v49  ;;  %v2652_v25 = vld [vmem:[#allocation3 + $0x60] sm:$0xff]  ;;  %2201 = vmatmul.mubr.f32.gmra.mxu0 %v1856_v35  ;;  %v2104_v38 = vpop.f32.mrf.mxu0 }
 0x273   : > { %2684 = vst.msk [vmem:[#allocation4 + $0xc0] sm:$0xff] %vm285_vm0, %v2652_v25  ;;  %v2469_v51 = vmul.f32 %v6651_v28, %v2328_v20  ;;  %v999_v50 = vpop.permute.xlu0 %998  ;;  %v6850_v21 = vld [vmem:[#allocation3 + $0x62] sm:$0xff] }
 0x274   : > { %1325 = vst.msk [vmem:[#allocation4 + $0x2a8] sm:$0xff] %vm654_vm3, %v1258_v52 }
 0x275   : > { %1068 = vst.msk [vmem:[#allocation4 + $0x288] sm:$0xff] %vm1040_vm5, %v999_v50  ;;  %v2508_v46 = vadd.f32 %v6660_v60, %v2469_v51  ;;  %3797 = vrot.lane.b32.xlu1 %v6850_v21, %s5309_s15  ;;  %3162 = vrot.lane.b32.xlu0 %v3095_v6, %s5309_s15  ;;  %v808_v10 = vpop.permute.xlu1 %807  ;;  %v1860_v27 = vld [vmem:[#allocation4 + $0x290] sm:$0xff]  ;;  %v5088_v50 = vpop.f32.mrf.mxu1 }
 0x276   : > { %876 = vst.msk [vmem:[#allocation4 + $0x2a0] sm:$0xff] %vm847_vm4, %v808_v10  ;;  %2205 = vmatprep.mubr.f32.mxu0 %v1860_v27  ;;  %v3351_v27 = vld [vmem:[#allocation3 + $0x54] sm:$0xff] }
 0x277   : > { %v2540_v19 = vmax.f32 %v2508_v46, 0.0  ;;  %v1451_v36 = vpop.permute.xlu0 %1450 }
 0x278   : > { %v6864_v7 = vld [vmem:[#allocation3 + $0x64] sm:$0xff]  ;;  %v6866_v12 = vld [vmem:[#allocation3 + $0x6c] sm:$0xff]  ;;  %1518 = vst.msk [vmem:[#allocation4 + $0x2a8] sm:$0xff] %vm847_vm4, %v1451_v36  ;;  %v2107_v39 = vpop.f32.mrf.mxu0 }
 0x279   : > { %3957 = vst.msk [vmem:[#allocation4 + $0x10] sm:$0xff] %vm285_vm0, %v6864_v7  ;;  %3958 = vst.msk [vmem:[#allocation4 + $0x28] sm:$0xff] %vm285_vm0, %v6866_v12  ;;  %v2333_v33 = vadd.f32 %v6818_v9, %v2107_v39  ;;  %3414 = vrot.lane.b32.xlu1 %v6861_v29, %s5307_s9  ;;  %2780 = vrot.lane.b32.xlu0 %v6706_v43, %s5307_s9  ;;  %v3289_v44 = vld [vmem:[#allocation3 + $0x6a] sm:$0xff]  ;;  %v1001_v13 = vpop.permute.xlu1 %1000  ;;  %v4101_v43 = vld [vmem:[%s7983_s4 + $0x80] sm:$0xff] }
 0x27a   : > { %2618 = vst.msk [vmem:[#allocation3 + $0x7a] sm:$0xff] %vm285_vm0, %v2540_v19  ;;  %v2653_v56 = vld [vmem:[#allocation3 + $0x68] sm:$0xff]  ;;  %v2109_v54 = vpop.f32.mrf.mxu0  ;;  %3321 = vst.msk [vmem:[#allocation4 + $0x80] sm:$0xff] %vm285_vm0, %v3289_v44  ;;  %4280 = vmatpush2.msra.mxu1 %v4101_v43  ;;  %v2347_v19 = vpop.f32.mrf.mxu1 }
 0x27b   : > { %2685 = vst.msk [vmem:[#allocation4 + $0xd8] sm:$0xff] %vm285_vm0, %v2653_v56  ;;  %v2470_v45 = vmul.f32 %v6651_v28, %v2333_v33  ;;  %v1643_v41 = vpop.permute.xlu0 %1642  ;;  %v6891_v47 = vld [vmem:[#allocation3 + $0x68] sm:$0xff]  ;;  %5175 = vmatprep.subr.mxu1 %v6603_v26 }
 0x27c   : > { %1069 = vst.msk [vmem:[#allocation4 + $0x2a0] sm:$0xff] %vm1040_vm5, %v1001_v13  ;;  %v1859_v62 = vld [vmem:[#allocation4 + $0x288] sm:$0xff]  ;;  %1710 = vst.msk [vmem:[#allocation4 + $0x2a8] sm:$0xff] %vm1040_vm5, %v1643_v41 }
 0x27d   : > { %2206 = vmatmul.mubr.f32.gmra.mxu0 %v1859_v62  ;;  %v2509_v4 = vadd.f32 %v6660_v60, %v2470_v45  ;;  %3607 = vrot.lane.b32.xlu1 %v6891_v47, %s5308_s20  ;;  %v1453_v53 = vpop.permute.xlu1 %1452  ;;  %v6901_v34 = vld [vmem:[#allocation3 + $0x6a] sm:$0xff] }
 0x27e   : > { %2972 = vrot.lane.b32.xlu0 %v6737_v30, %s5308_s20 }
 0x27f   : > { %v2541_v59 = vmax.f32 %v2509_v4, 0.0  ;;  %v1260_v24 = vpop.permute.xlu0 %1259 }
 0x280   : > { %1326 = vst.msk [vmem:[#allocation4 + $0x2c0] sm:$0xff] %vm654_vm3, %v1260_v24  ;;  %v2112_v8 = vpop.f32.mrf.mxu0 }
 0x281   : > { %2619 = vst.msk [vmem:[#allocation3 + $0x82] sm:$0xff] %vm285_vm0, %v2541_v59  ;;  %v2338_v40 = vadd.f32 %v2337_v55, %v2112_v8  ;;  %3799 = vrot.lane.b32.xlu1 %v6901_v34, %s5309_s15  ;;  %v3290_v30 = vld [vmem:[#allocation3 + $0x7a] sm:$0xff]  ;;  %v1645_v23 = vpop.permute.xlu1 %1644 }
 0x282   : > { %1519 = vst.msk [vmem:[#allocation4 + $0x2c0] sm:$0xff] %vm847_vm4, %v1453_v53  ;;  %3164 = vrot.lane.b32.xlu0 %v6832_v58, %s5309_s15  ;;  %v2654_v5 = vld [vmem:[#allocation3 + $0x78] sm:$0xff]  ;;  %v2114_v26 = vpop.f32.mrf.mxu0 }
 0x283   : > { %3322 = vst.msk [vmem:[#allocation4 + $0x98] sm:$0xff] %vm285_vm0, %v3290_v30  ;;  %2686 = vst.msk [vmem:[#allocation4 + $0xf0] sm:$0xff] %vm285_vm0, %v2654_v5  ;;  %v2471_v14 = vmul.f32 %v6651_v28, %v2338_v40  ;;  %v810_v48 = vpop.permute.xlu0 %809  ;;  %v1863_v9 = vld [vmem:[#allocation4 + $0x2a8] sm:$0xff]  ;;  %v1862_v42 = vld [vmem:[#allocation4 + $0x2a0] sm:$0xff] }
 0x284   : > { %1711 = vst.msk [vmem:[#allocation4 + $0x2c0] sm:$0xff] %vm1040_vm5, %v1645_v23  ;;  %2210 = vmatprep.mubr.f32.mxu0 %v1863_v9  ;;  %v6924_v11 = vld [vmem:[#allocation3 + $0x78] sm:$0xff] }
 0x285   : > { %877 = vst.msk [vmem:[#allocation4 + $0x2b8] sm:$0xff] %vm847_vm4, %v810_v48  ;;  %v2510_v0 = vadd.f32 %v6660_v60, %v2471_v14  ;;  %3416 = vrot.lane.b32.xlu1 %v3350_v2, %s5307_s9  ;;  %2211 = vmatmul.mubr.f32.gmra.mxu0 %v1862_v42  ;;  %v1262_v31 = vpop.permute.xlu1 %1261  ;;  %v6940_v51 = vld [vmem:[#allocation3 + $0x7a] sm:$0xff]  ;;  %v5091_v48 = vpop.f32.mrf.mxu1 }
 0x286   : > { %2782 = vrot.lane.b32.xlu0 %v6748_v32, %s5307_s9  ;;  %1327 = vst.msk [vmem:[#allocation4 + $0x2d8] sm:$0xff] %vm654_vm3, %v1262_v31 }
 0x287   : > { %v2542_v63 = vmax.f32 %v2510_v0, 0.0  ;;  %v1003_v17 = vpop.permute.xlu0 %1002 }
 0x288   : > { %v6919_v18 = vld [vmem:[#allocation3 + $0x7c] sm:$0xff]  ;;  %v6921_v35 = vld [vmem:[#allocation3 + $0x84] sm:$0xff]  ;;  %1070 = vst.msk [vmem:[#allocation4 + $0x2b8] sm:$0xff] %vm1040_vm5, %v1003_v17  ;;  %v2117_v22 = vpop.f32.mrf.mxu0  ;;  %v2357_v17 = vpop.f32.mrf.mxu1 }
 0x289   : > { %3959 = vst.msk [vmem:[#allocation4 + $0x40] sm:$0xff] %vm285_vm0, %v6919_v18  ;;  %3960 = vst.msk [vmem:[#allocation4 + $0x58] sm:$0xff] %vm285_vm0, %v6921_v35  ;;  %v2343_v32 = vadd.f32 %v5085_v37, %v2117_v22  ;;  %3609 = vrot.lane.b32.xlu1 %v6924_v11, %s5308_s20  ;;  %v3291_v58 = vld [vmem:[#allocation3 + $0x82] sm:$0xff]  ;;  %v812_v20 = vpop.permute.xlu1 %811 }
 0x28a   : > { %2620 = vst.msk [vmem:[#allocation3 + $0x92] sm:$0xff] %vm285_vm0, %v2542_v63  ;;  %2974 = vrot.lane.b32.xlu0 %v6861_v29, %s5308_s20  ;;  %v2655_v15 = vld [vmem:[#allocation3 + $0x80] sm:$0xff]  ;;  %v2119_v49 = vpop.f32.mrf.mxu0  ;;  %3323 = vst.msk [vmem:[#allocation4 + $0xb0] sm:$0xff] %vm285_vm0, %v3291_v58 }
 0x28b   : > { %v1866_v25 = vld [vmem:[#allocation4 + $0x2c0] sm:$0xff]  ;;  %2687 = vst.msk [vmem:[#allocation4 + $0x108] sm:$0xff] %vm285_vm0, %v2655_v15  ;;  %v2472_v38 = vmul.f32 %v6651_v28, %v2343_v32  ;;  %v1455_v52 = vpop.permute.xlu0 %1454  ;;  %v3994_v15 = vld [vmem:[#allocation4 + $0x28] sm:$0xff] }
 0x28c   : > { %878 = vst.msk [vmem:[#allocation4 + $0x2d0] sm:$0xff] %vm847_vm4, %v812_v20  ;;  %2215 = vmatprep.mubr.f32.mxu0 %v1866_v25  ;;  %1520 = vst.msk [vmem:[#allocation4 + $0x2d8] sm:$0xff] %vm847_vm4, %v1455_v52  ;;  %v3544_v13 = vld [vmem:[#allocation3 + $0x80] sm:$0xff] }
 0x28d   : > { %v2511_v61 = vadd.f32 %v6660_v60, %v2472_v38  ;;  %3801 = vrot.lane.b32.xlu1 %v6940_v51, %s5309_s15  ;;  %v1005_v6 = vpop.permute.xlu1 %1004  ;;  %v6967_v53 = vld [vmem:[#allocation3 + $0x82] sm:$0xff] }
 0x28e   : > { %3166 = vrot.lane.b32.xlu0 %v6891_v47, %s5309_s15  ;;  %1071 = vst.msk [vmem:[#allocation4 + $0x2d0] sm:$0xff] %vm1040_vm5, %v1005_v6 }
 0x28f   : > { %v2543_v46 = vmax.f32 %v2511_v61, 0.0  ;;  %v1647_v16 = vpop.permute.xlu0 %1646  ;;  %v1865_v10 = vld [vmem:[#allocation4 + $0x2b8] sm:$0xff] }
 0x290   : > { %1712 = vst.msk [vmem:[#allocation4 + $0x2d8] sm:$0xff] %vm1040_vm5, %v1647_v16  ;;  %2216 = vmatmul.mubr.f32.gmra.mxu0 %v1865_v10  ;;  %v3997_v20 = vld [vmem:[#allocation4 + $0x40] sm:$0xff]  ;;  %v4000_v38 = vld [vmem:[#allocation4 + $0x58] sm:$0xff] }
 0x291   : > { %2621 = vst.msk [vmem:[#allocation3 + $0x9a] sm:$0xff] %vm285_vm0, %v2543_v46  ;;  %3418 = vrot.lane.b32.xlu1 %v3351_v27, %s5307_s9  ;;  %v2122_v36 = vpop.f32.mrf.mxu0  ;;  %v3292_v29 = vld [vmem:[#allocation3 + $0x92] sm:$0xff]  ;;  %v1457_v33 = vpop.permute.xlu1 %1456 }
 0x292   : > { %2784 = vrot.lane.b32.xlu0 %v6772_v57, %s5307_s9  ;;  %v2656_v39 = vld [vmem:[#allocation3 + $0x90] sm:$0xff]  ;;  %v2348_v3 = vadd.f32 %v2347_v19, %v2122_v36  ;;  %3324 = vst.msk [vmem:[#allocation4 + $0xc8] sm:$0xff] %vm285_vm0, %v3292_v29 }
 0x293   : > { %2688 = vst.msk [vmem:[#allocation4 + $0x120] sm:$0xff] %vm285_vm0, %v2656_v39  ;;  %v2124_v44 = vpop.f32.mrf.mxu0  ;;  %v1264_v56 = vpop.permute.xlu0 %1263  ;;  %v3545_v14 = vld [vmem:[#allocation3 + $0x90] sm:$0xff] }
 0x294   : > { %v2473_v54 = vmul.f32 %v6651_v28, %v2348_v3  ;;  %1328 = vst.msk [vmem:[#allocation4 + $0x2f0] sm:$0xff] %vm654_vm3, %v1264_v56  ;;  %v6992_v63 = vld [vmem:[#allocation3 + $0x92] sm:$0xff] }
 0x295   : > { %3611 = vrot.lane.b32.xlu1 %v3544_v13, %s5308_s20  ;;  %1521 = vst.msk [vmem:[#allocation4 + $0x2f0] sm:$0xff] %vm847_vm4, %v1457_v33  ;;  %v1649_v45 = vpop.permute.xlu1 %1648  ;;  %v1868_v43 = vld [vmem:[#allocation4 + $0x2d0] sm:$0xff]  ;;  %v5094_v33 = vpop.f32.mrf.mxu1 }
 0x296   : > { %2976 = vrot.lane.b32.xlu0 %v3350_v2, %s5308_s20  ;;  %v2512_v57 = vadd.f32 %v6660_v60, %v2473_v54  ;;  %1713 = vst.msk [vmem:[#allocation4 + $0x2f0] sm:$0xff] %vm1040_vm5, %v1649_v45 }
 0x297   : > { %v814_v41 = vpop.permute.xlu0 %813  ;;  %v1869_v62 = vld [vmem:[#allocation4 + $0x2d8] sm:$0xff]  ;;  %v2367_v45 = vpop.f32.mrf.mxu1 }
 0x298   : > { %v6962_v37 = vld [vmem:[#allocation3 + $0x94] sm:$0xff]  ;;  %v6964_v47 = vld [vmem:[#allocation3 + $0x9c] sm:$0xff]  ;;  %v2544_v4 = vmax.f32 %v2512_v57, 0.0  ;;  %879 = vst.msk [vmem:[#allocation4 + $0x2e8] sm:$0xff] %vm847_vm4, %v814_v41  ;;  %2220 = vmatprep.mubr.f32.mxu0 %v1869_v62 }
 0x299   : > { %3961 = vst.msk [vmem:[#allocation4 + $0x70] sm:$0xff] %vm285_vm0, %v6962_v37  ;;  %3962 = vst.msk [vmem:[#allocation4 + $0x88] sm:$0xff] %vm285_vm0, %v6964_v47  ;;  %3803 = vrot.lane.b32.xlu1 %v6967_v53, %s5309_s15  ;;  %v3293_v59 = vld [vmem:[#allocation3 + $0x9a] sm:$0xff]  ;;  %2221 = vmatmul.mubr.f32.gmra.mxu0 %v1868_v43 }
 0x29a   : > { %3168 = vrot.lane.b32.xlu0 %v6924_v11, %s5309_s15  ;;  %v2657_v24 = vld [vmem:[#allocation3 + $0x98] sm:$0xff]  ;;  %2622 = vst.msk [vmem:[#allocation3 + $0xaa] sm:$0xff] %vm285_vm0, %v2544_v4  ;;  %3325 = vst.msk [vmem:[#allocation4 + $0xe0] sm:$0xff] %vm285_vm0, %v3293_v59  ;;  %v3991_v11 = vld [vmem:[#allocation4 + $0x10] sm:$0xff] }
 0x29b   : > { %2689 = vst.msk [vmem:[#allocation4 + $0x138] sm:$0xff] %vm285_vm0, %v2657_v24  ;;  %v1007_v55 = vpop.permute.xlu0 %1006  ;;  %v3546_v6 = vld [vmem:[#allocation3 + $0x98] sm:$0xff] }
 0x29c   : > { %1072 = vst.msk [vmem:[#allocation4 + $0x2e8] sm:$0xff] %vm1040_vm5, %v1007_v55  ;;  %v2127_v8 = vpop.f32.mrf.mxu0  ;;  %v7025_v19 = vld [vmem:[#allocation3 + $0x9a] sm:$0xff] }
 0x29d   : > { %v2353_v40 = vadd.f32 %v5088_v50, %v2127_v8  ;;  %3420 = vrot.lane.b32.xlu1 %v6864_v7, %s5307_s9  ;;  %v1872_v5 = vld [vmem:[#allocation4 + $0x2f0] sm:$0xff] }
 0x29e   : > { %2786 = vrot.lane.b32.xlu0 %v6804_v1, %s5307_s9  ;;  %v2129_v30 = vpop.f32.mrf.mxu0  ;;  %2225 = vmatprep.mubr.f32.mxu0 %v1872_v5 }
 0x29f   : > { %v2474_v26 = vmul.f32 %v6651_v28, %v2353_v40  ;;  %v2773_v23 = vpop.permute.xlu0 %2772 }
 0x2a0   : > { %2868 = vst.msk [vmem:[#allocation4] sm:$0xff] %vm654_vm3, %v2773_v23  ;;  %v4006_v10 = vld [vmem:[#allocation4 + $0x88] sm:$0xff] }
 0x2a1   : > { %v2513_v9 = vadd.f32 %v6660_v60, %v2474_v26  ;;  %3613 = vrot.lane.b32.xlu1 %v3545_v14, %s5308_s20  ;;  %v3294_v42 = vld [vmem:[#allocation3 + $0xaa] sm:$0xff]  ;;  %v7073_v26 = vld [vmem:[%s7981_s2] ss:$0 sm:$0xff] }
 0x2a2   : > { %2978 = vrot.lane.b32.xlu0 %v3351_v27, %s5308_s20  ;;  %3326 = vst.msk [vmem:[#allocation4 + $0xf8] sm:$0xff] %vm285_vm0, %v3294_v42  ;;  %v2658_v1 = vld [vmem:[#allocation3 + $0xa8] sm:$0xff] }
 0x2a3   : > { %v2545_v2 = vmax.f32 %v2513_v9, 0.0  ;;  %v1871_v0 = vld [vmem:[#allocation4 + $0x2e8] sm:$0xff]  ;;  %v2965_v31 = vpop.permute.xlu0 %2964  ;;  %2690 = vst.msk [vmem:[#allocation4 + $0x150] sm:$0xff] %vm285_vm0, %v2658_v1  ;;  %v5097_v1 = vpop.f32.mrf.mxu1 }
 0x2a4   : > { %2226 = vmatmul.mubr.f32.gmra.mxu0 %v1871_v0  ;;  %3060 = vst.msk [vmem:[#allocation4] sm:$0xff] %vm847_vm4, %v2965_v31  ;;  %v3547_v57 = vld [vmem:[#allocation3 + $0xa8] sm:$0xff] }
 0x2a5   : > { %2623 = vst.msk [vmem:[#allocation3 + $0xb2] sm:$0xff] %vm285_vm0, %v2545_v2  ;;  %3805 = vrot.lane.b32.xlu1 %v6992_v63, %s5309_s15  ;;  %v2132_v22 = vpop.f32.mrf.mxu0  ;;  %5127 = vmatprep.mubr.msk.f32.mxu0 %vm285_vm0, %v3991_v11  ;;  %v7045_v4 = vld [vmem:[#allocation3 + $0xaa] sm:$0xff] }
 0x2a6   : > { %3170 = vrot.lane.b32.xlu0 %v3544_v13, %s5309_s15  ;;  %v2358_v32 = vadd.f32 %v2357_v17, %v2132_v22 }
 0x2a7   : > { %v2134_v58 = vpop.f32.mrf.mxu0 }
 0x2a8   : > { %v2475_v49 = vmul.f32 %v6651_v28, %v2358_v32  ;;  %5128 = vmatmul.mubr.msk.f32.vlgmr.msra.gmra.mxu0 %vm285_vm0, %v3994_v15  ;;  %v2377_v32 = vpop.f32.mrf.mxu1 }
 0x2a9   : > { %3422 = vrot.lane.b32.xlu1 %v6866_v12, %s5307_s9  ;;  %5130 = vmatprep.mubr.msk.f32.mxu0 %vm285_vm0, %v3997_v20 }
 0x2aa   : > { %2788 = vrot.lane.b32.xlu0 %v6850_v21, %s5307_s9  ;;  %v2514_v25 = vadd.f32 %v6660_v60, %v2475_v49  ;;  %v4003_v21 = vld [vmem:[#allocation4 + $0x70] sm:$0xff] }
 0x2ac   : > { %v7008_v52 = vld [vmem:[#allocation3 + $0xac] sm:$0xff]  ;;  %v7010_v50 = vld [vmem:[#allocation3 + $0xb4] sm:$0xff]  ;;  %v2546_v61 = vmax.f32 %v2514_v25, 0.0  ;;  %5131 = vmatmul.mubr.msk.f32.gmra.mxu0 %vm285_vm0, %v4000_v38 }
 0x2ad   : > { %3963 = vst.msk [vmem:[#allocation4 + $0xa0] sm:$0xff] %vm285_vm0, %v7008_v52  ;;  %3964 = vst.msk [vmem:[#allocation4 + $0xb8] sm:$0xff] %vm285_vm0, %v7010_v50  ;;  %3615 = vrot.lane.b32.xlu1 %v3546_v6, %s5308_s20  ;;  %v3295_v46 = vld [vmem:[#allocation3 + $0xb2] sm:$0xff]  ;;  %5133 = vmatprep.mubr.msk.f32.mxu0 %vm285_vm0, %v4003_v21 }
 0x2ae   : > { %2980 = vrot.lane.b32.xlu0 %v6864_v7, %s5308_s20  ;;  %v2659_v16 = vld [vmem:[#allocation3 + $0xb0] sm:$0xff]  ;;  %2624 = vst.msk [vmem:[#allocation3 + $0xc2] sm:$0xff] %vm285_vm0, %v2546_v61  ;;  %3327 = vst.msk [vmem:[#allocation4 + $0x110] sm:$0xff] %vm285_vm0, %v3295_v46 }
 0x2af   : > { %2691 = vst.msk [vmem:[#allocation4 + $0x168] sm:$0xff] %vm285_vm0, %v2659_v16  ;;  %v3548_v30 = vld [vmem:[#allocation3 + $0xb0] sm:$0xff] }
 0x2b0   : > { %v2137_v27 = vpop.f32.mrf.mxu0  ;;  %5134 = vmatmul.mubr.msk.f32.gmra.mxu0 %vm285_vm0, %v4006_v10 }
 0x2b1   : > { %v2363_v36 = vadd.f32 %v5091_v48, %v2137_v27  ;;  %3807 = vrot.lane.b32.xlu1 %v7025_v19, %s5309_s15  ;;  %v7077_v48 = vld [vmem:[#allocation3 + $0xb2] sm:$0xff] }
 0x2b2   : > { %3172 = vrot.lane.b32.xlu0 %v3545_v14, %s5309_s15  ;;  %v2139_v7 = vpop.f32.mrf.mxu0 }
 0x2b3   : > { %v2476_v29 = vmul.f32 %v6651_v28, %v2363_v36 }
 0x2b4   : > { %v4009_v39 = vld [vmem:[#allocation4 + $0xa0] sm:$0xff]  ;;  %v4012_v3 = vld [vmem:[#allocation4 + $0xb8] sm:$0xff] }
 0x2b5   : > { %v2515_v44 = vadd.f32 %v6660_v60, %v2476_v29  ;;  %3424 = vrot.lane.b32.xlu1 %v6919_v18, %s5307_s9  ;;  %v3296_v56 = vld [vmem:[#allocation3 + $0xc2] sm:$0xff]  ;;  %5136 = vmatprep.mubr.msk.f32.mxu0 %vm285_vm0, %v4009_v39 }
 0x2b6   : > { %2790 = vrot.lane.b32.xlu0 %v6901_v34, %s5307_s9  ;;  %3328 = vst.msk [vmem:[#allocation4 + $0x128] sm:$0xff] %vm285_vm0, %v3296_v56  ;;  %v2660_v54 = vld [vmem:[#allocation3 + $0xc0] sm:$0xff]  ;;  %5137 = vmatmul.mubr.msk.f32.gmra.mxu0 %vm285_vm0, %v4012_v3 }
 0x2b7   : > { %v2547_v13 = vmax.f32 %v2515_v44, 0.0  ;;  %2692 = vst.msk [vmem:[#allocation4 + $0x180] sm:$0xff] %vm285_vm0, %v2660_v54  ;;  %v3549_v38 = vld [vmem:[#allocation3 + $0xc0] sm:$0xff]  ;;  %v5100_v54 = vpop.f32.mrf.mxu1 }
 0x2b8   : > { %v7110_v16 = vld [vmem:[#allocation3 + $0xc2] sm:$0xff] }
 0x2b9   : > { %2625 = vst.msk [vmem:[#allocation3 + $0xca] sm:$0xff] %vm285_vm0, %v2547_v13  ;;  %3617 = vrot.lane.b32.xlu1 %v3547_v57, %s5308_s20  ;;  %v2142_v41 = vpop.f32.mrf.mxu0 }
 0x2ba   : > { %2982 = vrot.lane.b32.xlu0 %v6866_v12, %s5308_s20  ;;  %v2368_v34 = vadd.f32 %v2367_v45, %v2142_v41 }
 0x2bb   : > { %v2144_v62 = vpop.f32.mrf.mxu0 }
 0x2bc   : > { %v2477_v43 = vmul.f32 %v6651_v28, %v2368_v34  ;;  %v2387_v62 = vpop.f32.mrf.mxu1 }
 0x2bd   : > { %3809 = vrot.lane.b32.xlu1 %v7045_v4, %s5309_s15 }
 0x2be   : > { %3174 = vrot.lane.b32.xlu0 %v3546_v6, %s5309_s15  ;;  %v2516_v59 = vadd.f32 %v6660_v60, %v2477_v43 }
 0x2c0   : > { %v7051_v24 = vld [vmem:[#allocation3 + $0xc4] sm:$0xff]  ;;  %v7053_v55 = vld [vmem:[#allocation3 + $0xcc] sm:$0xff]  ;;  %v2548_v8 = vmax.f32 %v2516_v59, 0.0 }
 0x2c1   : > { %3965 = vst.msk [vmem:[#allocation4 + $0xd0] sm:$0xff] %vm285_vm0, %v7051_v24  ;;  %3966 = vst.msk [vmem:[#allocation4 + $0xe8] sm:$0xff] %vm285_vm0, %v7053_v55  ;;  %3426 = vrot.lane.b32.xlu1 %v6921_v35, %s5307_s9  ;;  %v3297_v28 = vld [vmem:[#allocation3 + $0xca] sm:$0xff] }
 0x2c2   : > { %2792 = vrot.lane.b32.xlu0 %v6940_v51, %s5307_s9  ;;  %v2661_v12 = vld [vmem:[#allocation3 + $0xc8] sm:$0xff]  ;;  %2626 = vst.msk [vmem:[#allocation3 + $0xda] sm:$0xff] %vm285_vm0, %v2548_v8  ;;  %3329 = vst.msk [vmem:[#allocation4 + $0x140] sm:$0xff] %vm285_vm0, %v3297_v28 }
 0x2c3   : > { %2693 = vst.msk [vmem:[#allocation4 + $0x198] sm:$0xff] %vm285_vm0, %v2661_v12  ;;  %v3157_v60 = vpop.permute.xlu0 %3156  ;;  %v7141_v34 = vld [vmem:[#allocation3 + $0xca] sm:$0xff] }
 0x2c4   : > { %3252 = vst.msk [vmem:[#allocation4] sm:$0xff] %vm1040_vm5, %v3157_v60  ;;  %v2147_v40 = vpop.f32.mrf.mxu0 }
 0x2c5   : > { %v2373_v5 = vadd.f32 %v5094_v33, %v2147_v40  ;;  %3619 = vrot.lane.b32.xlu1 %v3548_v30, %s5308_s20  ;;  %v3550_v33 = vld [vmem:[#allocation3 + $0xc8] sm:$0xff] }
 0x2c6   : > { %2984 = vrot.lane.b32.xlu0 %v6919_v18, %s5308_s20  ;;  %v2149_v51 = vpop.f32.mrf.mxu0  ;;  %v7082_v18 = vld [vmem:[%s7982_s3] ss:$0 sm:$0xff] }
 0x2c7   : > { %v2478_v23 = vmul.f32 %v7073_v26, %v2373_v5  ;;  %v2775_v14 = vpop.permute.xlu0 %2774 }
 0x2c8   : > { %2869 = vst.msk [vmem:[#allocation4 + $0x18] sm:$0xff] %vm654_vm3, %v2775_v14  ;;  %v4015_v9 = vld [vmem:[#allocation4 + $0xd0] sm:$0xff]  ;;  %v4018_v42 = vld [vmem:[#allocation4 + $0xe8] sm:$0xff] }
 0x2c9   : > { %v2517_v2 = vadd.f32 %v7082_v18, %v2478_v23  ;;  %3811 = vrot.lane.b32.xlu1 %v7077_v48, %s5309_s15  ;;  %v3298_v0 = vld [vmem:[#allocation3 + $0xda] sm:$0xff]  ;;  %5139 = vmatprep.mubr.msk.f32.mxu0 %vm285_vm0, %v4015_v9 }
 0x2ca   : > { %3176 = vrot.lane.b32.xlu0 %v3547_v57, %s5309_s15  ;;  %3330 = vst.msk [vmem:[#allocation4 + $0x158] sm:$0xff] %vm285_vm0, %v3298_v0  ;;  %v2662_v31 = vld [vmem:[#allocation3 + $0xd8] sm:$0xff]  ;;  %5140 = vmatmul.mubr.msk.f32.gmra.mxu0 %vm285_vm0, %v4018_v42 }
 0x2cb   : > { %v2549_v17 = vmax.f32 %v2517_v2, 0.0  ;;  %v3413_v22 = vpop.permute.xlu1 %3412  ;;  %v2967_v11 = vpop.permute.xlu0 %2966  ;;  %2694 = vst.msk [vmem:[#allocation4 + $0x1b0] sm:$0xff] %vm285_vm0, %v2662_v31  ;;  %v7160_v14 = vld [vmem:[#allocation3 + $0xd8] sm:$0xff] }
 0x2cc   : > { %3508 = vst.msk [vmem:[#allocation4 + $0x8] sm:$0xff] %vm654_vm3, %v3413_v22  ;;  %v7178_v0 = vld [vmem:[#allocation3 + $0xda] sm:$0xff] }
 0x2cd   : > { %3061 = vst.msk [vmem:[#allocation4 + $0x18] sm:$0xff] %vm847_vm4, %v2967_v11  ;;  %3428 = vrot.lane.b32.xlu1 %v6962_v37, %s5307_s9  ;;  %v2152_v58 = vpop.f32.mrf.mxu0 }
 0x2ce   : > { %2627 = vst.msk [vmem:[#allocation3 + $0xe2] sm:$0xff] %vm285_vm0, %v2549_v17  ;;  %2794 = vrot.lane.b32.xlu0 %v6967_v53, %s5307_s9  ;;  %v2378_v15 = vadd.f32 %v2377_v32, %v2152_v58 }
 0x2cf   : > { %v2154_v49 = vpop.f32.mrf.mxu0  ;;  %v3159_v20 = vpop.permute.xlu0 %3158 }
 0x2d0   : > { %v2479_v25 = vmul.f32 %v7073_v26, %v2378_v15  ;;  %3253 = vst.msk [vmem:[#allocation4 + $0x18] sm:$0xff] %vm1040_vm5, %v3159_v20  ;;  %v7186_v49 = vpop.f32.mrf.mxu1 }
 0x2d1   : > { %3621 = vrot.lane.b32.xlu1 %v3549_v38, %s5308_s20 }
 0x2d2   : > { %2986 = vrot.lane.b32.xlu0 %v6921_v35, %s5308_s20  ;;  %v2518_v61 = vadd.f32 %v7082_v18, %v2479_v25  ;;  %v3989_v25 = vld [vmem:[#allocation4] sm:$0xff] }
 0x2d3   : > { %v2777_v6 = vpop.permute.xlu0 %2776 }
 0x2d4   : > { %v2550_v53 = vmax.f32 %v2518_v61, 0.0  ;;  %2870 = vst.msk [vmem:[#allocation4 + $0x30] sm:$0xff] %vm654_vm3, %v2777_v6 }
 0x2d5   : > { %v7105_v21 = vld [vmem:[#allocation3 + $0xdc] sm:$0xff]  ;;  %v7107_v46 = vld [vmem:[#allocation3 + $0xe4] sm:$0xff]  ;;  %3813 = vrot.lane.b32.xlu1 %v7110_v16, %s5309_s15 }
 0x2d6   : > { %3967 = vst.msk [vmem:[#allocation4 + $0x100] sm:$0xff] %vm285_vm0, %v7105_v21  ;;  %3968 = vst.msk [vmem:[#allocation4 + $0x118] sm:$0xff] %vm285_vm0, %v7107_v46  ;;  %3178 = vrot.lane.b32.xlu0 %v3548_v30, %s5309_s15  ;;  %v3299_v35 = vld [vmem:[#allocation3 + $0xe2] sm:$0xff] }
 0x2d7   : > { %v2663_v10 = vld [vmem:[#allocation3 + $0xe0] sm:$0xff]  ;;  %2628 = vst.msk [vmem:[#allocation3 + $0xf2] sm:$0xff] %vm285_vm0, %v2550_v53  ;;  %3331 = vst.msk [vmem:[#allocation4 + $0x170] sm:$0xff] %vm285_vm0, %v3299_v35  ;;  %v2969_v27 = vpop.permute.xlu0 %2968 }
 0x2d8   : > { %2695 = vst.msk [vmem:[#allocation4 + $0x1c8] sm:$0xff] %vm285_vm0, %v2663_v10  ;;  %v2157_v36 = vpop.f32.mrf.mxu0  ;;  %v7205_v10 = vld [vmem:[#allocation3 + $0xe0] sm:$0xff] }
 0x2d9   : > { %3062 = vst.msk [vmem:[#allocation4 + $0x30] sm:$0xff] %vm847_vm4, %v2969_v27  ;;  %v2383_v7 = vadd.f32 %v5097_v1, %v2157_v36  ;;  %3430 = vrot.lane.b32.xlu1 %v6964_v47, %s5307_s9  ;;  %v5231_v27 = vld [vmem:[%s7983_s4 + $0x110] sm:$0xff]  ;;  %v2397_v36 = vpop.f32.mrf.mxu1 }
 0x2da   : > { %2796 = vrot.lane.b32.xlu0 %v6992_v63, %s5307_s9  ;;  %v2159_v29 = vpop.f32.mrf.mxu0 }
 0x2db   : > { %v2480_v39 = vmul.f32 %v7073_v26, %v2383_v7  ;;  %v3161_v3 = vpop.permute.xlu0 %3160 }
 0x2dc   : > { %3254 = vst.msk [vmem:[#allocation4 + $0x30] sm:$0xff] %vm1040_vm5, %v3161_v3 }
 0x2dd   : > { %v4021_v44 = vld [vmem:[#allocation4 + $0x100] sm:$0xff]  ;;  %v4024_v56 = vld [vmem:[#allocation4 + $0x118] sm:$0xff]  ;;  %v2519_v13 = vadd.f32 %v7082_v18, %v2480_v39  ;;  %3623 = vrot.lane.b32.xlu1 %v3550_v33, %s5308_s20 }
 0x2de   : > { %2988 = vrot.lane.b32.xlu0 %v6962_v37, %s5308_s20  ;;  %v7133_v57 = vld [vmem:[#allocation3 + $0xf2] sm:$0xff]  ;;  %5142 = vmatprep.mubr.msk.f32.mxu0 %vm285_vm0, %v4021_v44 }
 0x2df   : > { %v2664_v63 = vld [vmem:[#allocation3 + $0xf0] sm:$0xff]  ;;  %3332 = vst.msk [vmem:[#allocation4 + $0x188] sm:$0xff] %vm285_vm0, %v7133_v57  ;;  %v2551_v45 = vmax.f32 %v2519_v13, 0.0  ;;  %5143 = vmatmul.mubr.msk.f32.gmra.mxu0 %vm285_vm0, %v4024_v56  ;;  %v2779_v41 = vpop.permute.xlu0 %2778  ;;  %v5233_v13 = vld [vmem:[%s7983_s4 + $0x100] sm:$0xff] }
 0x2e0   : > { %2696 = vst.msk [vmem:[#allocation4 + $0x1e0] sm:$0xff] %vm285_vm0, %v2664_v63 }
 0x2e1   : > { %2871 = vst.msk [vmem:[#allocation4 + $0x48] sm:$0xff] %vm654_vm3, %v2779_v41  ;;  %3815 = vrot.lane.b32.xlu1 %v7141_v34, %s5309_s15  ;;  %v2162_v37 = vpop.f32.mrf.mxu0 }
 0x2e2   : > { %2629 = vst.msk [vmem:[#allocation3 + $0xfa] sm:$0xff] %vm285_vm0, %v2551_v45  ;;  %3180 = vrot.lane.b32.xlu0 %v3549_v38, %s5309_s15  ;;  %v2388_v43 = vadd.f32 %v2387_v62, %v2162_v37 }
 0x2e3   : > { %v3606_v59 = vpop.permute.xlu1 %3605  ;;  %v2164_v8 = vpop.f32.mrf.mxu0 }
 0x2e4   : > { %v2481_v28 = vmul.f32 %v7073_v26, %v2388_v43  ;;  %3701 = vst.msk [vmem:[#allocation4 + $0x8] sm:$0xff] %vm847_vm4, %v3606_v59  ;;  %v2971_v12 = vpop.permute.xlu0 %2970  ;;  %v3992_v59 = vld [vmem:[#allocation4 + $0x18] sm:$0xff] }
 0x2e5   : > { %3063 = vst.msk [vmem:[#allocation4 + $0x48] sm:$0xff] %vm847_vm4, %v2971_v12  ;;  %3432 = vrot.lane.b32.xlu1 %v7008_v52, %s5307_s9 }
 0x2e6   : > { %2798 = vrot.lane.b32.xlu0 %v7025_v19, %s5307_s9  ;;  %v2520_v60 = vadd.f32 %v7082_v18, %v2481_v28 }
 0x2e7   : > { %v3798_v40 = vpop.permute.xlu1 %3797 }
 0x2e8   : > { %v2552_v51 = vmax.f32 %v2520_v60, 0.0  ;;  %3893 = vst.msk [vmem:[#allocation4 + $0x8] sm:$0xff] %vm1040_vm5, %v3798_v40  ;;  %v3163_v23 = vpop.permute.xlu0 %3162 }
 0x2e9   : > { %v7155_v30 = vld [vmem:[#allocation3 + $0xf4] sm:$0xff]  ;;  %v7157_v5 = vld [vmem:[#allocation3 + $0xfc] sm:$0xff]  ;;  %3255 = vst.msk [vmem:[#allocation4 + $0x48] sm:$0xff] %vm1040_vm5, %v3163_v23  ;;  %3625 = vrot.lane.b32.xlu1 %v7160_v14, %s5308_s20 }
 0x2ea   : > { %3969 = vst.msk [vmem:[#allocation4 + $0x130] sm:$0xff] %vm285_vm0, %v7155_v30  ;;  %3970 = vst.msk [vmem:[#allocation4 + $0x148] sm:$0xff] %vm285_vm0, %v7157_v5  ;;  %2990 = vrot.lane.b32.xlu0 %v6964_v47, %s5308_s20  ;;  %v7171_v19 = vld [vmem:[#allocation3 + $0xfa] sm:$0xff] }
 0x2eb   : > { %v2665_v9 = vld [vmem:[#allocation3 + $0xf8] sm:$0xff]  ;;  %2630 = vst.msk [vmem:[#allocation3 + $0x10a] sm:$0xff] %vm285_vm0, %v2552_v51  ;;  %3333 = vst.msk [vmem:[#allocation4 + $0x1a0] sm:$0xff] %vm285_vm0, %v7171_v19  ;;  %v3415_v42 = vpop.permute.xlu1 %3414  ;;  %v3553_v51 = vld [vmem:[#allocation3 + $0xf0] sm:$0xff] }
 0x2ec   : > { %2697 = vst.msk [vmem:[#allocation4 + $0x1f8] sm:$0xff] %vm285_vm0, %v2665_v9  ;;  %v2781_v1 = vpop.permute.xlu0 %2780  ;;  %v2167_v2 = vpop.f32.mrf.mxu0 }
 0x2ed   : > { %3509 = vst.msk [vmem:[#allocation4 + $0x20] sm:$0xff] %vm654_vm3, %v3415_v42  ;;  %2872 = vst.msk [vmem:[#allocation4 + $0x60] sm:$0xff] %vm654_vm3, %v2781_v1  ;;  %v2393_v47 = vadd.f32 %v5100_v54, %v2167_v2  ;;  %3817 = vrot.lane.b32.xlu1 %v7178_v0, %s5309_s15  ;;  %v7221_v54 = vld [vmem:[#allocation3 + $0xe2] sm:$0xff] }
 0x2ee   : > { %3182 = vrot.lane.b32.xlu0 %v3550_v33, %s5309_s15  ;;  %v2169_v31 = vpop.f32.mrf.mxu0  ;;  %v5232_v33 = vld [vmem:[%s7983_s4 + $0x108] sm:$0xff] }
 0x2ef   : > { %v2482_v17 = vmul.f32 %v7073_v26, %v2393_v47  ;;  %v3608_v22 = vpop.permute.xlu1 %3607  ;;  %v3990_v11 = vld [vmem:[#allocation4 + $0x8] sm:$0xff]  ;;  %v5106_v47 = vpop.f32.mrf.mxu1 }
 0x2f0   : > { %3702 = vst.msk [vmem:[#allocation4 + $0x20] sm:$0xff] %vm847_vm4, %v3608_v22  ;;  %v2973_v32 = vpop.permute.xlu0 %2972  ;;  %4281 = vmatprep.mubr.f32.mxu1 %v3990_v11 }
 0x2f1   : > { %v4027_v58 = vld [vmem:[#allocation4 + $0x130] sm:$0xff]  ;;  %v4030_v15 = vld [vmem:[#allocation4 + $0x148] sm:$0xff]  ;;  %v2521_v20 = vadd.f32 %v7082_v18, %v2482_v17  ;;  %3064 = vst.msk [vmem:[#allocation4 + $0x60] sm:$0xff] %vm847_vm4, %v2973_v32  ;;  %3434 = vrot.lane.b32.xlu1 %v7010_v50, %s5307_s9  ;;  %4282 = vmatmul.mubr.f32.vlgmr.msra.gmra.mxu1 %v3989_v25 }
 0x2f2   : > { %2800 = vrot.lane.b32.xlu0 %v7045_v4, %s5307_s9  ;;  %v7194_v38 = vld [vmem:[#allocation3 + $0x10a] sm:$0xff]  ;;  %5145 = vmatprep.mubr.msk.f32.mxu0 %vm285_vm0, %v4027_v58  ;;  %v5230_v4 = vld [vmem:[%s7983_s4 + $0x118] sm:$0xff] }
 0x2f3   : > { %v2666_v61 = vld [vmem:[#allocation3 + $0x108] sm:$0xff]  ;;  %3334 = vst.msk [vmem:[#allocation4 + $0x1b8] sm:$0xff] %vm285_vm0, %v7194_v38  ;;  %v2553_v6 = vmax.f32 %v2521_v20, 0.0  ;;  %5146 = vmatmul.mubr.msk.f32.gmra.mxu0 %vm285_vm0, %v4030_v15  ;;  %v3800_v53 = vpop.permute.xlu1 %3799  ;;  %5179 = vmatpush3.msra.mxu1 %v5230_v4  ;;  %v2407_v15 = vpop.f32.mrf.mxu1  ;;  %v3995_v20 = vld [vmem:[#allocation4 + $0x30] sm:$0xff] }
 0x2f4   : > { %2698 = vst.msk [vmem:[#allocation4 + $0x210] sm:$0xff] %vm285_vm0, %v2666_v61  ;;  %v3165_v35 = vpop.permute.xlu0 %3164  ;;  %5176 = vmatprep.subr.mxu1 %v5231_v27 }
 0x2f5   : > { %3894 = vst.msk [vmem:[#allocation4 + $0x20] sm:$0xff] %vm1040_vm5, %v3800_v53  ;;  %3256 = vst.msk [vmem:[#allocation4 + $0x60] sm:$0xff] %vm1040_vm5, %v3165_v35  ;;  %3627 = vrot.lane.b32.xlu1 %v7205_v10, %s5308_s20  ;;  %v2172_v7 = vpop.f32.mrf.mxu0  ;;  %5180 = vmatpush3.msra.mxu1 %v5231_v27  ;;  %v3554_v35 = vld [vmem:[#allocation3 + $0xf8] sm:$0xff] }
 0x2f6   : > { %2631 = vst.msk [vmem:[#allocation3 + $0x112] sm:$0xff] %vm285_vm0, %v2553_v6  ;;  %2992 = vrot.lane.b32.xlu0 %v7008_v52, %s5308_s20  ;;  %v2398_v29 = vadd.f32 %v2397_v36, %v2172_v7  ;;  %5177 = vmatprep.subr.mxu1 %v5232_v33 }
 0x2f7   : > { %v3417_v39 = vpop.permute.xlu1 %3416  ;;  %v2174_v3 = vpop.f32.mrf.mxu0  ;;  %5181 = vmatpush3.msra.mxu1 %v5232_v33 }
 0x2f8   : > { %v2483_v44 = vmul.f32 %v7073_v26, %v2398_v29  ;;  %3510 = vst.msk [vmem:[#allocation4 + $0x38] sm:$0xff] %vm654_vm3, %v3417_v39  ;;  %v2783_v56 = vpop.permute.xlu0 %2782  ;;  %5178 = vmatprep.subr.mxu1 %v5233_v13 }
 0x2f9   : > { %2873 = vst.msk [vmem:[#allocation4 + $0x78] sm:$0xff] %vm654_vm3, %v2783_v56  ;;  %3819 = vrot.lane.b32.xlu1 %v7221_v54, %s5309_s15  ;;  %5182 = vmatpush3.msra.mxu1 %v5233_v13  ;;  %v3998_v13 = vld [vmem:[#allocation4 + $0x48] sm:$0xff] }
 0x2fa   : > { %3184 = vrot.lane.b32.xlu0 %v7160_v14, %s5309_s15  ;;  %v2522_v52 = vadd.f32 %v7082_v18, %v2483_v44 }
 0x2fb   : > { %v3610_v63 = vpop.permute.xlu1 %3609 }
 0x2fc   : > { %v3993_v45 = vld [vmem:[#allocation4 + $0x20] sm:$0xff]  ;;  %v2554_v37 = vmax.f32 %v2522_v52, 0.0  ;;  %3703 = vst.msk [vmem:[#allocation4 + $0x38] sm:$0xff] %vm847_vm4, %v3610_v63  ;;  %v2975_v43 = vpop.permute.xlu0 %2974 }
 0x2fd   : > { %v7232_v41 = vld [vmem:[#allocation3 + $0x10c] sm:$0xff]  ;;  %v7234_v62 = vld [vmem:[#allocation3 + $0x114] sm:$0xff]  ;;  %4286 = vmatprep.mubr.f32.mxu1 %v3993_v45  ;;  %3065 = vst.msk [vmem:[#allocation4 + $0x78] sm:$0xff] %vm847_vm4, %v2975_v43  ;;  %3436 = vrot.lane.b32.xlu1 %v7051_v24, %s5307_s9 }
 0x2fe   : > { %3971 = vst.msk [vmem:[#allocation4 + $0x160] sm:$0xff] %vm285_vm0, %v7232_v41  ;;  %3972 = vst.msk [vmem:[#allocation4 + $0x178] sm:$0xff] %vm285_vm0, %v7234_v62  ;;  %2802 = vrot.lane.b32.xlu0 %v7077_v48, %s5307_s9  ;;  %v7246_v8 = vld [vmem:[#allocation3 + $0x112] sm:$0xff]  ;;  %4287 = vmatmul.mubr.f32.gmra.mxu1 %v3992_v59  ;;  %v3555_v59 = vld [vmem:[#allocation3 + $0x108] sm:$0xff] }
 0x2ff   : > { %v2667_v28 = vld [vmem:[#allocation3 + $0x110] sm:$0xff]  ;;  %2632 = vst.msk [vmem:[#allocation3 + $0x122] sm:$0xff] %vm285_vm0, %v2554_v37  ;;  %3335 = vst.msk [vmem:[#allocation4 + $0x1d0] sm:$0xff] %vm285_vm0, %v7246_v8  ;;  %v3802_v12 = vpop.permute.xlu1 %3801 }
 0x300   : > { %2699 = vst.msk [vmem:[#allocation4 + $0x228] sm:$0xff] %vm285_vm0, %v2667_v28  ;;  %v3167_v60 = vpop.permute.xlu0 %3166  ;;  %v2177_v40 = vpop.f32.mrf.mxu0 }
 0x301   : > { %3895 = vst.msk [vmem:[#allocation4 + $0x38] sm:$0xff] %vm1040_vm5, %v3802_v12  ;;  %3257 = vst.msk [vmem:[#allocation4 + $0x78] sm:$0xff] %vm1040_vm5, %v3167_v60  ;;  %v2403_v48 = vadd.f32 %v7186_v49, %v2177_v40  ;;  %3629 = vrot.lane.b32.xlu1 %v3553_v51, %s5308_s20  ;;  %v5109_v60 = vpop.f32.mrf.mxu1 }
 0x302   : > { %2994 = vrot.lane.b32.xlu0 %v7010_v50, %s5308_s20  ;;  %v2179_v23 = vpop.f32.mrf.mxu0 }
 0x303   : > { %v2484_v14 = vmul.f32 %v7073_v26, %v2403_v48  ;;  %v3419_v9 = vpop.permute.xlu1 %3418 }
 0x304   : > { %3511 = vst.msk [vmem:[#allocation4 + $0x50] sm:$0xff] %vm654_vm3, %v3419_v9  ;;  %v2785_v42 = vpop.permute.xlu0 %2784  ;;  %v2417_v9 = vpop.f32.mrf.mxu1 }
 0x305   : > { %v4033_v1 = vld [vmem:[#allocation4 + $0x160] sm:$0xff]  ;;  %v4036_v2 = vld [vmem:[#allocation4 + $0x178] sm:$0xff]  ;;  %v2523_v31 = vadd.f32 %v7082_v18, %v2484_v14  ;;  %2874 = vst.msk [vmem:[#allocation4 + $0x90] sm:$0xff] %vm654_vm3, %v2785_v42  ;;  %3821 = vrot.lane.b32.xlu1 %v7133_v57, %s5309_s15 }
 0x306   : > { %3186 = vrot.lane.b32.xlu0 %v7205_v10, %s5309_s15  ;;  %v7266_v50 = vld [vmem:[#allocation3 + $0x122] sm:$0xff]  ;;  %5148 = vmatprep.mubr.msk.f32.mxu0 %vm285_vm0, %v4033_v1 }
 0x307   : > { %v2668_v17 = vld [vmem:[#allocation3 + $0x120] sm:$0xff]  ;;  %3336 = vst.msk [vmem:[#allocation4 + $0x1e8] sm:$0xff] %vm285_vm0, %v7266_v50  ;;  %v2555_v22 = vmax.f32 %v2523_v31, 0.0  ;;  %5149 = vmatmul.mubr.msk.f32.gmra.mxu0 %vm285_vm0, %v4036_v2  ;;  %v3612_v11 = vpop.permute.xlu1 %3611 }
 0x308   : > { %2700 = vst.msk [vmem:[#allocation4 + $0x240] sm:$0xff] %vm285_vm0, %v2668_v17  ;;  %v3996_v32 = vld [vmem:[#allocation4 + $0x38] sm:$0xff]  ;;  %v2977_v58 = vpop.permute.xlu0 %2976 }
 0x309   : > { %3704 = vst.msk [vmem:[#allocation4 + $0x50] sm:$0xff] %vm847_vm4, %v3612_v11  ;;  %4291 = vmatprep.mubr.f32.mxu1 %v3996_v32  ;;  %3066 = vst.msk [vmem:[#allocation4 + $0x90] sm:$0xff] %vm847_vm4, %v2977_v58  ;;  %3438 = vrot.lane.b32.xlu1 %v7053_v55, %s5307_s9  ;;  %v2182_v49 = vpop.f32.mrf.mxu0  ;;  %v3556_v58 = vld [vmem:[#allocation3 + $0x110] sm:$0xff] }
 0x30a   : > { %2633 = vst.msk [vmem:[#allocation3 + $0x12a] sm:$0xff] %vm285_vm0, %v2555_v22  ;;  %2804 = vrot.lane.b32.xlu0 %v7110_v16, %s5307_s9  ;;  %v2408_v25 = vadd.f32 %v2407_v15, %v2182_v49  ;;  %4292 = vmatmul.mubr.f32.gmra.mxu1 %v3995_v20  ;;  %v4001_v22 = vld [vmem:[#allocation4 + $0x60] sm:$0xff] }
 0x30b   : > { %v3804_v61 = vpop.permute.xlu1 %3803  ;;  %v2184_v6 = vpop.f32.mrf.mxu0 }
 0x30c   : > { %v2485_v53 = vmul.f32 %v7073_v26, %v2408_v25  ;;  %3896 = vst.msk [vmem:[#allocation4 + $0x50] sm:$0xff] %vm1040_vm5, %v3804_v61  ;;  %v3169_v4 = vpop.permute.xlu0 %3168 }
 0x30d   : > { %3258 = vst.msk [vmem:[#allocation4 + $0x90] sm:$0xff] %vm1040_vm5, %v3169_v4  ;;  %3631 = vrot.lane.b32.xlu1 %v3554_v35, %s5308_s20 }
 0x30e   : > { %2996 = vrot.lane.b32.xlu0 %v7051_v24, %s5308_s20  ;;  %v2524_v16 = vadd.f32 %v7082_v18, %v2485_v53 }
 0x30f   : > { %v3421_v10 = vpop.permute.xlu1 %3420 }
 0x310   : > { %v2556_v7 = vmax.f32 %v2524_v16, 0.0  ;;  %3512 = vst.msk [vmem:[#allocation4 + $0x68] sm:$0xff] %vm654_vm3, %v3421_v10  ;;  %v2787_v29 = vpop.permute.xlu0 %2786 }
 0x311   : > { %v7287_v27 = vld [vmem:[#allocation3 + $0x124] sm:$0xff]  ;;  %v7289_v36 = vld [vmem:[#allocation3 + $0x12c] sm:$0xff]  ;;  %2875 = vst.msk [vmem:[#allocation4 + $0xa8] sm:$0xff] %vm654_vm3, %v2787_v29  ;;  %3823 = vrot.lane.b32.xlu1 %v7171_v19, %s5309_s15 }
 0x312   : > { %3973 = vst.msk [vmem:[#allocation4 + $0x190] sm:$0xff] %vm285_vm0, %v7287_v27  ;;  %3974 = vst.msk [vmem:[#allocation4 + $0x1a8] sm:$0xff] %vm285_vm0, %v7289_v36  ;;  %3188 = vrot.lane.b32.xlu0 %v3553_v51, %s5309_s15  ;;  %v7300_v24 = vld [vmem:[#allocation3 + $0x12a] sm:$0xff] }
 0x313   : > { %v2669_v39 = vld [vmem:[#allocation3 + $0x128] sm:$0xff]  ;;  %2634 = vst.msk [vmem:[#allocation3 + $0x13a] sm:$0xff] %vm285_vm0, %v2556_v7  ;;  %3337 = vst.msk [vmem:[#allocation4 + $0x200] sm:$0xff] %vm285_vm0, %v7300_v24  ;;  %v3614_v3 = vpop.permute.xlu1 %3613  ;;  %v3999_v33 = vld [vmem:[#allocation4 + $0x50] sm:$0xff] }
 0x314   : > { %2701 = vst.msk [vmem:[#allocation4 + $0x258] sm:$0xff] %vm285_vm0, %v2669_v39  ;;  %v2979_v44 = vpop.permute.xlu0 %2978  ;;  %v2187_v56 = vpop.f32.mrf.mxu0  ;;  %4296 = vmatprep.mubr.f32.mxu1 %v3999_v33  ;;  %v4004_v39 = vld [vmem:[#allocation4 + $0x78] sm:$0xff] }
 0x315   : > { %3705 = vst.msk [vmem:[#allocation4 + $0x68] sm:$0xff] %vm847_vm4, %v3614_v3  ;;  %3067 = vst.msk [vmem:[#allocation4 + $0xa8] sm:$0xff] %vm847_vm4, %v2979_v44  ;;  %v2413_v52 = vadd.f32 %v5106_v47, %v2187_v56  ;;  %3440 = vrot.lane.b32.xlu1 %v7105_v21, %s5307_s9  ;;  %4297 = vmatmul.mubr.f32.gmra.mxu1 %v3998_v13  ;;  %v5112_v56 = vpop.f32.mrf.mxu1 }
 0x316   : > { %2806 = vrot.lane.b32.xlu0 %v7141_v34, %s5307_s9  ;;  %v2189_v63 = vpop.f32.mrf.mxu0 }
 0x317   : > { %v2486_v45 = vmul.f32 %v7073_v26, %v2413_v52  ;;  %v3806_v37 = vpop.permute.xlu1 %3805 }
 0x318   : > { %3897 = vst.msk [vmem:[#allocation4 + $0x68] sm:$0xff] %vm1040_vm5, %v3806_v37  ;;  %v3171_v43 = vpop.permute.xlu0 %3170  ;;  %v2427_v37 = vpop.f32.mrf.mxu1 }
 0x319   : > { %v4039_v28 = vld [vmem:[#allocation4 + $0x190] sm:$0xff]  ;;  %v4042_v12 = vld [vmem:[#allocation4 + $0x1a8] sm:$0xff]  ;;  %v2525_v40 = vadd.f32 %v7082_v18, %v2486_v45  ;;  %3259 = vst.msk [vmem:[#allocation4 + $0xa8] sm:$0xff] %vm1040_vm5, %v3171_v43  ;;  %3633 = vrot.lane.b32.xlu1 %v3555_v59, %s5308_s20  ;;  %v3557_v45 = vld [vmem:[#allocation3 + $0x120] sm:$0xff] }
 0x31a   : > { %5151 = vmatprep.mubr.msk.f32.mxu0 %vm285_vm0, %v4039_v28  ;;  %v7318_v34 = vld [vmem:[#allocation3 + $0x138] sm:$0xff]  ;;  %2998 = vrot.lane.b32.xlu0 %v7053_v55, %s5308_s20 }
 0x31b   : > { %v7320_v51 = vld [vmem:[#allocation3 + $0x13a] sm:$0xff]  ;;  %5152 = vmatmul.mubr.msk.f32.gmra.mxu0 %vm285_vm0, %v4042_v12  ;;  %2702 = vst.msk [vmem:[#allocation4 + $0x270] sm:$0xff] %vm285_vm0, %v7318_v34  ;;  %v2557_v48 = vmax.f32 %v2525_v40, 0.0  ;;  %v3423_v23 = vpop.permute.xlu1 %3422 }
 0x31c   : > { %3338 = vst.msk [vmem:[#allocation4 + $0x218] sm:$0xff] %vm285_vm0, %v7320_v51  ;;  %v2789_v14 = vpop.permute.xlu0 %2788 }
 0x31d   : > { %3513 = vst.msk [vmem:[#allocation4 + $0x80] sm:$0xff] %vm654_vm3, %v3423_v23  ;;  %2876 = vst.msk [vmem:[#allocation4 + $0xc0] sm:$0xff] %vm654_vm3, %v2789_v14  ;;  %3825 = vrot.lane.b32.xlu1 %v7194_v38, %s5309_s15  ;;  %v2192_v55 = vpop.f32.mrf.mxu0 }
 0x31e   : > { %2635 = vst.msk [vmem:[#allocation3 + $0x142] sm:$0xff] %vm285_vm0, %v2557_v48  ;;  %v2418_v42 = vadd.f32 %v2417_v9, %v2192_v55  ;;  %3190 = vrot.lane.b32.xlu0 %v3554_v35, %s5309_s15  ;;  %v4007_v9 = vld [vmem:[#allocation4 + $0x90] sm:$0xff] }
 0x31f   : > { %v3616_v1 = vpop.permute.xlu1 %3615  ;;  %v2194_v2 = vpop.f32.mrf.mxu0  ;;  %v4002_v47 = vld [vmem:[#allocation4 + $0x68] sm:$0xff] }
 0x320   : > { %v2487_v31 = vmul.f32 %v7073_v26, %v2418_v42  ;;  %3706 = vst.msk [vmem:[#allocation4 + $0x80] sm:$0xff] %vm847_vm4, %v3616_v1  ;;  %v2981_v17 = vpop.permute.xlu0 %2980  ;;  %4301 = vmatprep.mubr.f32.mxu1 %v4002_v47 }
 0x321   : > { %3068 = vst.msk [vmem:[#allocation4 + $0xc0] sm:$0xff] %vm847_vm4, %v2981_v17  ;;  %3442 = vrot.lane.b32.xlu1 %v7107_v46, %s5307_s9  ;;  %4302 = vmatmul.mubr.f32.gmra.mxu1 %v4001_v22  ;;  %v3558_v22 = vld [vmem:[#allocation3 + $0x128] sm:$0xff] }
 0x322   : > { %v2526_v11 = vadd.f32 %v7082_v18, %v2487_v31  ;;  %2808 = vrot.lane.b32.xlu0 %v7178_v0, %s5307_s9 }
 0x323   : > { %v3808_v32 = vpop.permute.xlu1 %3807 }
 0x324   : > { %v2558_v49 = vmax.f32 %v2526_v11, 0.0  ;;  %3898 = vst.msk [vmem:[#allocation4 + $0x80] sm:$0xff] %vm1040_vm5, %v3808_v32  ;;  %v3173_v20 = vpop.permute.xlu0 %3172 }
 0x325   : > { %v7343_v15 = vld [vmem:[#allocation3 + $0x13c] sm:$0xff]  ;;  %3260 = vst.msk [vmem:[#allocation4 + $0xc0] sm:$0xff] %vm1040_vm5, %v3173_v20  ;;  %3635 = vrot.lane.b32.xlu1 %v3556_v58, %s5308_s20  ;;  %v3944_v0 = vld [vmem:[#allocation3 + $0x144] sm:$0xff]  ;;  %v5115_v20 = vpop.f32.mrf.mxu1 }
 0x326   : > { %v7346_v25 = vld [vmem:[#allocation3 + $0x140] sm:$0xff]  ;;  %3975 = vst.msk [vmem:[#allocation4 + $0x1c0] sm:$0xff] %vm285_vm0, %v7343_v15  ;;  %2636 = vst.msk [vmem:[#allocation3 + $0x152] sm:$0xff] %vm285_vm0, %v2558_v49  ;;  %3000 = vrot.lane.b32.xlu0 %v7105_v21, %s5308_s20 }
 0x327   : > { %v7348_v61 = vld [vmem:[#allocation3 + $0x142] sm:$0xff]  ;;  %2703 = vst.msk [vmem:[#allocation4 + $0x288] sm:$0xff] %vm285_vm0, %v7346_v25  ;;  %3976 = vst.msk [vmem:[#allocation4 + $0x1d8] sm:$0xff] %vm285_vm0, %v3944_v0  ;;  %v3425_v6 = vpop.permute.xlu1 %3424 }
 0x328   : > { %3339 = vst.msk [vmem:[#allocation4 + $0x230] sm:$0xff] %vm285_vm0, %v7348_v61  ;;  %v2791_v53 = vpop.permute.xlu0 %2790  ;;  %v2197_v4 = vpop.f32.mrf.mxu0 }
 0x329   : > { %3514 = vst.msk [vmem:[#allocation4 + $0x98] sm:$0xff] %vm654_vm3, %v3425_v6  ;;  %2877 = vst.msk [vmem:[#allocation4 + $0xd8] sm:$0xff] %vm654_vm3, %v2791_v53  ;;  %v2423_v35 = vadd.f32 %v5109_v60, %v2197_v4  ;;  %3827 = vrot.lane.b32.xlu1 %v7246_v8, %s5309_s15 }
 0x32a   : > { %3192 = vrot.lane.b32.xlu0 %v3555_v59, %s5309_s15  ;;  %v2199_v16 = vpop.f32.mrf.mxu0 }
 0x32b   : > { %v2488_v10 = vmul.f32 %v7073_v26, %v2423_v35  ;;  %v3618_v7 = vpop.permute.xlu1 %3617  ;;  %v4005_v21 = vld [vmem:[#allocation4 + $0x80] sm:$0xff] }
 0x32c   : > { %3707 = vst.msk [vmem:[#allocation4 + $0x98] sm:$0xff] %vm847_vm4, %v3618_v7  ;;  %v2983_v29 = vpop.permute.xlu0 %2982  ;;  %4306 = vmatprep.mubr.f32.mxu1 %v4005_v21  ;;  %v4010_v7 = vld [vmem:[#allocation4 + $0xa8] sm:$0xff] }
 0x32d   : > { %v2527_v3 = vadd.f32 %v7082_v18, %v2488_v10  ;;  %3069 = vst.msk [vmem:[#allocation4 + $0xd8] sm:$0xff] %vm847_vm4, %v2983_v29  ;;  %3444 = vrot.lane.b32.xlu1 %v7155_v30, %s5307_s9  ;;  %4307 = vmatmul.mubr.f32.gmra.mxu1 %v4004_v39  ;;  %v7373_v33 = vld [vmem:[#allocation3 + $0x150] sm:$0xff]  ;;  %v2437_v10 = vpop.f32.mrf.mxu1 }
 0x32e   : > { %v7375_v44 = vld [vmem:[#allocation3 + $0x152] sm:$0xff]  ;;  %2810 = vrot.lane.b32.xlu0 %v7221_v54, %s5307_s9  ;;  %2704 = vst.msk [vmem:[#allocation4 + $0x2a0] sm:$0xff] %vm285_vm0, %v7373_v33 }
 0x32f   : > { %3340 = vst.msk [vmem:[#allocation4 + $0x248] sm:$0xff] %vm285_vm0, %v7375_v44  ;;  %v2559_v52 = vmax.f32 %v2527_v3, 0.0  ;;  %v3810_v13 = vpop.permute.xlu1 %3809 }
 0x330   : > { %3899 = vst.msk [vmem:[#allocation4 + $0x98] sm:$0xff] %vm1040_vm5, %v3810_v13  ;;  %v3175_v63 = vpop.permute.xlu0 %3174 }
 0x331   : > { %2637 = vst.msk [vmem:[#allocation3 + $0x15a] sm:$0xff] %vm285_vm0, %v2559_v52  ;;  %3637 = vrot.lane.b32.xlu1 %v3557_v45, %s5308_s20 }
 0x332   : > { %3261 = vst.msk [vmem:[#allocation4 + $0xd8] sm:$0xff] %vm1040_vm5, %v3175_v63  ;;  %v2202_v54 = vpop.f32.mrf.mxu0  ;;  %3002 = vrot.lane.b32.xlu0 %v7107_v46, %s5308_s20 }
 0x333   : > { %v2428_v43 = vadd.f32 %v2427_v37, %v2202_v54  ;;  %v3427_v59 = vpop.permute.xlu1 %3426 }
 0x334   : > { %3515 = vst.msk [vmem:[#allocation4 + $0xb0] sm:$0xff] %vm654_vm3, %v3427_v59  ;;  %v2204_v28 = vpop.f32.mrf.mxu0  ;;  %v2793_v12 = vpop.permute.xlu0 %2792 }
 0x335   : > { %v2489_v60 = vmul.f32 %v7073_v26, %v2428_v43  ;;  %2878 = vst.msk [vmem:[#allocation4 + $0xf0] sm:$0xff] %vm654_vm3, %v2793_v12  ;;  %3829 = vrot.lane.b32.xlu1 %v7266_v50, %s5309_s15 }
 0x336   : > { %3194 = vrot.lane.b32.xlu0 %v3556_v58, %s5309_s15 }
 0x337   : > { %v2528_v40 = vadd.f32 %v7082_v18, %v2489_v60  ;;  %v3620_v48 = vpop.permute.xlu1 %3619  ;;  %v4008_v23 = vld [vmem:[#allocation4 + $0x98] sm:$0xff] }
 0x338   : > { %v7396_v46 = vld [vmem:[#allocation3 + $0x154] sm:$0xff]  ;;  %3708 = vst.msk [vmem:[#allocation4 + $0xb0] sm:$0xff] %vm847_vm4, %v3620_v48  ;;  %v2985_v14 = vpop.permute.xlu0 %2984  ;;  %4311 = vmatprep.mubr.f32.mxu1 %v4008_v23  ;;  %v7408_v2 = vld [vmem:[#allocation3 + $0x15c] sm:$0xff] }
 0x339   : > { %v7399_v55 = vld [vmem:[#allocation3 + $0x158] sm:$0xff]  ;;  %3977 = vst.msk [vmem:[#allocation4 + $0x1f0] sm:$0xff] %vm285_vm0, %v7396_v46  ;;  %v2560_v42 = vmax.f32 %v2528_v40, 0.0  ;;  %3446 = vrot.lane.b32.xlu1 %v7157_v5, %s5307_s9  ;;  %4312 = vmatmul.mubr.f32.gmra.mxu1 %v4007_v9  ;;  %3978 = vst.msk [vmem:[#allocation4 + $0x208] sm:$0xff] %vm285_vm0, %v7408_v2  ;;  %v4013_v40 = vld [vmem:[#allocation4 + $0xc0] sm:$0xff] }
 0x33a   : > { %3070 = vst.msk [vmem:[#allocation4 + $0xf0] sm:$0xff] %vm847_vm4, %v2985_v14  ;;  %v7406_v1 = vld [vmem:[#allocation3 + $0x15a] sm:$0xff]  ;;  %2812 = vrot.lane.b32.xlu0 %v7133_v57, %s5307_s9 }
 0x33b   : > { %2705 = vst.msk [vmem:[#allocation4 + $0x2b8] sm:$0xff] %vm285_vm0, %v7399_v55  ;;  %3341 = vst.msk [vmem:[#allocation4 + $0x260] sm:$0xff] %vm285_vm0, %v7406_v1  ;;  %v3812_v47 = vpop.permute.xlu1 %3811 }
 0x33c   : > { %2638 = vst.msk [vmem:[#allocation3 + $0x16a] sm:$0xff] %vm285_vm0, %v2560_v42  ;;  %v3177_v31 = vpop.permute.xlu0 %3176 }
 0x33d   : > { %3900 = vst.msk [vmem:[#allocation4 + $0xb0] sm:$0xff] %vm1040_vm5, %v3812_v47  ;;  %v2207_v17 = vpop.f32.mrf.mxu0  ;;  %3262 = vst.msk [vmem:[#allocation4 + $0xf0] sm:$0xff] %vm1040_vm5, %v3177_v31  ;;  %3639 = vrot.lane.b32.xlu1 %v3558_v22, %s5308_s20  ;;  %v5118_v47 = vpop.f32.mrf.mxu1 }
 0x33e   : > { %v2433_v11 = vadd.f32 %v5112_v56, %v2207_v17  ;;  %3004 = vrot.lane.b32.xlu0 %v7155_v30, %s5308_s20 }
 0x33f   : > { %v2209_v57 = vpop.f32.mrf.mxu0  ;;  %v3429_v58 = vpop.permute.xlu1 %3428 }
 0x340   : > { %v2490_v32 = vmul.f32 %v7073_v26, %v2433_v11  ;;  %3516 = vst.msk [vmem:[#allocation4 + $0xc8] sm:$0xff] %vm654_vm3, %v3429_v58  ;;  %v2795_v49 = vpop.permute.xlu0 %2794  ;;  %v2447_v57 = vpop.f32.mrf.mxu1 }
 0x341   : > { %2879 = vst.msk [vmem:[#allocation4 + $0x108] sm:$0xff] %vm654_vm3, %v2795_v49  ;;  %3831 = vrot.lane.b32.xlu1 %v7300_v24, %s5309_s15 }
 0x342   : > { %v2529_v0 = vadd.f32 %v7082_v18, %v2490_v32  ;;  %3196 = vrot.lane.b32.xlu0 %v3557_v45, %s5309_s15 }
 0x343   : > { %v7431_v6 = vld [vmem:[#allocation3 + $0x168] sm:$0xff]  ;;  %v3622_v4 = vpop.permute.xlu1 %3621 }
 0x344   : > { %v7433_v30 = vld [vmem:[#allocation3 + $0x16a] sm:$0xff]  ;;  %v2561_v53 = vmax.f32 %v2529_v0, 0.0  ;;  %2706 = vst.msk [vmem:[#allocation4 + $0x2d0] sm:$0xff] %vm285_vm0, %v7431_v6  ;;  %v2987_v16 = vpop.permute.xlu0 %2986 }
 0x345   : > { %v4011_v35 = vld [vmem:[#allocation4 + $0xb0] sm:$0xff]  ;;  %3342 = vst.msk [vmem:[#allocation4 + $0x278] sm:$0xff] %vm285_vm0, %v7433_v30  ;;  %3448 = vrot.lane.b32.xlu1 %v7232_v41, %s5307_s9  ;;  %v2212_v21 = vpop.f32.mrf.mxu0 }
 0x346   : > { %3709 = vst.msk [vmem:[#allocation4 + $0xc8] sm:$0xff] %vm847_vm4, %v3622_v4  ;;  %4316 = vmatprep.mubr.f32.mxu1 %v4011_v35  ;;  %3071 = vst.msk [vmem:[#allocation4 + $0x108] sm:$0xff] %vm847_vm4, %v2987_v16  ;;  %2814 = vrot.lane.b32.xlu0 %v7171_v19, %s5307_s9  ;;  %v2438_v29 = vadd.f32 %v2437_v10, %v2212_v21 }
 0x347   : > { %2639 = vst.msk [vmem:[#allocation3 + $0x172] sm:$0xff] %vm285_vm0, %v2561_v53  ;;  %4317 = vmatmul.mubr.f32.gmra.mxu1 %v4010_v7  ;;  %v3814_v39 = vpop.permute.xlu1 %3813  ;;  %v2214_v3 = vpop.f32.mrf.mxu0  ;;  %v4016_v53 = vld [vmem:[#allocation4 + $0xd8] sm:$0xff] }
 0x348   : > { %3901 = vst.msk [vmem:[#allocation4 + $0xc8] sm:$0xff] %vm1040_vm5, %v3814_v39  ;;  %v3179_v56 = vpop.permute.xlu0 %3178  ;;  %v2491_v52 = vmul.f32 %v7073_v26, %v2438_v29  ;;  %v5234_v3 = vld [vmem:[%s7981_s2] ss:$0 sm:$0xff] }
 0x349   : > { %3263 = vst.msk [vmem:[#allocation4 + $0x108] sm:$0xff] %vm1040_vm5, %v3179_v56  ;;  %3641 = vrot.lane.b32.xlu1 %v7318_v34, %s5308_s20 }
 0x34a   : > { %3006 = vrot.lane.b32.xlu0 %v7157_v5, %s5308_s20  ;;  %v2530_v13 = vadd.f32 %v7082_v18, %v2491_v52 }
 0x34b   : > { %v3431_v63 = vpop.permute.xlu1 %3430 }
 0x34c   : > { %3517 = vst.msk [vmem:[#allocation4 + $0xe0] sm:$0xff] %vm654_vm3, %v3431_v63  ;;  %v2797_v45 = vpop.permute.xlu0 %2796  ;;  %v2562_v43 = vmax.f32 %v2530_v13, 0.0 }
 0x34d   : > { %2880 = vst.msk [vmem:[#allocation4 + $0x120] sm:$0xff] %vm654_vm3, %v2797_v45  ;;  %3833 = vrot.lane.b32.xlu1 %v7320_v51, %s5309_s15  ;;  %v4019_v45 = vld [vmem:[#allocation4 + $0xf0] sm:$0xff] }
 0x34e   : > { %v7454_v19 = vld [vmem:[#allocation3 + $0x16c] sm:$0xff]  ;;  %v7466_v5 = vld [vmem:[#allocation3 + $0x174] sm:$0xff]  ;;  %3198 = vrot.lane.b32.xlu0 %v3558_v22, %s5309_s15  ;;  %2640 = vst.msk [vmem:[#allocation3 + $0x182] sm:$0xff] %vm285_vm0, %v2562_v43  ;;  %v5235_v43 = vld [vmem:[%s7982_s3] ss:$0 sm:$0xff] }
 0x34f   : > { %v7457_v37 = vld [vmem:[#allocation3 + $0x170] sm:$0xff]  ;;  %3979 = vst.msk [vmem:[#allocation4 + $0x220] sm:$0xff] %vm285_vm0, %v7454_v19  ;;  %3980 = vst.msk [vmem:[#allocation4 + $0x238] sm:$0xff] %vm285_vm0, %v7466_v5  ;;  %v3624_v59 = vpop.permute.xlu1 %3623  ;;  %v4014_v28 = vld [vmem:[#allocation4 + $0xc8] sm:$0xff] }
 0x350   : > { %v7459_v54 = vld [vmem:[#allocation3 + $0x172] sm:$0xff]  ;;  %2707 = vst.msk [vmem:[#allocation4 + $0x2e8] sm:$0xff] %vm285_vm0, %v7457_v37  ;;  %v2989_v12 = vpop.permute.xlu0 %2988  ;;  %v2217_v60 = vpop.f32.mrf.mxu0  ;;  %4321 = vmatprep.mubr.f32.mxu1 %v4014_v28 }
 0x351   : > { %3343 = vst.msk [vmem:[#allocation4 + $0x290] sm:$0xff] %vm285_vm0, %v7459_v54  ;;  %v2443_v48 = vadd.f32 %v5115_v20, %v2217_v60  ;;  %3450 = vrot.lane.b32.xlu1 %v7234_v62, %s5307_s9  ;;  %4322 = vmatmul.mubr.f32.gmra.mxu1 %v4013_v40 }
 0x352   : > { %3710 = vst.msk [vmem:[#allocation4 + $0xe0] sm:$0xff] %vm847_vm4, %v3624_v59  ;;  %3072 = vst.msk [vmem:[#allocation4 + $0x120] sm:$0xff] %vm847_vm4, %v2989_v12  ;;  %2816 = vrot.lane.b32.xlu0 %v7194_v38, %s5307_s9  ;;  %v2219_v23 = vpop.f32.mrf.mxu0 }
 0x353   : > { %v2492_v14 = vmul.f32 %v7073_v26, %v2443_v48  ;;  %v3816_v9 = vpop.permute.xlu1 %3815 }
 0x354   : > { %3902 = vst.msk [vmem:[#allocation4 + $0xe0] sm:$0xff] %vm1040_vm5, %v3816_v9  ;;  %v3181_v42 = vpop.permute.xlu0 %3180 }
 0x355   : > { %v2531_v31 = vadd.f32 %v7082_v18, %v2492_v14  ;;  %3264 = vst.msk [vmem:[#allocation4 + $0x120] sm:$0xff] %vm1040_vm5, %v3181_v42  ;;  %3643 = vrot.lane.b32.xlu1 %v7346_v25, %s5308_s20  ;;  %v7490_v17 = vld [vmem:[#allocation3 + $0x182] sm:$0xff] }
 0x356   : > { %3008 = vrot.lane.b32.xlu0 %v7232_v41, %s5308_s20  ;;  %3344 = vst.msk [vmem:[#allocation4 + $0x2a8] sm:$0xff] %vm285_vm0, %v7490_v17 }
 0x357   : > { %v2563_v38 = vmax.f32 %v2531_v31, 0.0  ;;  %v3433_v22 = vpop.permute.xlu1 %3432 }
 0x358   : > { %3518 = vst.msk [vmem:[#allocation4 + $0xf8] sm:$0xff] %vm654_vm3, %v3433_v22  ;;  %v2799_v11 = vpop.permute.xlu0 %2798 }
 0x359   : > { %2641 = vst.msk [vmem:[#allocation3 + $0x18a] sm:$0xff] %vm285_vm0, %v2563_v38  ;;  %3835 = vrot.lane.b32.xlu1 %v7348_v61, %s5309_s15  ;;  %v2222_v32 = vpop.f32.mrf.mxu0 }
 0x35a   : > { %2881 = vst.msk [vmem:[#allocation4 + $0x138] sm:$0xff] %vm654_vm3, %v2799_v11  ;;  %3200 = vrot.lane.b32.xlu0 %v7318_v34, %s5309_s15  ;;  %v2448_v41 = vadd.f32 %v2447_v57, %v2222_v32  ;;  %v3371_v32 = vld [vmem:[#allocation3 + $0x144] sm:$0xff] }
 0x35b   : > { %v3626_v58 = vpop.permute.xlu1 %3625  ;;  %v4017_v49 = vld [vmem:[#allocation4 + $0xe0] sm:$0xff]  ;;  %v2224_v20 = vpop.f32.mrf.mxu0 }
 0x35c   : > { %3711 = vst.msk [vmem:[#allocation4 + $0xf8] sm:$0xff] %vm847_vm4, %v3626_v58  ;;  %v2991_v0 = vpop.permute.xlu0 %2990  ;;  %4326 = vmatprep.mubr.f32.mxu1 %v4017_v49  ;;  %v2493_v4 = vmul.f32 %v7073_v26, %v2448_v41 }
 0x35d   : > { %3073 = vst.msk [vmem:[#allocation4 + $0x138] sm:$0xff] %vm847_vm4, %v2991_v0  ;;  %3452 = vrot.lane.b32.xlu1 %v7287_v27, %s5307_s9  ;;  %4327 = vmatmul.mubr.f32.gmra.mxu1 %v4016_v53 }
 0x35e   : > { %2818 = vrot.lane.b32.xlu0 %v7246_v8, %s5307_s9  ;;  %v2532_v34 = vadd.f32 %v7082_v18, %v2493_v4  ;;  %v3565_v4 = vld [vmem:[#allocation3 + $0x180] sm:$0xff] }
 0x35f   : > { %v3818_v35 = vpop.permute.xlu1 %3817 }
 0x360   : > { %v7509_v16 = vld [vmem:[#allocation3 + $0x184] sm:$0xff]  ;;  %3903 = vst.msk [vmem:[#allocation4 + $0xf8] sm:$0xff] %vm1040_vm5, %v3818_v35  ;;  %v3183_v10 = vpop.permute.xlu0 %3182  ;;  %v2564_v26 = vmax.f32 %v2532_v34, 0.0  ;;  %v7519_v8 = vld [vmem:[#allocation3 + $0x18c] sm:$0xff] }
 0x361   : > { %v7512_v7 = vld [vmem:[#allocation3 + $0x18a] sm:$0xff]  ;;  %3981 = vst.msk [vmem:[#allocation4 + $0x250] sm:$0xff] %vm285_vm0, %v7509_v16  ;;  %3645 = vrot.lane.b32.xlu1 %v7373_v33, %s5308_s20  ;;  %3982 = vst.msk [vmem:[#allocation4 + $0x268] sm:$0xff] %vm285_vm0, %v7519_v8 }
 0x362   : > { %3265 = vst.msk [vmem:[#allocation4 + $0x138] sm:$0xff] %vm1040_vm5, %v3183_v10  ;;  %3010 = vrot.lane.b32.xlu0 %v7234_v62, %s5308_s20 }
 0x363   : > { %3345 = vst.msk [vmem:[#allocation4 + $0x2c0] sm:$0xff] %vm285_vm0, %v7512_v7  ;;  %2642 = vst.msk [vmem:[#allocation3 + $0x19a] sm:$0xff] %vm285_vm0, %v2564_v26  ;;  %v3435_v18 = vpop.permute.xlu1 %3434 }
 0x364   : > { %3519 = vst.msk [vmem:[#allocation4 + $0x110] sm:$0xff] %vm654_vm3, %v3435_v18  ;;  %v2801_v21 = vpop.permute.xlu0 %2800  ;;  %v2227_v29 = vpop.f32.mrf.mxu0 }
 0x365   : > { %2882 = vst.msk [vmem:[#allocation4 + $0x150] sm:$0xff] %vm654_vm3, %v2801_v21  ;;  %v2453_v39 = vadd.f32 %v5118_v47, %v2227_v29  ;;  %3837 = vrot.lane.b32.xlu1 %v7375_v44, %s5309_s15  ;;  %v3566_v21 = vld [vmem:[#allocation3 + $0x188] sm:$0xff] }
 0x366   : > { %3202 = vrot.lane.b32.xlu0 %v7346_v25, %s5309_s15  ;;  %v2229_v62 = vpop.f32.mrf.mxu0 }
 0x367   : > { %v2494_v56 = vmul.f32 %v5234_v3, %v2453_v39  ;;  %v3628_v52 = vpop.permute.xlu1 %3627  ;;  %v4020_v13 = vld [vmem:[#allocation4 + $0xf8] sm:$0xff] }
 0x368   : > { %3712 = vst.msk [vmem:[#allocation4 + $0x110] sm:$0xff] %vm847_vm4, %v3628_v52  ;;  %v2993_v63 = vpop.permute.xlu0 %2992  ;;  %4331 = vmatprep.mubr.f32.mxu1 %v4020_v13 }
 0x369   : > { %v2533_v59 = vadd.f32 %v5235_v43, %v2494_v56  ;;  %3074 = vst.msk [vmem:[#allocation4 + $0x150] sm:$0xff] %vm847_vm4, %v2993_v63  ;;  %3454 = vrot.lane.b32.xlu1 %v7289_v36, %s5307_s9  ;;  %4332 = vmatmul.mubr.f32.gmra.mxu1 %v4019_v45  ;;  %v4028_v53 = vld [vmem:[#allocation4 + $0x138] sm:$0xff] }
 0x36a   : > { %2820 = vrot.lane.b32.xlu0 %v7266_v50, %s5307_s9  ;;  %v7546_v25 = vld [vmem:[#allocation3 + $0x19a] sm:$0xff] }
 0x36b   : > { %v2565_v28 = vmax.f32 %v2533_v59, 0.0  ;;  %v3820_v12 = vpop.permute.xlu1 %3819  ;;  %3346 = vst.msk [vmem:[#allocation4 + $0x2d8] sm:$0xff] %vm285_vm0, %v7546_v25  ;;  %v3567_v52 = vld [vmem:[#allocation3 + $0x198] sm:$0xff] }
 0x36c   : > { %3904 = vst.msk [vmem:[#allocation4 + $0x110] sm:$0xff] %vm1040_vm5, %v3820_v12  ;;  %v3185_v60 = vpop.permute.xlu0 %3184 }
 0x36d   : > { %2643 = vst.msk [vmem:[#allocation3 + $0x1a2] sm:$0xff] %vm285_vm0, %v2565_v28  ;;  %3647 = vrot.lane.b32.xlu1 %v7399_v55, %s5308_s20 }
 0x36e   : > { %3266 = vst.msk [vmem:[#allocation4 + $0x150] sm:$0xff] %vm1040_vm5, %v3185_v60  ;;  %3012 = vrot.lane.b32.xlu0 %v7287_v27, %s5308_s20  ;;  %v4022_v27 = vld [vmem:[#allocation4 + $0x108] sm:$0xff] }
 0x36f   : > { %v3437_v50 = vpop.permute.xlu1 %3436 }
 0x370   : > { %3520 = vst.msk [vmem:[#allocation4 + $0x128] sm:$0xff] %vm654_vm3, %v3437_v50  ;;  %v2803_v40 = vpop.permute.xlu0 %2802 }
 0x371   : > { %2883 = vst.msk [vmem:[#allocation4 + $0x168] sm:$0xff] %vm654_vm3, %v2803_v40  ;;  %3839 = vrot.lane.b32.xlu1 %v7406_v1, %s5309_s15 }
 0x372   : > { %3204 = vrot.lane.b32.xlu0 %v7373_v33, %s5309_s15 }
 0x373   : > { %v3630_v48 = vpop.permute.xlu1 %3629  ;;  %v4023_v23 = vld [vmem:[#allocation4 + $0x110] sm:$0xff] }
 0x374   : > { %v7563_v14 = vld [vmem:[#allocation3 + $0x19c] sm:$0xff]  ;;  %3713 = vst.msk [vmem:[#allocation4 + $0x128] sm:$0xff] %vm847_vm4, %v3630_v48  ;;  %v2995_v9 = vpop.permute.xlu0 %2994  ;;  %4336 = vmatprep.mubr.f32.mxu1 %v4023_v23  ;;  %v7573_v33 = vld [vmem:[#allocation3 + $0x1a4] sm:$0xff] }
 0x375   : > { %3983 = vst.msk [vmem:[#allocation4 + $0x280] sm:$0xff] %vm285_vm0, %v7563_v14  ;;  %3456 = vrot.lane.b32.xlu1 %v7343_v15, %s5307_s9  ;;  %4337 = vmatmul.mubr.f32.gmra.mxu1 %v4022_v27  ;;  %v7571_v42 = vld [vmem:[#allocation3 + $0x1a2] sm:$0xff]  ;;  %3984 = vst.msk [vmem:[#allocation4 + $0x298] sm:$0xff] %vm285_vm0, %v7573_v33  ;;  %v4031_v18 = vld [vmem:[#allocation4 + $0x150] sm:$0xff] }
 0x376   : > { %3075 = vst.msk [vmem:[#allocation4 + $0x168] sm:$0xff] %vm847_vm4, %v2995_v9  ;;  %2822 = vrot.lane.b32.xlu0 %v7300_v24, %s5307_s9  ;;  %v3568_v60 = vld [vmem:[#allocation3 + $0x1a0] sm:$0xff]  ;;  %v3569_v27 = vld [vmem:[#allocation3 + $0x1b0] sm:$0xff] }
 0x377   : > { %3347 = vst.msk [vmem:[#allocation4 + $0x2f0] sm:$0xff] %vm285_vm0, %v7571_v42  ;;  %v3822_v47 = vpop.permute.xlu1 %3821 }
 0x378   : > { %3905 = vst.msk [vmem:[#allocation4 + $0x128] sm:$0xff] %vm1040_vm5, %v3822_v47  ;;  %v3187_v31 = vpop.permute.xlu0 %3186 }
 0x379   : > { %3267 = vst.msk [vmem:[#allocation4 + $0x168] sm:$0xff] %vm1040_vm5, %v3187_v31  ;;  %3649 = vrot.lane.b32.xlu1 %v7431_v6, %s5308_s20 }
 0x37a   : > { %3014 = vrot.lane.b32.xlu0 %v7289_v36, %s5308_s20  ;;  %v4025_v36 = vld [vmem:[#allocation4 + $0x120] sm:$0xff] }
 0x37b   : > { %v3439_v38 = vpop.permute.xlu1 %3438 }
 0x37c   : > { %3521 = vst.msk [vmem:[#allocation4 + $0x140] sm:$0xff] %vm654_vm3, %v3439_v38  ;;  %v2805_v24 = vpop.permute.xlu0 %2804 }
 0x37d   : > { %2884 = vst.msk [vmem:[#allocation4 + $0x180] sm:$0xff] %vm654_vm3, %v2805_v24  ;;  %3841 = vrot.lane.b32.xlu1 %v7433_v30, %s5309_s15 }
 0x37e   : > { %3206 = vrot.lane.b32.xlu0 %v7399_v55, %s5309_s15 }
 0x37f   : > { %v3632_v22 = vpop.permute.xlu1 %3631  ;;  %v4026_v11 = vld [vmem:[#allocation4 + $0x128] sm:$0xff] }
 0x380   : > { %3714 = vst.msk [vmem:[#allocation4 + $0x140] sm:$0xff] %vm847_vm4, %v3632_v22  ;;  %v2997_v57 = vpop.permute.xlu0 %2996  ;;  %4341 = vmatprep.mubr.f32.mxu1 %v4026_v11  ;;  %v4034_v56 = vld [vmem:[#allocation4 + $0x168] sm:$0xff] }
 0x381   : > { %3076 = vst.msk [vmem:[#allocation4 + $0x180] sm:$0xff] %vm847_vm4, %v2997_v57  ;;  %3458 = vrot.lane.b32.xlu1 %v3371_v32, %s5307_s9  ;;  %4342 = vmatmul.mubr.f32.gmra.mxu1 %v4025_v36 }
 0x382   : > { %2824 = vrot.lane.b32.xlu0 %v7320_v51, %s5307_s9 }
 0x383   : > { %v3824_v41 = vpop.permute.xlu1 %3823 }
 0x384   : > { %3906 = vst.msk [vmem:[#allocation4 + $0x140] sm:$0xff] %vm1040_vm5, %v3824_v41  ;;  %v3189_v55 = vpop.permute.xlu0 %3188 }
 0x385   : > { %3268 = vst.msk [vmem:[#allocation4 + $0x180] sm:$0xff] %vm1040_vm5, %v3189_v55  ;;  %3651 = vrot.lane.b32.xlu1 %v7457_v37, %s5308_s20 }
 0x386   : > { %3016 = vrot.lane.b32.xlu0 %v7343_v15, %s5308_s20 }
 0x387   : > { %v3441_v58 = vpop.permute.xlu1 %3440 }
 0x388   : > { %3522 = vst.msk [vmem:[#allocation4 + $0x158] sm:$0xff] %vm654_vm3, %v3441_v58  ;;  %v2807_v49 = vpop.permute.xlu0 %2806  ;;  %v3762_v58 = vld [vmem:[#allocation3 + $0x1ba] sm:$0xff] }
 0x389   : > { %2885 = vst.msk [vmem:[#allocation4 + $0x198] sm:$0xff] %vm654_vm3, %v2807_v49  ;;  %3843 = vrot.lane.b32.xlu1 %v7459_v54, %s5309_s15 }
 0x38a   : > { %3208 = vrot.lane.b32.xlu0 %v7431_v6, %s5309_s15 }
 0x38b   : > { %v3634_v51 = vpop.permute.xlu1 %3633  ;;  %v4029_v20 = vld [vmem:[#allocation4 + $0x140] sm:$0xff] }
 0x38c   : > { %3715 = vst.msk [vmem:[#allocation4 + $0x158] sm:$0xff] %vm847_vm4, %v3634_v51  ;;  %v2999_v0 = vpop.permute.xlu0 %2998  ;;  %4346 = vmatprep.mubr.f32.mxu1 %v4029_v20  ;;  %v4037_v59 = vld [vmem:[#allocation4 + $0x180] sm:$0xff] }
 0x38d   : > { %3077 = vst.msk [vmem:[#allocation4 + $0x198] sm:$0xff] %vm847_vm4, %v2999_v0  ;;  %3460 = vrot.lane.b32.xlu1 %v7396_v46, %s5307_s9  ;;  %4347 = vmatmul.mubr.f32.gmra.mxu1 %v4028_v53 }
 0x38e   : > { %2826 = vrot.lane.b32.xlu0 %v7348_v61, %s5307_s9 }
 0x38f   : > { %v3826_v15 = vpop.permute.xlu1 %3825 }
 0x390   : > { %3907 = vst.msk [vmem:[#allocation4 + $0x158] sm:$0xff] %vm1040_vm5, %v3826_v15  ;;  %v3191_v6 = vpop.permute.xlu0 %3190 }
 0x391   : > { %3269 = vst.msk [vmem:[#allocation4 + $0x198] sm:$0xff] %vm1040_vm5, %v3191_v6  ;;  %3653 = vrot.lane.b32.xlu1 %v3565_v4, %s5308_s20  ;;  %v3571_v6 = vld [vmem:[#allocation3 + $0x1c8] sm:$0xff] }
 0x392   : > { %3018 = vrot.lane.b32.xlu0 %v3371_v32, %s5308_s20  ;;  %v3570_v32 = vld [vmem:[#allocation3 + $0x1b8] sm:$0xff] }
 0x393   : > { %v3443_v34 = vpop.permute.xlu1 %3442 }
 0x394   : > { %3523 = vst.msk [vmem:[#allocation4 + $0x170] sm:$0xff] %vm654_vm3, %v3443_v34  ;;  %v2809_v35 = vpop.permute.xlu0 %2808 }
 0x395   : > { %2886 = vst.msk [vmem:[#allocation4 + $0x1b0] sm:$0xff] %vm654_vm3, %v2809_v35  ;;  %3845 = vrot.lane.b32.xlu1 %v7490_v17, %s5309_s15 }
 0x396   : > { %3210 = vrot.lane.b32.xlu0 %v7457_v37, %s5309_s15 }
 0x397   : > { %v3636_v61 = vpop.permute.xlu1 %3635  ;;  %v4032_v10 = vld [vmem:[#allocation4 + $0x158] sm:$0xff] }
 0x398   : > { %3716 = vst.msk [vmem:[#allocation4 + $0x170] sm:$0xff] %vm847_vm4, %v3636_v61  ;;  %v3001_v26 = vpop.permute.xlu0 %3000  ;;  %4351 = vmatprep.mubr.f32.mxu1 %v4032_v10  ;;  %v4040_v9 = vld [vmem:[#allocation4 + $0x198] sm:$0xff]  ;;  %v3763_v61 = vld [vmem:[#allocation3 + $0x1ca] sm:$0xff] }
 0x399   : > { %3078 = vst.msk [vmem:[#allocation4 + $0x1b0] sm:$0xff] %vm847_vm4, %v3001_v26  ;;  %3462 = vrot.lane.b32.xlu1 %v7408_v2, %s5307_s9  ;;  %4352 = vmatmul.mubr.f32.gmra.mxu1 %v4031_v18 }
 0x39a   : > { %2828 = vrot.lane.b32.xlu0 %v7375_v44, %s5307_s9 }
 0x39b   : > { %v3828_v17 = vpop.permute.xlu1 %3827 }
 0x39c   : > { %3908 = vst.msk [vmem:[#allocation4 + $0x170] sm:$0xff] %vm1040_vm5, %v3828_v17  ;;  %v3193_v37 = vpop.permute.xlu0 %3192 }
 0x39d   : > { %3270 = vst.msk [vmem:[#allocation4 + $0x1b0] sm:$0xff] %vm1040_vm5, %v3193_v37  ;;  %3655 = vrot.lane.b32.xlu1 %v3566_v21, %s5308_s20 }
 0x39e   : > { %3020 = vrot.lane.b32.xlu0 %v7396_v46, %s5308_s20 }
 0x39f   : > { %v3445_v29 = vpop.permute.xlu1 %3444 }
 0x3a0   : > { %3524 = vst.msk [vmem:[#allocation4 + $0x188] sm:$0xff] %vm654_vm3, %v3445_v29  ;;  %v2811_v39 = vpop.permute.xlu0 %2810  ;;  %v3572_v29 = vld [vmem:[#allocation3 + $0x1d0] sm:$0xff] }
 0x3a1   : > { %2887 = vst.msk [vmem:[#allocation4 + $0x1c8] sm:$0xff] %vm654_vm3, %v2811_v39  ;;  %3847 = vrot.lane.b32.xlu1 %v7512_v7, %s5309_s15 }
 0x3a2   : > { %3212 = vrot.lane.b32.xlu0 %v3565_v4, %s5309_s15 }
 0x3a3   : > { %v3638_v44 = vpop.permute.xlu1 %3637  ;;  %v4035_v62 = vld [vmem:[#allocation4 + $0x170] sm:$0xff] }
 0x3a4   : > { %3717 = vst.msk [vmem:[#allocation4 + $0x188] sm:$0xff] %vm847_vm4, %v3638_v44  ;;  %v3003_v3 = vpop.permute.xlu0 %3002  ;;  %4356 = vmatprep.mubr.f32.mxu1 %v4035_v62  ;;  %v4043_v57 = vld [vmem:[#allocation4 + $0x1b0] sm:$0xff] }
 0x3a5   : > { %3079 = vst.msk [vmem:[#allocation4 + $0x1c8] sm:$0xff] %vm847_vm4, %v3003_v3  ;;  %3464 = vrot.lane.b32.xlu1 %v7454_v19, %s5307_s9  ;;  %4357 = vmatmul.mubr.f32.gmra.mxu1 %v4034_v56  ;;  %v3764_v3 = vld [vmem:[#allocation3 + $0x1d2] sm:$0xff] }
 0x3a6   : > { %2830 = vrot.lane.b32.xlu0 %v7406_v1, %s5307_s9 }
 0x3a7   : > { %v3830_v46 = vpop.permute.xlu1 %3829 }
 0x3a8   : > { %3909 = vst.msk [vmem:[#allocation4 + $0x188] sm:$0xff] %vm1040_vm5, %v3830_v46  ;;  %v3195_v7 = vpop.permute.xlu0 %3194 }
 0x3a9   : > { %3271 = vst.msk [vmem:[#allocation4 + $0x1c8] sm:$0xff] %vm1040_vm5, %v3195_v7  ;;  %3657 = vrot.lane.b32.xlu1 %v3567_v52, %s5308_s20 }
 0x3aa   : > { %3022 = vrot.lane.b32.xlu0 %v7408_v2, %s5308_s20 }
 0x3ab   : > { %v3447_v13 = vpop.permute.xlu1 %3446 }
 0x3ac   : > { %3525 = vst.msk [vmem:[#allocation4 + $0x1a0] sm:$0xff] %vm654_vm3, %v3447_v13  ;;  %v2813_v63 = vpop.permute.xlu0 %2812 }
 0x3ad   : > { %2888 = vst.msk [vmem:[#allocation4 + $0x1e0] sm:$0xff] %vm654_vm3, %v2813_v63  ;;  %3849 = vrot.lane.b32.xlu1 %v7546_v25, %s5309_s15 }
 0x3ae   : > { %3214 = vrot.lane.b32.xlu0 %v3566_v21, %s5309_s15 }
 0x3af   : > { %v3640_v1 = vpop.permute.xlu1 %3639  ;;  %v4038_v45 = vld [vmem:[#allocation4 + $0x188] sm:$0xff] }
 0x3b0   : > { %3718 = vst.msk [vmem:[#allocation4 + $0x1a0] sm:$0xff] %vm847_vm4, %v3640_v1  ;;  %v3005_v43 = vpop.permute.xlu0 %3004  ;;  %4361 = vmatprep.mubr.f32.mxu1 %v4038_v45  ;;  %v4046_v53 = vld [vmem:[#allocation4 + $0x1c8] sm:$0xff] }
 0x3b1   : > { %3080 = vst.msk [vmem:[#allocation4 + $0x1e0] sm:$0xff] %vm847_vm4, %v3005_v43  ;;  %3466 = vrot.lane.b32.xlu1 %v7466_v5, %s5307_s9  ;;  %4362 = vmatmul.mubr.f32.gmra.mxu1 %v4037_v59  ;;  %v7662_v2 = vpop.f32.mrf.mxu1 }
 0x3b2   : > { %2832 = vrot.lane.b32.xlu0 %v7433_v30, %s5307_s9 }
 0x3b3   : > { %v3832_v25 = vpop.permute.xlu1 %3831  ;;  %v4285_v28 = vpop.f32.mrf.mxu1 }
 0x3b4   : > { %3910 = vst.msk [vmem:[#allocation4 + $0x1a0] sm:$0xff] %vm1040_vm5, %v3832_v25  ;;  %v3197_v12 = vpop.permute.xlu0 %3196 }
 0x3b5   : > { %3272 = vst.msk [vmem:[#allocation4 + $0x1e0] sm:$0xff] %vm1040_vm5, %v3197_v12  ;;  %3659 = vrot.lane.b32.xlu1 %v3568_v60, %s5308_s20 }
 0x3b6   : > { %3024 = vrot.lane.b32.xlu0 %v7454_v19, %s5308_s20 }
 0x3b7   : > { %v3449_v50 = vpop.permute.xlu1 %3448 }
 0x3b8   : > { %3526 = vst.msk [vmem:[#allocation4 + $0x1b8] sm:$0xff] %vm654_vm3, %v3449_v50  ;;  %v2815_v40 = vpop.permute.xlu0 %2814 }
 0x3b9   : > { %2889 = vst.msk [vmem:[#allocation4 + $0x1f8] sm:$0xff] %vm654_vm3, %v2815_v40  ;;  %3851 = vrot.lane.b32.xlu1 %v7571_v42, %s5309_s15 }
 0x3ba   : > { %3216 = vrot.lane.b32.xlu0 %v3567_v52, %s5309_s15 }
 0x3bb   : > { %v3642_v30 = vpop.permute.xlu1 %3641  ;;  %v4041_v48 = vld [vmem:[#allocation4 + $0x1a0] sm:$0xff] }
 0x3bc   : > { %3719 = vst.msk [vmem:[#allocation4 + $0x1b8] sm:$0xff] %vm847_vm4, %v3642_v30  ;;  %v3007_v23 = vpop.permute.xlu0 %3006  ;;  %4366 = vmatprep.mubr.f32.mxu1 %v4041_v48  ;;  %v4049_v37 = vld [vmem:[#allocation4 + $0x1e0] sm:$0xff] }
 0x3bd   : > { %3081 = vst.msk [vmem:[#allocation4 + $0x1f8] sm:$0xff] %vm847_vm4, %v3007_v23  ;;  %3468 = vrot.lane.b32.xlu1 %v7509_v16, %s5307_s9  ;;  %4367 = vmatmul.mubr.f32.gmra.mxu1 %v4040_v9  ;;  %v3761_v16 = vld [vmem:[#allocation3 + $0x1b2] sm:$0xff] }
 0x3be   : > { %v7680_v19 = vpop.f32.mrf.mxu1  ;;  %2834 = vrot.lane.b32.xlu0 %v7459_v54, %s5307_s9 }
 0x3bf   : > { %v3834_v42 = vpop.permute.xlu1 %3833 }
 0x3c0   : > { %3911 = vst.msk [vmem:[#allocation4 + $0x1b8] sm:$0xff] %vm1040_vm5, %v3834_v42  ;;  %v4290_v47 = vpop.f32.mrf.mxu1  ;;  %v3199_v31 = vpop.permute.xlu0 %3198 }
 0x3c1   : > { %3273 = vst.msk [vmem:[#allocation4 + $0x1f8] sm:$0xff] %vm1040_vm5, %v3199_v31  ;;  %3661 = vrot.lane.b32.xlu1 %v3569_v27, %s5308_s20  ;;  %v5129_v42 = vpop.f32.mrf.mxu0 }
 0x3c2   : > { %3026 = vrot.lane.b32.xlu0 %v7466_v5, %s5308_s20 }
 0x3c3   : > { %v3451_v38 = vpop.permute.xlu1 %3450 }
 0x3c4   : > { %3527 = vst.msk [vmem:[#allocation4 + $0x1d0] sm:$0xff] %vm654_vm3, %v3451_v38  ;;  %v2817_v24 = vpop.permute.xlu0 %2816 }
 0x3c5   : > { %2890 = vst.msk [vmem:[#allocation4 + $0x210] sm:$0xff] %vm654_vm3, %v2817_v24  ;;  %3853 = vrot.lane.b32.xlu1 %v3761_v16, %s5309_s15 }
 0x3c6   : > { %3218 = vrot.lane.b32.xlu0 %v3568_v60, %s5309_s15 }
 0x3c7   : > { %v3644_v54 = vpop.permute.xlu1 %3643  ;;  %v4044_v22 = vld [vmem:[#allocation4 + $0x1b8] sm:$0xff] }
 0x3c8   : > { %3720 = vst.msk [vmem:[#allocation4 + $0x1d0] sm:$0xff] %vm847_vm4, %v3644_v54  ;;  %v3009_v11 = vpop.permute.xlu0 %3008  ;;  %4371 = vmatprep.mubr.f32.mxu1 %v4044_v22  ;;  %v4052_v13 = vld [vmem:[#allocation4 + $0x1f8] sm:$0xff]  ;;  %v4508_v54 = vpop.f32.mrf.mxu0 }
 0x3c9   : > { %3082 = vst.msk [vmem:[#allocation4 + $0x210] sm:$0xff] %vm847_vm4, %v3009_v11  ;;  %3470 = vrot.lane.b32.xlu1 %v7519_v8, %s5307_s9  ;;  %4372 = vmatmul.mubr.f32.gmra.mxu1 %v4043_v57  ;;  %v4509_v57 = vadd.f32 %v4508_v54, %v7662_v2  ;;  %v7763_v2 = vld [vmem:[%s7985_s6] ss:$0 sm:$0xff] }
 0x3ca   : > { %v7697_v5 = vpop.f32.mrf.mxu1 }
 0x3cb   : > { %v3836_v36 = vpop.permute.xlu1 %3835 }
 0x3cc   : > { %3912 = vst.msk [vmem:[#allocation4 + $0x1d0] sm:$0xff] %vm1040_vm5, %v3836_v36  ;;  %v4295_v41 = vpop.f32.mrf.mxu1  ;;  %v3201_v55 = vpop.permute.xlu0 %3200  ;;  %v7754_v36 = vld [vmem:[%s7984_s5] ss:$0 sm:$0xff] }
 0x3cd   : > { %3274 = vst.msk [vmem:[#allocation4 + $0x210] sm:$0xff] %vm1040_vm5, %v3201_v55  ;;  %3663 = vrot.lane.b32.xlu1 %v3570_v32, %s5308_s20  ;;  %v5132_v41 = vpop.f32.mrf.mxu0 }
 0x3cf   : > { %v3453_v49 = vpop.permute.xlu1 %3452 }
 0x3d0   : > { %3528 = vst.msk [vmem:[#allocation4 + $0x1e8] sm:$0xff] %vm654_vm3, %v3453_v49  ;;  %v2819_v51 = vpop.permute.xlu0 %2818  ;;  %v4514_v49 = vadd.f32 %v5129_v42, %v7680_v19 }
 0x3d1   : > { %2891 = vst.msk [vmem:[#allocation4 + $0x228] sm:$0xff] %vm654_vm3, %v2819_v51  ;;  %3855 = vrot.lane.b32.xlu1 %v3762_v58, %s5309_s15  ;;  %v4674_v58 = vmul.f32 %v7754_v36, %v4509_v57 }
 0x3d3   : > { %v3646_v8 = vpop.permute.xlu1 %3645  ;;  %v4047_v20 = vld [vmem:[#allocation4 + $0x1d0] sm:$0xff] }
 0x3d4   : > { %3721 = vst.msk [vmem:[#allocation4 + $0x1e8] sm:$0xff] %vm847_vm4, %v3646_v8  ;;  %v3011_v0 = vpop.permute.xlu0 %3010  ;;  %4376 = vmatprep.mubr.f32.mxu1 %v4047_v20  ;;  %v4055_v50 = vld [vmem:[#allocation4 + $0x210] sm:$0xff]  ;;  %v4518_v8 = vpop.f32.mrf.mxu0 }
 0x3d5   : > { %3083 = vst.msk [vmem:[#allocation4 + $0x228] sm:$0xff] %vm847_vm4, %v3011_v0  ;;  %3472 = vrot.lane.b32.xlu1 %v7563_v14, %s5307_s9  ;;  %4377 = vmatmul.mubr.f32.gmra.mxu1 %v4046_v53  ;;  %v7709_v15 = vpop.f32.mrf.mxu1  ;;  %v4713_v53 = vadd.f32 %v7763_v2, %v4674_v58 }
 0x3d7   : > { %v3838_v4 = vpop.permute.xlu1 %3837  ;;  %v4300_v34 = vpop.f32.mrf.mxu1 }
 0x3d8   : > { %3913 = vst.msk [vmem:[#allocation4 + $0x1e8] sm:$0xff] %vm1040_vm5, %v3838_v4  ;;  %v3203_v35 = vpop.permute.xlu0 %3202  ;;  %v4519_v4 = vadd.f32 %v4518_v8, %v7697_v5 }
 0x3d9   : > { %3275 = vst.msk [vmem:[#allocation4 + $0x228] sm:$0xff] %vm1040_vm5, %v3203_v35  ;;  %3665 = vrot.lane.b32.xlu1 %v3571_v6, %s5308_s20  ;;  %v4675_v6 = vmul.f32 %v7754_v36, %v4514_v49 }
 0x3db   : > { %v3455_v10 = vpop.permute.xlu1 %3454 }
 0x3dc   : > { %3529 = vst.msk [vmem:[#allocation4 + $0x200] sm:$0xff] %vm654_vm3, %v3455_v10  ;;  %v2821_v26 = vpop.permute.xlu0 %2820 }
 0x3dd   : > { %2892 = vst.msk [vmem:[#allocation4 + $0x240] sm:$0xff] %vm654_vm3, %v2821_v26  ;;  %3857 = vrot.lane.b32.xlu1 %v3763_v61, %s5309_s15  ;;  %v5135_v61 = vpop.f32.mrf.mxu0 }
 0x3df   : > { %v3648_v14 = vpop.permute.xlu1 %3647  ;;  %v4050_v18 = vld [vmem:[#allocation4 + $0x1e8] sm:$0xff] }
 0x3e0   : > { %3722 = vst.msk [vmem:[#allocation4 + $0x200] sm:$0xff] %vm847_vm4, %v3648_v14  ;;  %v3013_v17 = vpop.permute.xlu0 %3012  ;;  %4381 = vmatprep.mubr.f32.mxu1 %v4050_v18  ;;  %v4058_v38 = vld [vmem:[#allocation4 + $0x228] sm:$0xff]  ;;  %v4714_v14 = vadd.f32 %v7763_v2, %v4675_v6  ;;  %v4676_v18 = vmul.f32 %v7754_v36, %v4519_v4 }
 0x3e1   : > { %3084 = vst.msk [vmem:[#allocation4 + $0x240] sm:$0xff] %vm847_vm4, %v3013_v17  ;;  %3474 = vrot.lane.b32.xlu1 %v7573_v33, %s5307_s9  ;;  %v7721_v21 = vpop.f32.mrf.mxu1  ;;  %4382 = vmatmul.mubr.f32.gmra.mxu1 %v4049_v37  ;;  %v4524_v17 = vadd.f32 %v5132_v41, %v7709_v15  ;;  %v4528_v37 = vpop.f32.mrf.mxu0 }
 0x3e3   : > { %v3840_v39 = vpop.permute.xlu1 %3839  ;;  %v4305_v44 = vpop.f32.mrf.mxu1 }
 0x3e4   : > { %3914 = vst.msk [vmem:[#allocation4 + $0x200] sm:$0xff] %vm1040_vm5, %v3840_v39  ;;  %v3205_v62 = vpop.permute.xlu0 %3204  ;;  %v4715_v39 = vadd.f32 %v7763_v2, %v4676_v18  ;;  %v4677_v44 = vmul.f32 %v7754_v36, %v4524_v17  ;;  %v5138_v15 = vpop.f32.mrf.mxu0 }
 0x3e5   : > { %3276 = vst.msk [vmem:[#allocation4 + $0x240] sm:$0xff] %vm1040_vm5, %v3205_v62  ;;  %3667 = vrot.lane.b32.xlu1 %v3572_v29, %s5308_s20  ;;  %v4529_v62 = vadd.f32 %v4528_v37, %v7721_v21 }
 0x3e7   : > { %v3457_v56 = vpop.permute.xlu1 %3456 }
 0x3e8   : > { %3530 = vst.msk [vmem:[#allocation4 + $0x218] sm:$0xff] %vm654_vm3, %v3457_v56  ;;  %v2823_v46 = vpop.permute.xlu0 %2822 }
 0x3e9   : > { %2893 = vst.msk [vmem:[#allocation4 + $0x258] sm:$0xff] %vm654_vm3, %v2823_v46  ;;  %3859 = vrot.lane.b32.xlu1 %v3764_v3, %s5309_s15 }
 0x3eb   : > { %v3650_v33 = vpop.permute.xlu1 %3649  ;;  %v4053_v7 = vld [vmem:[#allocation4 + $0x200] sm:$0xff] }
 0x3ec   : > { %3723 = vst.msk [vmem:[#allocation4 + $0x218] sm:$0xff] %vm847_vm4, %v3650_v33  ;;  %v3015_v52 = vpop.permute.xlu0 %3014  ;;  %4386 = vmatprep.mubr.f32.mxu1 %v4053_v7  ;;  %v4061_v34 = vld [vmem:[#allocation4 + $0x240] sm:$0xff]  ;;  %v4716_v33 = vadd.f32 %v7763_v2, %v4677_v44  ;;  %v4678_v7 = vmul.f32 %v7754_v36, %v4529_v62 }
 0x3ed   : > { %3085 = vst.msk [vmem:[#allocation4 + $0x258] sm:$0xff] %vm847_vm4, %v3015_v52  ;;  %v7731_v63 = vpop.f32.mrf.mxu1  ;;  %4387 = vmatmul.mubr.f32.gmra.mxu1 %v4052_v13 }
 0x3ee   : > { %v4534_v52 = vadd.f32 %v5135_v61, %v7731_v63 }
 0x3ef   : > { %v3842_v1 = vpop.permute.xlu1 %3841  ;;  %v4310_v45 = vpop.f32.mrf.mxu1 }
 0x3f0   : > { %3915 = vst.msk [vmem:[#allocation4 + $0x218] sm:$0xff] %vm1040_vm5, %v3842_v1  ;;  %v3207_v43 = vpop.permute.xlu0 %3206  ;;  %v4538_v45 = vpop.f32.mrf.mxu0 }
 0x3f1   : > { %3277 = vst.msk [vmem:[#allocation4 + $0x258] sm:$0xff] %vm1040_vm5, %v3207_v43 }
 0x3f3   : > { %v3459_v59 = vpop.permute.xlu1 %3458 }
 0x3f4   : > { %3531 = vst.msk [vmem:[#allocation4 + $0x230] sm:$0xff] %vm654_vm3, %v3459_v59  ;;  %v2825_v25 = vpop.permute.xlu0 %2824 }
 0x3f5   : > { %2894 = vst.msk [vmem:[#allocation4 + $0x270] sm:$0xff] %vm654_vm3, %v2825_v25  ;;  %v4717_v25 = vadd.f32 %v7763_v2, %v4678_v7 }
 0x3f7   : > { %v3652_v28 = vpop.permute.xlu1 %3651  ;;  %v4056_v12 = vld [vmem:[#allocation4 + $0x218] sm:$0xff] }
 0x3f8   : > { %3724 = vst.msk [vmem:[#allocation4 + $0x230] sm:$0xff] %vm847_vm4, %v3652_v28  ;;  %v3017_v60 = vpop.permute.xlu0 %3016  ;;  %4391 = vmatprep.mubr.f32.mxu1 %v4056_v12  ;;  %v4064_v21 = vld [vmem:[#allocation4 + $0x258] sm:$0xff]  ;;  %v4679_v28 = vmul.f32 %v7754_v36, %v4534_v52 }
 0x3f9   : > { %3086 = vst.msk [vmem:[#allocation4 + $0x270] sm:$0xff] %vm847_vm4, %v3017_v60  ;;  %v7739_v40 = vpop.f32.mrf.mxu1  ;;  %4392 = vmatmul.mubr.f32.gmra.mxu1 %v4055_v50  ;;  %v5141_v60 = vpop.f32.mrf.mxu0 }
 0x3fa   : > { %v4539_v12 = vadd.f32 %v4538_v45, %v7739_v40 }
 0x3fb   : > { %v3844_v30 = vpop.permute.xlu1 %3843  ;;  %v4315_v48 = vpop.f32.mrf.mxu1 }
 0x3fc   : > { %3916 = vst.msk [vmem:[#allocation4 + $0x230] sm:$0xff] %vm1040_vm5, %v3844_v30  ;;  %v3209_v23 = vpop.permute.xlu0 %3208  ;;  %v4718_v30 = vadd.f32 %v7763_v2, %v4679_v28  ;;  %v4680_v48 = vmul.f32 %v7754_v36, %v4539_v12  ;;  %v4548_v40 = vpop.f32.mrf.mxu0 }
 0x3fd   : > { %3278 = vst.msk [vmem:[#allocation4 + $0x270] sm:$0xff] %vm1040_vm5, %v3209_v23 }
 0x3ff   : > { %v3461_v9 = vpop.permute.xlu1 %3460 }
 0x400   : > { %3532 = vst.msk [vmem:[#allocation4 + $0x248] sm:$0xff] %vm654_vm3, %v3461_v9  ;;  %v2827_v27 = vpop.permute.xlu0 %2826 }
 0x401   : > { %2895 = vst.msk [vmem:[#allocation4 + $0x288] sm:$0xff] %vm654_vm3, %v2827_v27 }
 0x403   : > { %v3654_v47 = vpop.permute.xlu1 %3653  ;;  %v4059_v31 = vld [vmem:[#allocation4 + $0x230] sm:$0xff] }
 0x404   : > { %3725 = vst.msk [vmem:[#allocation4 + $0x248] sm:$0xff] %vm847_vm4, %v3654_v47  ;;  %v3019_v16 = vpop.permute.xlu0 %3018  ;;  %4396 = vmatprep.mubr.f32.mxu1 %v4059_v31  ;;  %v4719_v47 = vadd.f32 %v7763_v2, %v4680_v48  ;;  %v4067_v54 = vld [vmem:[#allocation4 + $0x270] sm:$0xff] }
 0x405   : > { %3087 = vst.msk [vmem:[#allocation4 + $0x288] sm:$0xff] %vm847_vm4, %v3019_v16  ;;  %4397 = vmatmul.mubr.f32.gmra.mxu1 %v4058_v38 }
 0x407   : > { %v7747_v24 = vpop.f32.mrf.mxu1  ;;  %v3846_v22 = vpop.permute.xlu1 %3845 }
 0x408   : > { %3917 = vst.msk [vmem:[#allocation4 + $0x248] sm:$0xff] %vm1040_vm5, %v3846_v22  ;;  %v3211_v32 = vpop.permute.xlu0 %3210  ;;  %v4544_v23 = vadd.f32 %v5138_v15, %v7747_v24  ;;  %v5144_v22 = vpop.f32.mrf.mxu0 }
 0x409   : > { %v4320_v11 = vpop.f32.mrf.mxu1  ;;  %3279 = vst.msk [vmem:[#allocation4 + $0x288] sm:$0xff] %vm1040_vm5, %v3211_v32 }
 0x40a   : > { %v4681_v31 = vmul.f32 %v7754_v36, %v4544_v23  ;;  %v4558_v49 = vpop.f32.mrf.mxu0 }
 0x40b   : > { %v3463_v55 = vpop.permute.xlu1 %3462 }
 0x40c   : > { %3533 = vst.msk [vmem:[#allocation4 + $0x260] sm:$0xff] %vm654_vm3, %v3463_v55  ;;  %v2829_v51 = vpop.permute.xlu0 %2828  ;;  %v4720_v32 = vadd.f32 %v7763_v2, %v4681_v31  ;;  %v5147_v44 = vpop.f32.mrf.mxu0 }
 0x40d   : > { %2896 = vst.msk [vmem:[#allocation4 + $0x2a0] sm:$0xff] %vm654_vm3, %v2829_v51 }
 0x40f   : > { %v3656_v20 = vpop.permute.xlu1 %3655  ;;  %v4062_v0 = vld [vmem:[#allocation4 + $0x248] sm:$0xff] }
 0x410   : > { %3726 = vst.msk [vmem:[#allocation4 + $0x260] sm:$0xff] %vm847_vm4, %v3656_v20  ;;  %v3021_v19 = vpop.permute.xlu0 %3020  ;;  %4401 = vmatprep.mubr.f32.mxu1 %v4062_v0  ;;  %v4070_v61 = vld [vmem:[#allocation4 + $0x288] sm:$0xff] }
 0x411   : > { %3088 = vst.msk [vmem:[#allocation4 + $0x2a0] sm:$0xff] %vm847_vm4, %v3021_v19  ;;  %v4323_v35 = vpop.f32.mrf.mxu1  ;;  %4402 = vmatmul.mubr.f32.gmra.mxu1 %v4061_v34 }
 0x412   : > { %4745 = vxpose.xlu1.b32.start [1/16] (narrow) %v4713_v53, 32  ;;  %v4549_v16 = vadd.f32 %v4548_v40, %v4323_v35 }
 0x413   : > { %v3848_v10 = vpop.permute.xlu1 %3847  ;;  %v4325_v26 = vpop.f32.mrf.mxu1 }
 0x414   : > { %3918 = vst.msk [vmem:[#allocation4 + $0x260] sm:$0xff] %vm1040_vm5, %v3848_v10  ;;  %v3213_v5 = vpop.permute.xlu0 %3212  ;;  %v4682_v41 = vmul.f32 %v7754_v36, %v4549_v16 }
 0x415   : > { %3280 = vst.msk [vmem:[#allocation4 + $0x2a0] sm:$0xff] %vm1040_vm5, %v3213_v5 }
 0x416   : > { %4746 = vxpose.xlu1.b32.cont [2/16] (narrow) %v4714_v14, 32  ;;  %v4721_v8 = vadd.f32 %v7763_v2, %v4682_v41 }
 0x417   : > { %v3465_v29 = vpop.permute.xlu1 %3464 }
 0x418   : > { %3534 = vst.msk [vmem:[#allocation4 + $0x278] sm:$0xff] %vm654_vm3, %v3465_v29  ;;  %v2831_v3 = vpop.permute.xlu0 %2830 }
 0x419   : > { %2897 = vst.msk [vmem:[#allocation4 + $0x2b8] sm:$0xff] %vm654_vm3, %v2831_v3 }
 0x41a   : > { %4747 = vxpose.xlu1.b32.cont [3/16] (narrow) %v4715_v39, 32 }
 0x41b   : > { %v3658_v56 = vpop.permute.xlu1 %3657  ;;  %v4065_v46 = vld [vmem:[#allocation4 + $0x260] sm:$0xff] }
 0x41c   : > { %3727 = vst.msk [vmem:[#allocation4 + $0x278] sm:$0xff] %vm847_vm4, %v3658_v56  ;;  %v3023_v13 = vpop.permute.xlu0 %3022  ;;  %4406 = vmatprep.mubr.f32.mxu1 %v4065_v46  ;;  %v4073_v15 = vld [vmem:[#allocation4 + $0x2a0] sm:$0xff]  ;;  %v4568_v56 = vpop.f32.mrf.mxu0 }
 0x41d   : > { %3089 = vst.msk [vmem:[#allocation4 + $0x2b8] sm:$0xff] %vm847_vm4, %v3023_v13  ;;  %v4328_v1 = vpop.f32.mrf.mxu1  ;;  %4407 = vmatmul.mubr.f32.gmra.mxu1 %v4064_v21 }
 0x41e   : > { %4748 = vxpose.xlu1.b32.cont [4/16] (narrow) %v4716_v33, 32  ;;  %v4554_v55 = vadd.f32 %v5141_v60, %v4328_v1  ;;  %v5150_v48 = vpop.f32.mrf.mxu0 }
 0x41f   : > { %v3850_v43 = vpop.permute.xlu1 %3849  ;;  %v4330_v59 = vpop.f32.mrf.mxu1 }
 0x420   : > { %3919 = vst.msk [vmem:[#allocation4 + $0x278] sm:$0xff] %vm1040_vm5, %v3850_v43  ;;  %v3215_v63 = vpop.permute.xlu0 %3214  ;;  %v4683_v20 = vmul.f32 %v7754_v36, %v4554_v55 }
 0x421   : > { %3281 = vst.msk [vmem:[#allocation4 + $0x2b8] sm:$0xff] %vm1040_vm5, %v3215_v63 }
 0x422   : > { %4749 = vxpose.xlu1.b32.cont [5/16] (narrow) %v4717_v25, 32  ;;  %v4722_v19 = vadd.f32 %v7763_v2, %v4683_v20 }
 0x423   : > { %v3467_v50 = vpop.permute.xlu1 %3466 }
 0x424   : > { %3535 = vst.msk [vmem:[#allocation4 + $0x290] sm:$0xff] %vm654_vm3, %v3467_v50  ;;  %v2833_v9 = vpop.permute.xlu0 %2832 }
 0x425   : > { %2898 = vst.msk [vmem:[#allocation4 + $0x2d0] sm:$0xff] %vm654_vm3, %v2833_v9 }
 0x426   : > { %4750 = vxpose.xlu1.b32.cont [6/16] (narrow) %v4718_v30, 32 }
 0x427   : > { %v3660_v27 = vpop.permute.xlu1 %3659  ;;  %v4068_v42 = vld [vmem:[#allocation4 + $0x278] sm:$0xff] }
 0x428   : > { %3728 = vst.msk [vmem:[#allocation4 + $0x290] sm:$0xff] %vm847_vm4, %v3660_v27  ;;  %v3025_v38 = vpop.permute.xlu0 %3024  ;;  %4411 = vmatprep.mubr.f32.mxu1 %v4068_v42  ;;  %v4076_v59 = vld [vmem:[#allocation4 + $0x2b8] sm:$0xff]  ;;  %v4578_v27 = vpop.f32.mrf.mxu0 }
 0x429   : > { %3090 = vst.msk [vmem:[#allocation4 + $0x2d0] sm:$0xff] %vm847_vm4, %v3025_v38  ;;  %v4333_v24 = vpop.f32.mrf.mxu1  ;;  %4412 = vmatmul.mubr.f32.gmra.mxu1 %v4067_v54 }
 0x42a   : > { %4751 = vxpose.xlu1.b32.cont [7/16] (narrow) %v4719_v47, 32  ;;  %v4559_v0 = vadd.f32 %v4558_v49, %v4333_v24  ;;  %v4051_v49 = vld [vmem:[#allocation4 + $0x1f0] sm:$0xff]  ;;  %v5153_v20 = vpop.f32.mrf.mxu0 }
 0x42b   : > { %v3852_v11 = vpop.permute.xlu1 %3851  ;;  %v4335_v57 = vpop.f32.mrf.mxu1 }
 0x42c   : > { %3920 = vst.msk [vmem:[#allocation4 + $0x290] sm:$0xff] %vm1040_vm5, %v3852_v11  ;;  %v3217_v58 = vpop.permute.xlu0 %3216  ;;  %v4684_v34 = vmul.f32 %v7754_v36, %v4559_v0  ;;  %v4045_v57 = vld [vmem:[#allocation4 + $0x1c0] sm:$0xff] }
 0x42d   : > { %3282 = vst.msk [vmem:[#allocation4 + $0x2d0] sm:$0xff] %vm1040_vm5, %v3217_v58  ;;  %v4048_v58 = vld [vmem:[#allocation4 + $0x1d8] sm:$0xff]  ;;  %v4057_v0 = vld [vmem:[#allocation4 + $0x220] sm:$0xff] }
 0x42e   : > { %4752 = vxpose.xlu1.b32.cont [8/16] (narrow) %v4720_v32, 32  ;;  %v4723_v17 = vadd.f32 %v7763_v2, %v4684_v34 }
 0x42f   : > { %v3469_v51 = vpop.permute.xlu1 %3468 }
 0x430   : > { %3536 = vst.msk [vmem:[#allocation4 + $0x2a8] sm:$0xff] %vm654_vm3, %v3469_v51  ;;  %v2835_v53 = vpop.permute.xlu0 %2834 }
 0x431   : > { %2899 = vst.msk [vmem:[#allocation4 + $0x2e8] sm:$0xff] %vm654_vm3, %v2835_v53  ;;  %v4060_v53 = vld [vmem:[#allocation4 + $0x238] sm:$0xff] }
 0x432   : > { %4753 = vxpose.xlu1.b32.cont [9/16] (narrow) %v4721_v8, 32  ;;  %v4054_v8 = vld [vmem:[#allocation4 + $0x208] sm:$0xff] }
 0x433   : > { %v3662_v6 = vpop.permute.xlu1 %3661  ;;  %v4071_v4 = vld [vmem:[#allocation4 + $0x290] sm:$0xff] }
 0x434   : > { %3729 = vst.msk [vmem:[#allocation4 + $0x2a8] sm:$0xff] %vm847_vm4, %v3662_v6  ;;  %v3027_v35 = vpop.permute.xlu0 %3026  ;;  %4416 = vmatprep.mubr.f32.mxu1 %v4071_v4  ;;  %v4079_v40 = vld [vmem:[#allocation4 + $0x2d0] sm:$0xff]  ;;  %v4588_v6 = vpop.f32.mrf.mxu0 }
 0x435   : > { %3091 = vst.msk [vmem:[#allocation4 + $0x2e8] sm:$0xff] %vm847_vm4, %v3027_v35  ;;  %v4338_v10 = vpop.f32.mrf.mxu1  ;;  %4417 = vmatmul.mubr.f32.gmra.mxu1 %v4070_v61 }
 0x436   : > { %v4564_v26 = vadd.f32 %v5144_v22, %v4338_v10  ;;  %4754 = vxpose.xlu1.b32.cont [10/16] (narrow) %v4722_v19, 32  ;;  %v4063_v19 = vld [vmem:[#allocation4 + $0x250] sm:$0xff]  ;;  %v4066_v10 = vld [vmem:[#allocation4 + $0x268] sm:$0xff] }
 0x437   : > { %v3854_v14 = vpop.permute.xlu1 %3853  ;;  %v4340_v18 = vpop.f32.mrf.mxu1 }
 0x438   : > { %v4685_v5 = vmul.f32 %v7754_v36, %v4564_v26  ;;  %3921 = vst.msk [vmem:[#allocation4 + $0x2a8] sm:$0xff] %vm1040_vm5, %v3854_v14  ;;  %v3219_v37 = vpop.permute.xlu0 %3218  ;;  %v4069_v26 = vld [vmem:[#allocation4 + $0x280] sm:$0xff]  ;;  %v4075_v18 = vld [vmem:[#allocation4 + $0x2b0] sm:$0xff] }
 0x439   : > { %3283 = vst.msk [vmem:[#allocation4 + $0x2e8] sm:$0xff] %vm1040_vm5, %v3219_v37  ;;  %v4081_v37 = vld [vmem:[#allocation4 + $0x2e0] sm:$0xff] }
 0x43a   : > { %4755 = vxpose.xlu1.b32.cont [11/16] (narrow) %v4723_v17, 32  ;;  %v4724_v39 = vadd.f32 %v7763_v2, %v4685_v5  ;;  %v4072_v17 = vld [vmem:[#allocation4 + $0x298] sm:$0xff]  ;;  %v4078_v5 = vld [vmem:[#allocation4 + $0x2c8] sm:$0xff] }
 0x43b   : > { %v3471_v29 = vpop.permute.xlu1 %3470 }
 0x43c   : > { %3537 = vst.msk [vmem:[#allocation4 + $0x2c0] sm:$0xff] %vm654_vm3, %v3471_v29 }
 0x43e   : > { %4756 = vxpose.xlu1.b32.cont [12/16] (narrow) %v4724_v39, 32 }
 0x43f   : > { %v3664_v62 = vpop.permute.xlu1 %3663  ;;  %v4074_v3 = vld [vmem:[#allocation4 + $0x2a8] sm:$0xff] }
 0x440   : > { %3730 = vst.msk [vmem:[#allocation4 + $0x2c0] sm:$0xff] %vm847_vm4, %v3664_v62  ;;  %4421 = vmatprep.mubr.f32.mxu1 %v4074_v3  ;;  %v4082_v22 = vld [vmem:[#allocation4 + $0x2e8] sm:$0xff] }
 0x441   : > { %v4343_v46 = vpop.f32.mrf.mxu1  ;;  %4422 = vmatmul.mubr.f32.gmra.mxu1 %v4073_v15 }
 0x442   : > { %v4569_v33 = vadd.f32 %v4568_v56, %v4343_v46 }
 0x443   : > { %v3856_v7 = vpop.permute.xlu1 %3855  ;;  %v4345_v52 = vpop.f32.mrf.mxu1 }
 0x444   : > { %v4686_v13 = vmul.f32 %v7754_v36, %v4569_v33  ;;  %3922 = vst.msk [vmem:[#allocation4 + $0x2c0] sm:$0xff] %vm1040_vm5, %v3856_v7 }
 0x446   : > { %v4725_v21 = vadd.f32 %v7763_v2, %v4686_v13 }
 0x447   : > { %v3473_v1 = vpop.permute.xlu1 %3472 }
 0x448   : > { %3538 = vst.msk [vmem:[#allocation4 + $0x2d8] sm:$0xff] %vm654_vm3, %v3473_v1  ;;  %4757 = vxpose.xlu1.b32.cont [13/16] (narrow) %v4725_v21, 32 }
 0x44b   : > { %v3666_v45 = vpop.permute.xlu1 %3665  ;;  %v4077_v43 = vld [vmem:[#allocation4 + $0x2c0] sm:$0xff] }
 0x44c   : > { %3731 = vst.msk [vmem:[#allocation4 + $0x2d8] sm:$0xff] %vm847_vm4, %v3666_v45  ;;  %4426 = vmatprep.mubr.f32.mxu1 %v4077_v43 }
 0x44d   : > { %v4348_v25 = vpop.f32.mrf.mxu1  ;;  %4427 = vmatmul.mubr.f32.gmra.mxu1 %v4076_v59 }
 0x44e   : > { %v4574_v28 = vadd.f32 %v5147_v44, %v4348_v25  ;;  %v4084_v44 = vld [vmem:[#allocation4 + $0x2f8] sm:$0xff] }
 0x44f   : > { %v3858_v12 = vpop.permute.xlu1 %3857  ;;  %v4350_v63 = vpop.f32.mrf.mxu1 }
 0x450   : > { %v4687_v60 = vmul.f32 %v7754_v36, %v4574_v28  ;;  %3923 = vst.msk [vmem:[#allocation4 + $0x2d8] sm:$0xff] %vm1040_vm5, %v3858_v12 }
 0x452   : > { %v4726_v50 = vadd.f32 %v7763_v2, %v4687_v60 }
 0x453   : > { %v3475_v30 = vpop.permute.xlu1 %3474 }
 0x454   : > { %3539 = vst.msk [vmem:[#allocation4 + $0x2f0] sm:$0xff] %vm654_vm3, %v3475_v30  ;;  %4758 = vxpose.xlu1.b32.cont [14/16] (narrow) %v4726_v50, 32  ;;  %v5236_v30 = vld [vmem:[%s5590_s17] sm:$0xff] }
 0x457   : > { %v3668_v23 = vpop.permute.xlu1 %3667  ;;  %v4080_v9 = vld [vmem:[#allocation4 + $0x2d8] sm:$0xff] }
 0x458   : > { %3732 = vst.msk [vmem:[#allocation4 + $0x2f0] sm:$0xff] %vm847_vm4, %v3668_v23  ;;  %4431 = vmatprep.mubr.f32.mxu1 %v4080_v9 }
 0x459   : > { %v4353_v42 = vpop.f32.mrf.mxu1  ;;  %4432 = vmatmul.mubr.f32.gmra.mxu1 %v4079_v40 }
 0x45a   : > { %v4579_v47 = vadd.f32 %v4578_v27, %v4353_v42 }
 0x45b   : > { %v3860_v31 = vpop.permute.xlu1 %3859  ;;  %v4355_v16 = vpop.f32.mrf.mxu1 }
 0x45c   : > { %v4688_v38 = vmul.f32 %v7754_v36, %v4579_v47  ;;  %3924 = vst.msk [vmem:[#allocation4 + $0x2f0] sm:$0xff] %vm1040_vm5, %v3860_v31 }
 0x45e   : > { %v4727_v54 = vadd.f32 %v7763_v2, %v4688_v38 }
 0x460   : > { %4759 = vxpose.xlu1.b32.cont [15/16] (narrow) %v4727_v54, 32 }
 0x463   : > { %v4083_v24 = vld [vmem:[#allocation4 + $0x2f0] sm:$0xff] }
 0x464   : > { %4436 = vmatprep.mubr.f32.mxu1 %v4083_v24 }
 0x465   : > { %v4358_v11 = vpop.f32.mrf.mxu1  ;;  %4437 = vmatmul.mubr.f32.gmra.mxu1 %v4082_v22 }
 0x466   : > { %v4584_v32 = vadd.f32 %v5150_v48, %v4358_v11  ;;  %5154 = vmatprep.mubr.msk.f32.mxu1 %vm285_vm0, %v4045_v57 }
 0x467   : > { %v4360_v41 = vpop.f32.mrf.mxu1 }
 0x468   : > { %v4689_v55 = vmul.f32 %v7754_v36, %v4584_v32 }
 0x469   : > { %5155 = vmatmul.mubr.msk.f32.vlgmr.msra.gmra.mxu1 %vm285_vm0, %v4048_v58 }
 0x46a   : > { %v4728_v51 = vadd.f32 %v7763_v2, %v4689_v55  ;;  %5157 = vmatprep.mubr.msk.f32.mxu1 %vm285_vm0, %v4051_v49  ;;  %v5237_v49 = vld [vmem:[%s5590_s17 + $0x10] sm:$0xff] }
 0x46c   : > { %4760 = vxpose.xlu1.b32.end [16/16] (narrow) %v4728_v51, 32 }
 0x46d   : > { %5158 = vmatmul.mubr.msk.f32.gmra.mxu1 %vm285_vm0, %v4054_v8 }
 0x46e   : > { %5160 = vmatprep.mubr.msk.f32.mxu1 %vm285_vm0, %v4057_v0 }
 0x471   : > { %v4363_v4 = vpop.f32.mrf.mxu1  ;;  %5161 = vmatmul.mubr.msk.f32.gmra.mxu1 %vm285_vm0, %v4060_v53 }
 0x472   : > { %v4589_v34 = vadd.f32 %v4588_v6, %v4363_v4  ;;  %5163 = vmatprep.mubr.msk.f32.mxu1 %vm285_vm0, %v4063_v19 }
 0x473   : > { %v4365_v35 = vpop.f32.mrf.mxu1 }
 0x474   : > { %v4690_v61 = vmul.f32 %v7754_v36, %v4589_v34  ;;  %v5238_v35 = vld [vmem:[%s5590_s17 + $0x20] sm:$0xff] }
 0x475   : > { %5164 = vmatmul.mubr.msk.f32.gmra.mxu1 %vm285_vm0, %v4066_v10 }
 0x476   : > { %v4729_v14 = vadd.f32 %v7763_v2, %v4690_v61  ;;  %5166 = vmatprep.mubr.msk.f32.mxu1 %vm285_vm0, %v4069_v26 }
 0x478   : > { %4777 = vxpose.xlu0.b32.start [1/16] (narrow) %v4729_v14, 32 }
 0x479   : > { %5167 = vmatmul.mubr.msk.f32.gmra.mxu1 %vm285_vm0, %v4072_v17 }
 0x47a   : > { %5169 = vmatprep.mubr.msk.f32.mxu1 %vm285_vm0, %v4075_v18 }
 0x47d   : > { %v4368_v29 = vpop.f32.mrf.mxu1  ;;  %5170 = vmatmul.mubr.msk.f32.gmra.mxu1 %vm285_vm0, %v4078_v5 }
 0x47e   : > { %v4594_v39 = vadd.f32 %v5153_v20, %v4368_v29  ;;  %5172 = vmatprep.mubr.msk.f32.mxu1 %vm285_vm0, %v4081_v37  ;;  %v5239_v37 = vld [vmem:[%s5590_s17 + $0x30] sm:$0xff] }
 0x47f   : > { %v4370_v62 = vpop.f32.mrf.mxu1 }
 0x480   : > { %v4691_v3 = vmul.f32 %v7754_v36, %v4594_v39 }
 0x481   : > { %5173 = vmatmul.mubr.msk.f32.gmra.mxu1 %vm285_vm0, %v4084_v44 }
 0x482   : > { %v4730_v15 = vadd.f32 %v7763_v2, %v4691_v3 }
 0x484   : > { %4778 = vxpose.xlu0.b32.cont [2/16] (narrow) %v4730_v15, 32 }
 0x489   : > { %v4373_v56 = vpop.f32.mrf.mxu1 }
 0x48b   : > { %v4375_v46 = vpop.f32.mrf.mxu1 }
 0x495   : > { %v4378_v33 = vpop.f32.mrf.mxu1 }
 0x497   : > { %v4380_v7 = vpop.f32.mrf.mxu1 }
 0x4a1   : > { %v4383_v52 = vpop.f32.mrf.mxu1 }
 0x4a3   : > { %v4385_v13 = vpop.f32.mrf.mxu1 }
 0x4ac   : > { %v4761_v50 = vpop.trf.xlu1 }
 0x4ad   : > { %v4388_v21 = vpop.f32.mrf.mxu1  ;;  %v4809_v48 = vadd.f32 %v5236_v30, %v4761_v50 }
 0x4af   : > { %v4390_v1 = vpop.f32.mrf.mxu1  ;;  %v4817_v9 = vmax.f32 %v4809_v48, 0.0 }
 0x4b0   : > { %v4762_v41 = vpop.trf.xlu1 }
 0x4b1   : > { %4825 = vst [vmem:[%s7864_s18] sm:$0xff] %v4817_v9  ;;  %v4811_v51 = vadd.f32 %v5237_v49, %v4762_v41 }
 0x4b3   : > { %v4819_v0 = vmax.f32 %v4811_v51, 0.0 }
 0x4b4   : > { %v4763_v6 = vpop.trf.xlu1 }
 0x4b5   : > { %4827 = vst [vmem:[%s7864_s18 + $0x10] sm:$0xff] %v4819_v0  ;;  %v4813_v61 = vadd.f32 %v5238_v35, %v4763_v6  ;;  %v5241_v6 = vld [vmem:[%s5590_s17 + $0x18] sm:$0xff] }
 0x4b7   : > { %v4821_v26 = vmax.f32 %v4813_v61, 0.0 }
 0x4b8   : > { %v4764_v14 = vpop.trf.xlu1 }
 0x4b9   : > { %v4393_v45 = vpop.f32.mrf.mxu1  ;;  %4829 = vst [vmem:[%s7864_s18 + $0x20] sm:$0xff] %v4821_v26  ;;  %v4815_v29 = vadd.f32 %v5239_v37, %v4764_v14 }
 0x4bb   : > { %v4395_v43 = vpop.f32.mrf.mxu1  ;;  %v4823_v44 = vmax.f32 %v4815_v29, 0.0 }
 0x4bd   : > { %4831 = vst [vmem:[%s7864_s18 + $0x30] sm:$0xff] %v4823_v44 }
 0x4c5   : > { %v7852_v59 = vpop.f32.mrf.mxu1 }
 0x4c7   : > { %v4400_v25 = vpop.f32.mrf.mxu1 }
 0x4d1   : > { %v7854_v28 = vpop.f32.mrf.mxu1 }
 0x4d3   : > { %v4405_v12 = vpop.f32.mrf.mxu1 }
 0x4dd   : > { %v7856_v63 = vpop.f32.mrf.mxu1 }
 0x4df   : > { %v4410_v60 = vpop.f32.mrf.mxu1 }
 0x4e9   : > { %v7862_v23 = vpop.f32.mrf.mxu1 }
 0x4eb   : > { %v4415_v40 = vpop.f32.mrf.mxu1 }
 0x4f5   : > { %v7867_v27 = vpop.f32.mrf.mxu1 }
 0x4f7   : > { %v4420_v42 = vpop.f32.mrf.mxu1 }
 0x501   : > { %v7869_v47 = vpop.f32.mrf.mxu1 }
 0x503   : > { %v4425_v31 = vpop.f32.mrf.mxu1 }
 0x50d   : > { %v7871_v16 = vpop.f32.mrf.mxu1 }
 0x50f   : > { %v4430_v38 = vpop.f32.mrf.mxu1 }
 0x519   : > { %v7873_v54 = vpop.f32.mrf.mxu1 }
 0x51b   : > { %v4435_v24 = vpop.f32.mrf.mxu1 }
 0x525   : > { %v7875_v22 = vpop.f32.mrf.mxu1 }
 0x527   : > { %v4440_v11 = vpop.f32.mrf.mxu1 }
 0x529   : > { %v5156_v57 = vpop.f32.mrf.mxu1 }
 0x52a   : > { %v4604_v55 = vadd.f32 %v5156_v57, %v4378_v33 }
 0x52b   : > { %v4598_v32 = vpop.f32.mrf.mxu1 }
 0x52c   : > { %v4599_v58 = vadd.f32 %v4598_v32, %v4373_v56  ;;  %v4693_v4 = vmul.f32 %v7754_v36, %v4604_v55 }
 0x52d   : > { %v5159_v8 = vpop.f32.mrf.mxu1 }
 0x52e   : > { %v4692_v20 = vmul.f32 %v7754_v36, %v4599_v58  ;;  %v4732_v18 = vadd.f32 %v7763_v2, %v4693_v4  ;;  %v4614_v17 = vadd.f32 %v5159_v8, %v4388_v21 }
 0x52f   : > { %v4608_v53 = vpop.f32.mrf.mxu1 }
 0x530   : > { %v4731_v19 = vadd.f32 %v7763_v2, %v4692_v20  ;;  %v4609_v34 = vadd.f32 %v4608_v53, %v4383_v52  ;;  %v4695_v62 = vmul.f32 %v7754_v36, %v4614_v17  ;;  %v5240_v20 = vld [vmem:[%s5590_s17 + $0x8] sm:$0xff] }
 0x531   : > { %v5162_v10 = vpop.f32.mrf.mxu1 }
 0x532   : > { %4779 = vxpose.xlu0.b32.cont [3/16] (narrow) %v4731_v19, 32  ;;  %v4694_v5 = vmul.f32 %v7754_v36, %v4609_v34  ;;  %v4734_v46 = vadd.f32 %v7763_v2, %v4695_v62  ;;  %v4624_v33 = vadd.f32 %v5162_v10, %v7852_v59  ;;  %v5242_v34 = vld [vmem:[%s5590_s17 + $0x28] sm:$0xff]  ;;  %v5243_v10 = vld [vmem:[%s5590_s17 + $0x38] sm:$0xff]  ;;  %s5310_s17 = smov [#allocation5]  }
 0x533   : > { %v4618_v39 = vpop.f32.mrf.mxu1  ;;  %s5248_s9 = sshll.u32 %s5310_s17, 4  ;;  %s5249_s9 = int_to_ptr.vmem [resolvable:$false] %s5248_s9 }
 0x534   : > { %v4733_v3 = vadd.f32 %v7763_v2, %v4694_v5  ;;  %v4619_v15 = vadd.f32 %v4618_v39, %v4393_v45  ;;  %v4697_v13 = vmul.f32 %v7754_v36, %v4624_v33  ;;  %s5250_s20 = scalar_lea.vmem %s5249_s9, 2048  ;;  %p5251_p0 = scmp.lt.s32.totalorder %s7934_s21, %s5249_s9 }
 0x535   : > { %v5165_v56 = vpop.f32.mrf.mxu1  ;;  %p5252_p1 = scmp.lt.s32.totalorder %s5250_s20, %s5244_s28 }
 0x536   : > { %4780 = vxpose.xlu0.b32.cont [4/16] (narrow) %v4732_v18, 32  ;;  %v4696_v7 = vmul.f32 %v7754_v36, %v4619_v15  ;;  %v4736_v45 = vadd.f32 %v7763_v2, %v4697_v13  ;;  %v4634_v25 = vadd.f32 %v5165_v56, %v7856_v63 }
 0x537   : > { %v4628_v52 = vpop.f32.mrf.mxu1  ;;  %p5253_p2 = por %p5252_p1, %p5251_p0 }
 0x538   : > { %v4735_v21 = vadd.f32 %v7763_v2, %v4696_v7  ;;  %v4629_v1 = vadd.f32 %v4628_v52, %v7854_v28  ;;  %v4699_v59 = vmul.f32 %v7754_v36, %v4634_v25 }
 0x539   : > { %v5168_v43 = vpop.f32.mrf.mxu1  ;;  %p5254_p3 = pnand %p5253_p2, %p5247_p13 }
 0x53a   : > { %4781 = vxpose.xlu0.b32.cont [5/16] (narrow) %v4733_v3, 32  ;;  %v4698_v12 = vmul.f32 %v7754_v36, %v4629_v1  ;;  %v4738_v28 = vadd.f32 %v7763_v2, %v4699_v59  ;;  %v4644_v9 = vadd.f32 %v5168_v43, %v7867_v27 }
 0x53b   : > { %v4638_v60 = vpop.f32.mrf.mxu1 }
 0x53c   : > { %v4737_v50 = vadd.f32 %v7763_v2, %v4698_v12  ;;  %v4639_v30 = vadd.f32 %v4638_v60, %v7862_v23  ;;  %v4701_v63 = vmul.f32 %v7754_v36, %v4644_v9 }
 0x53d   : > { %v5171_v48 = vpop.f32.mrf.mxu1 }
 0x53e   : > { %4782 = vxpose.xlu0.b32.cont [6/16] (narrow) %v4734_v46, 32  ;;  %v4700_v40 = vmul.f32 %v7754_v36, %v4639_v30  ;;  %v4740_v23 = vadd.f32 %v7763_v2, %v4701_v63  ;;  %v4654_v11 = vadd.f32 %v5171_v48, %v7871_v16 }
 0x53f   : > { %v4648_v42 = vpop.f32.mrf.mxu1 }
 0x540   : > { %v4739_v31 = vadd.f32 %v7763_v2, %v4700_v40  ;;  %v4649_v38 = vadd.f32 %v4648_v42, %v7869_v47  ;;  %v4703_v27 = vmul.f32 %v7754_v36, %v4654_v11 }
 0x541   : > { %v5174_v24 = vpop.f32.mrf.mxu1 }
 0x542   : > { %4783 = vxpose.xlu0.b32.cont [7/16] (narrow) %v4735_v21, 32  ;;  %v4702_v57 = vmul.f32 %v7754_v36, %v4649_v38  ;;  %v4742_v47 = vadd.f32 %v7763_v2, %v4703_v27  ;;  %v4664_v58 = vadd.f32 %v5174_v24, %v7875_v22 }
 0x543   : > { %v4658_v32 = vpop.f32.mrf.mxu1 }
 0x544   : > { %v4741_v41 = vadd.f32 %v7763_v2, %v4702_v57  ;;  %v4659_v55 = vadd.f32 %v4658_v32, %v7873_v54  ;;  %v4705_v49 = vmul.f32 %v7754_v36, %v4664_v58 }
 0x546   : > { %4784 = vxpose.xlu0.b32.cont [8/16] (narrow) %v4736_v45, 32  ;;  %v4704_v16 = vmul.f32 %v7754_v36, %v4659_v55  ;;  %v4744_v8 = vadd.f32 %v7763_v2, %v4705_v49 }
 0x548   : > { %v4743_v51 = vadd.f32 %v7763_v2, %v4704_v16 }
 0x54a   : > { %4785 = vxpose.xlu0.b32.cont [9/16] (narrow) %v4737_v50, 32 }
 0x54e   : > { %4786 = vxpose.xlu0.b32.cont [10/16] (narrow) %v4738_v28, 32 }
 0x552   : > { %4787 = vxpose.xlu0.b32.cont [11/16] (narrow) %v4739_v31, 32 }
 0x556   : > { %4788 = vxpose.xlu0.b32.cont [12/16] (narrow) %v4740_v23, 32 }
 0x55a   : > { %4789 = vxpose.xlu0.b32.cont [13/16] (narrow) %v4741_v41, 32 }
 0x55e   : > { %4790 = vxpose.xlu0.b32.cont [14/16] (narrow) %v4742_v47, 32 }
 0x562   : > { %4791 = vxpose.xlu0.b32.cont [15/16] (narrow) %v4743_v51, 32 }
 0x566   : > { %4792 = vxpose.xlu0.b32.end [16/16] (narrow) %v4744_v8, 32 }
 0x5a6   : > { %v4793_v54 = vpop.trf.xlu0 }
 0x5a7   : > { %v4810_v0 = vadd.f32 %v5240_v20, %v4793_v54 }
 0x5a9   : > { %v4818_v22 = vmax.f32 %v4810_v0, 0.0 }
 0x5aa   : > { %v4794_v53 = vpop.trf.xlu0 }
 0x5ab   : > { %4826 = vst [vmem:[%s7864_s18 + $0x8] sm:$0xff] %v4818_v22  ;;  %v4812_v4 = vadd.f32 %v5241_v6, %v4794_v53 }
 0x5ad   : > { %v4820_v36 = vmax.f32 %v4812_v4, 0.0 }
 0x5ae   : > { %v4795_v19 = vpop.trf.xlu0 }
 0x5af   : > { %4828 = vst [vmem:[%s7864_s18 + $0x18] sm:$0xff] %v4820_v36  ;;  %v4814_v2 = vadd.f32 %v5242_v34, %v4795_v19 }
 0x5b1   : > { %v4822_v35 = vmax.f32 %v4814_v2, 0.0 }
 0x5b2   : > { %v4796_v61 = vpop.trf.xlu0 }
 0x5b3   : > { %4830 = vst [vmem:[%s7864_s18 + $0x28] sm:$0xff] %v4822_v35  ;;  %v4816_v26 = vadd.f32 %v5243_v10, %v4796_v61 }
 0x5b5   : > { %v4824_v14 = vmax.f32 %v4816_v26, 0.0 }
 0x5b7   : > { %4832 = vst [vmem:[%s7864_s18 + $0x38] sm:$0xff] %v4824_v14 }
 0x5b8   : > { %5257 = shalt.err (!%p5254_p3)
}
 0x5b9   : > { %s5258_s15 = scalar_lea.hbm %s7932_s29, 1024  ;;  %s5262_s16 = scalar_lea.hbm %s7986_s7, 2048 }
 0x5ba   : > { %p5259_p4 = scmp.ne.s32.totalorder %s7932_s29, %s5258_s15  ;;  %p5263_p9 = scmp.lt.s32.totalorder %s7932_s29, %s7986_s7 }
 0x5bb   : > { %p5264_p10 = scmp.lt.s32.totalorder %s5262_s16, %s5258_s15 }
 0x5bc   : > { %p5260_p7 = pnand %p5259_p4, %p5391_p5 }
 0x5bd   : > { %p5265_p11 = por %p5264_p10, %p5263_p9 }
 0x5be   : > { %p5261_p8 = pneg %p5260_p7 }
 0x5c0   : > { %p5266_p12 = pnand %p5265_p11, %p5261_p8 }
 0x5c2   : > { %5269 = shalt.err (!%p5266_p12)
}
 0x5c3   : > { %s5311_s22 = smov 256   ;;  %s5312_s23 = smov 16  }
 0x5c4   : > { %5183 = dma.vmem_to_hbm [thread:$0]  (%p5391_p5), %s7934_s21, 1024, %s7932_s29, %s7939_s8, %s5311_s22, %s5311_s22, %s5312_s23  }
 0x5c5 PF: > { %p5189_p13 = scmp.ge.s32.totalorder %s5304_s27, 2  ;;  %s4862_s28 = sand.u32 1, %s5292_s24  }
 0x5c6   : > { %s4863_s17 = scalar_lea.sflag [#allocation6], %s4862_s28 }
 0x5c7   : > { %p5186_p0 = pnand %p5189_p13, %p5395_p6 }
 0x5c9   : > { %p5187_p1 = pneg %p5186_p0 }
 0x5cb   : > { %5287 = dma.done.wait (%p5187_p1), %s4863_s17, 1024  }
 0x5cc   : > { %5289 = vsyncadd (%p5187_p1), %s4863_s17, 4294966272  ;;  %p17_p2 = scmp.ge.s32.totalorder %s5378_s30, 4   ;;  %s8038_s24 = smov %s5296_s25 }
 0x5cd   : > { %s8039_s25 = smov %s5300_s26  ;;  %s8040_s26 = smov %s5389_s10 }
 0x5ce   : > { %s8041_s27 = smov %s5378_s30  ;;  %19 = sbr.rel (!%p17_p2) target bundleno = 3 (0x3), region = 89 }
 0x5d3   :  { %4868 = vsyncpa [#allocation6], 1 }
 0x5d4   :  { %4870 = vsyncpa [#allocation6 + $0x1], 1 }

</bundles_post_ra>
